<compile_context>
chip_gen: v7x
topology: tpu7x:2x2x1
jax: 0.10.0
libtpu: 0.0.40
codegen_flags: <defaults>
</compile_context>

<pallas_src>
import jax
import jax.numpy as jnp
from jax import lax
from jax.experimental import pallas as pl
from jax.experimental.pallas import tpu as pltpu


# ----------------------------- Pallas kernels ------------------------------


def _conv_pool_kernel(p_ref, w_ref, b_ref, o_ref):
    """Fused conv-as-GEMM + bias + ReLU + 2x2/stride-2 max-pool.

    p_ref: (4, Q, K)  im2col patches grouped by pool-window corner g = gi*2 + gj,
                      row r = b*Hp*Wp + ip*Wp + jp (one row per *pooled* pixel).
    w_ref: (K, N)     GEMM weights (K = Cin*kh*kw zero-padded, N = Cout zero-padded).
    b_ref: (1, N)     bias (zero-padded).
    o_ref: (Q, N)     pooled activations, channels-last, lane-dense (N = 128).
    """
    w = w_ref[...]
    m = jnp.dot(p_ref[0], w, preferred_element_type=jnp.float32)
    for g in range(1, 4):  # max over the four 2x2-window corners -> pool fused into GEMM
        m = jnp.maximum(m, jnp.dot(p_ref[g], w, preferred_element_type=jnp.float32))
    # Bias is corner-independent and ReLU is monotone, so
    # maxpool(ReLU(conv + b)) == ReLU(max_g(conv_g) + b).
    o_ref[...] = jnp.maximum(m + b_ref[...], 0.0).astype(o_ref.dtype)


def _fc_chain_kernel(z_ref, w1_ref, b1_ref, w2_ref, b2_ref, w3_ref, b3_ref, o_ref):
    """fc1+ReLU -> fc2+ReLU -> fc3, activations stay resident in VMEM/vregs."""
    h = jnp.dot(z_ref[...], w1_ref[...], preferred_element_type=jnp.float32) + b1_ref[...]
    h = jnp.maximum(h, 0.0)
    h = jnp.dot(h, w2_ref[...], preferred_element_type=jnp.float32) + b2_ref[...]
    h = jnp.maximum(h, 0.0)
    o_ref[...] = (
        jnp.dot(h, w3_ref[...], preferred_element_type=jnp.float32) + b3_ref[...]
    ).astype(o_ref.dtype)


# ----------------------------- Pallas wrappers ------------------------------


def _vmem_spec():
    # Whole array resident in VMEM, single-shot (no grid / no pipelining needed at
    # these sizes: largest operand is ~0.8 MiB, far below every generation's limit).
    return pl.BlockSpec(memory_space=pltpu.MemorySpace.VMEM)


def _conv_pool_stage(patches, w, b):
    _, q, _ = patches.shape
    n = w.shape[1]
    return pl.pallas_call(
        _conv_pool_kernel,
        out_shape=jax.ShapeDtypeStruct((q, n), jnp.float32),
        in_specs=[_vmem_spec(), _vmem_spec(), _vmem_spec()],
        out_specs=_vmem_spec(),
    )(patches, w, b)


def _fc_chain(z, fw1, fb1, fw2, fb2, fw3, fb3):
    m = z.shape[0]
    n = fw3.shape[1]
    return pl.pallas_call(
        _fc_chain_kernel,
        out_shape=jax.ShapeDtypeStruct((m, n), jnp.float32),
        in_specs=[_vmem_spec()] * 7,
        out_specs=_vmem_spec(),
    )(z, fw1, fb1, fw2, fb2, fw3, fb3)


# ------------------------------- forward glue -------------------------------


def _pool_grouped_patches(x_nchw, kh, kw, k_pad):
    """im2col patches for a VALID stride-1 conv, rows grouped by 2x2-pool corner.

    Returns (4, B*Hp*Wp, k_pad): entry [gi*2+gj, b*Hp*Wp + ip*Wp + jp, :] is the
    Cin*kh*kw patch at conv-output position (2*ip+gi, 2*jp+gj), zero-padded to k_pad.
    """
    b, c, h, w = x_nchw.shape
    ho, wo = h - kh + 1, w - kw + 1
    hp, wp = ho // 2, wo // 2
    # Guard the even-spatial assumption of the fused 2x2 pool (review concern).
    assert ho == 2 * hp and wo == 2 * wp, (ho, wo)
    k = c * kh * kw
    # Single XLA op instead of a 25-slice python loop; exact copies (identity filter).
    pat = lax.conv_general_dilated_patches(
        x_nchw, (kh, kw), (1, 1), "VALID", precision=lax.Precision.HIGHEST
    )                                                # (B, K, Ho, Wo)
    pat = pat.reshape(b, k, hp, 2, wp, 2)            # ho = 2*ip + gi, wo = 2*jp + gj
    pat = pat.transpose(3, 5, 0, 2, 4, 1)            # (gi, gj, B, Hp, Wp, K)
    pat = pat.reshape(4, b * hp * wp, k)
    return jnp.pad(pat, ((0, 0), (0, 0), (0, k_pad - k)))


# --------------------------- one-time parameter prep -------------------------


def _round_up(n, m):
    return ((n + m - 1) // m) * m


def _patch_feature_perm(cin, kh, kw):
    """Map conv_general_dilated_patches' feature index -> PyTorch (ci, dy, dx) flat index."""
    probe = jnp.arange(cin * kh * kw, dtype=jnp.float32).reshape(1, cin, kh, kw)
    pat = lax.conv_general_dilated_patches(
        probe, (kh, kw), (1, 1), "VALID", precision=lax.Precision.HIGHEST
    )
    return jnp.round(pat.reshape(cin * kh * kw)).astype(jnp.int32)


def _prep_conv(w, bias, lane=128):
    """Torch conv weight (Cout,Cin,kh,kw) -> lane-dense GEMM weight (K_pad,N_pad) + bias (1,N_pad)."""
    cout, cin, kh, kw = w.shape
    k = cin * kh * kw
    kp, npad = _round_up(k, lane), _round_up(cout, lane)
    perm = _patch_feature_perm(cin, kh, kw)          # align rows with patch feature order
    wm = w.reshape(cout, k)[:, perm].T               # (K, Cout)
    wm = jnp.pad(wm, ((0, kp - k), (0, npad - cout)))
    bm = jnp.pad(bias, (0, npad - cout)).reshape(1, npad)
    return wm, bm


def _prep_fc(w, bias, k_pad, lane=128):
    """Torch linear weight (N,K) -> lane-dense GEMM weight (k_pad,N_pad) + bias (1,N_pad)."""
    n, k = w.shape
    npad = _round_up(n, lane)
    wm = jnp.pad(w.T, ((0, k_pad - k), (0, npad - n)))
    bm = jnp.pad(bias, (0, npad - n)).reshape(1, npad)
    return wm, bm


def prepare_params(p):
    """One-time layout/permutation/padding of PyTorch-style params (hoisted out of forward)."""
    w1, b1 = _prep_conv(p["conv1_w"], p["conv1_b"])              # (128, 128), (1, 128)
    w2, b2 = _prep_conv(p["conv2_w"], p["conv2_b"])              # (256, 128), (1, 128)
    fw1, fb1 = _prep_fc(p["fc1_w"], p["fc1_b"], k_pad=_round_up(16 * 5 * 5, 128))  # (512,128)
    fw2, fb2 = _prep_fc(p["fc2_w"], p["fc2_b"], k_pad=_round_up(120, 128))         # (128,128)
    fw3, fb3 = _prep_fc(p["fc3_w"], p["fc3_b"], k_pad=_round_up(84, 128))          # (128,128)
    return {
        "conv1_w": w1, "conv1_b": b1,
        "conv2_w": w2, "conv2_b": b2,
        "fc1_w": fw1, "fc1_b": fb1,
        "fc2_w": fw2, "fc2_b": fb2,
        "fc3_w": fw3, "fc3_b": fb3,
    }


# ------------------------------- LeNet forward -------------------------------


def lenet_forward(x, p, *, num_classes=10):
    """LeNet forward. x: NCHW (B, 3, 32, 32) float32; p = prepare_params(raw_params)."""
    assert x.shape[1:] == (3, 32, 32), x.shape
    bsz = x.shape[0]

    # stage 1: conv1(5x5) + bias + ReLU + maxpool2   (one fused Pallas kernel)
    p1 = _pool_grouped_patches(x, 5, 5, p["conv1_w"].shape[0])        # (4, B*14*14, 128)
    a1 = _conv_pool_stage(p1, p["conv1_w"], p["conv1_b"])             # (B*14*14, 128); ch 0..5 valid

    # stage 2: conv2(5x5) + bias + ReLU + maxpool2   (one fused Pallas kernel)
    a1 = a1.reshape(bsz, 14, 14, 128)[:, :, :, :6].transpose(0, 3, 1, 2)   # NCHW (B, 6, 14, 14)
    p2 = _pool_grouped_patches(a1, 5, 5, p["conv2_w"].shape[0])       # (4, B*5*5, 256)
    a2 = _conv_pool_stage(p2, p["conv2_w"], p["conv2_b"])             # (B*5*5, 128); ch 0..15 valid

    # flatten exactly like torch's x.view(-1, 16*5*5): per batch, (c, ih, iw) order
    z = a2.reshape(bsz, 25, 128)[:, :, :16].transpose(0, 2, 1).reshape(bsz, 400)
    z = jnp.pad(z, ((0, 0), (0, p["fc1_w"].shape[0] - 400)))          # (B, 512), lane-dense K

    # stage 3: fc1+ReLU -> fc2+ReLU -> fc3            (one fused Pallas kernel)
    out = _fc_chain(z, p["fc1_w"], p["fc1_b"], p["fc2_w"], p["fc2_b"],
                    p["fc3_w"], p["fc3_b"])                           # (B, 128), cols >=10 are 0
    return out[:, :num_classes]


# --------------------------- init & pure-JAX reference -----------------------


def init_lenet_params(key, num_classes=10):
    ks = jax.random.split(key, 10)

    def u(k, shape, fan_in):
        bound = 1.0 / jnp.sqrt(jnp.float32(fan_in))
        return jax.random.uniform(k, shape, jnp.float32, -bound, bound)

    return {
        "conv1_w": u(ks[0], (6, 3, 5, 5), 3 * 5 * 5),
        "conv1_b": u(ks[1], (6,), 3 * 5 * 5),
        "conv2_w": u(ks[2], (16, 6, 5, 5), 6 * 5 * 5),
        "conv2_b": u(ks[3], (16,), 6 * 5 * 5),
        "fc1_w": u(ks[4], (120, 16 * 5 * 5), 16 * 5 * 5),
        "fc1_b": u(ks[5], (120,), 16 * 5 * 5),
        "fc2_w": u(ks[6], (84, 120), 120),
        "fc2_b": u(ks[7], (84,), 120),
        "fc3_w": u(ks[8], (num_classes, 84), 84),
        "fc3_b": u(ks[9], (num_classes,), 84),
    }


def lenet_reference(x, p):
    """Pure-JAX (XLA) LeNet, used only to validate the Pallas path."""
    y = lax.conv(x, p["conv1_w"], (1, 1), "VALID") + p["conv1_b"][None, :, None, None]
    y = lax.reduce_window(jnp.maximum(y, 0.0), -jnp.inf, lax.max,
                          (1, 1, 2, 2), (1, 1, 2, 2), "VALID")
    y = lax.conv(y, p["conv2_w"], (1, 1), "VALID") + p["conv2_b"][None, :, None, None]
    y = lax.reduce_window(jnp.maximum(y, 0.0), -jnp.inf, lax.max,
                          (1, 1, 2, 2), (1, 1, 2, 2), "VALID")
    y = y.reshape(y.shape[0], -1)
    y = jnp.maximum(y @ p["fc1_w"].T + p["fc1_b"], 0.0)
    y = jnp.maximum(y @ p["fc2_w"].T + p["fc2_b"], 0.0)
    return y @ p["fc3_w"].T + p["fc3_b"]


if __name__ == "__main__":
    key = jax.random.PRNGKey(0)
    k_in, k_param = jax.random.split(key)

    # LeNet's 16*5*5 flatten implies 3x32x32 input; batch = 2.
    x = jax.random.normal(k_in, (2, 3, 32, 32), dtype=jnp.float32)
    raw_params = init_lenet_params(k_param)

    # One-time weight layout/permutation/padding, outside the jitted forward.
    params = prepare_params(raw_params)

    fwd = jax.jit(lenet_forward)
    out = jax.block_until_ready(fwd(x, params))

    assert out.shape == (2, 10), out.shape
    assert out.dtype == jnp.float32

    # Validate forward-pass semantics against a pure-JAX LeNet reference.
    ref = jax.block_until_ready(jax.jit(lenet_reference)(x, raw_params))
    max_err = float(jnp.max(jnp.abs(out - ref)))
    assert max_err < 2e-2, f"mismatch vs reference: max abs err = {max_err}"

    print("KERNEL_OK")
</pallas_src>

<mosaic_0001>
module attributes {stable_mosaic.version = 11 : i64} {
  func.func @_conv_pool_kernel(%arg0: memref<4x392x128xf32, #tpu.memory_space<vmem>>, %arg1: memref<128x128xf32, #tpu.memory_space<vmem>>, %arg2: memref<1x128xf32, #tpu.memory_space<vmem>>, %arg3: memref<392x128xf32, #tpu.memory_space<vmem>>) attributes {dimension_semantics = [], scalar_prefetch = 0 : i64, scratch_operands = 0 : i64, tpu.core_type = #tpu.core_type<tc>} {
    %c0 = arith.constant 0 : index
    %c0_0 = arith.constant 0 : index
    %0 = vector.load %arg1[%c0, %c0_0] : memref<128x128xf32, #tpu.memory_space<vmem>>, vector<128x128xf32>
    %c0_1 = arith.constant 0 : index
    %c0_2 = arith.constant 0 : index
    %c0_3 = arith.constant 0 : index
    %1 = vector.load %arg0[%c0_1, %c0_2, %c0_3] : memref<4x392x128xf32, #tpu.memory_space<vmem>>, vector<1x392x128xf32>
    %2 = vector.shape_cast %1 : vector<1x392x128xf32> to vector<392x128xf32>
    %cst = arith.constant dense<0.000000e+00> : vector<392x128xf32>
    %3 = tpu.matmul %2, %0, %cst {dimension_numbers = #tpu.dot_dimension_numbers<[1], [0], [0], [1], [0, 0, 1, 1], [], []>} : vector<392x128xf32>, vector<128x128xf32>, vector<392x128xf32> -> vector<392x128xf32>
    %c1 = arith.constant 1 : index
    %c0_4 = arith.constant 0 : index
    %c0_5 = arith.constant 0 : index
    %4 = vector.load %arg0[%c1, %c0_4, %c0_5] : memref<4x392x128xf32, #tpu.memory_space<vmem>>, vector<1x392x128xf32>
    %5 = vector.shape_cast %4 : vector<1x392x128xf32> to vector<392x128xf32>
    %cst_6 = arith.constant dense<0.000000e+00> : vector<392x128xf32>
    %6 = tpu.matmul %5, %0, %cst_6 {dimension_numbers = #tpu.dot_dimension_numbers<[1], [0], [0], [1], [0, 0, 1, 1], [], []>} : vector<392x128xf32>, vector<128x128xf32>, vector<392x128xf32> -> vector<392x128xf32>
    %7 = arith.maximumf %3, %6 : vector<392x128xf32>
    %c2 = arith.constant 2 : index
    %c0_7 = arith.constant 0 : index
    %c0_8 = arith.constant 0 : index
    %8 = vector.load %arg0[%c2, %c0_7, %c0_8] : memref<4x392x128xf32, #tpu.memory_space<vmem>>, vector<1x392x128xf32>
    %9 = vector.shape_cast %8 : vector<1x392x128xf32> to vector<392x128xf32>
    %cst_9 = arith.constant dense<0.000000e+00> : vector<392x128xf32>
    %10 = tpu.matmul %9, %0, %cst_9 {dimension_numbers = #tpu.dot_dimension_numbers<[1], [0], [0], [1], [0, 0, 1, 1], [], []>} : vector<392x128xf32>, vector<128x128xf32>, vector<392x128xf32> -> vector<392x128xf32>
    %11 = arith.maximumf %7, %10 : vector<392x128xf32>
    %c3 = arith.constant 3 : index
    %c0_10 = arith.constant 0 : index
    %c0_11 = arith.constant 0 : index
    %12 = vector.load %arg0[%c3, %c0_10, %c0_11] : memref<4x392x128xf32, #tpu.memory_space<vmem>>, vector<1x392x128xf32>
    %13 = vector.shape_cast %12 : vector<1x392x128xf32> to vector<392x128xf32>
    %cst_12 = arith.constant dense<0.000000e+00> : vector<392x128xf32>
    %14 = tpu.matmul %13, %0, %cst_12 {dimension_numbers = #tpu.dot_dimension_numbers<[1], [0], [0], [1], [0, 0, 1, 1], [], []>} : vector<392x128xf32>, vector<128x128xf32>, vector<392x128xf32> -> vector<392x128xf32>
    %15 = arith.maximumf %11, %14 : vector<392x128xf32>
    %c0_13 = arith.constant 0 : index
    %c0_14 = arith.constant 0 : index
    %16 = vector.load %arg2[%c0_13, %c0_14] : memref<1x128xf32, #tpu.memory_space<vmem>>, vector<1x128xf32>
    %17 = vector.broadcast %16 : vector<1x128xf32> to vector<392x128xf32>
    %18 = arith.addf %15, %17 : vector<392x128xf32>
    %cst_15 = arith.constant 0.000000e+00 : f32
    %19 = vector.broadcast %cst_15 : f32 to vector<392x128xf32>
    %20 = arith.maximumf %18, %19 : vector<392x128xf32>
    %c0_16 = arith.constant 0 : index
    %c0_17 = arith.constant 0 : index
    %21 = vector.load %arg3[%c0_16, %c0_17] : memref<392x128xf32, #tpu.memory_space<vmem>>, vector<392x128xf32>
    tpu.vector_store %arg3[%c0_16, %c0_17], %20 {strides = array<i32>} : memref<392x128xf32, #tpu.memory_space<vmem>>, vector<392x128xf32>,
    return
  }
}

module attributes {stable_mosaic.version = 11 : i64} {
  func.func @_conv_pool_kernel(%arg0: memref<4x50x256xf32, #tpu.memory_space<vmem>>, %arg1: memref<256x128xf32, #tpu.memory_space<vmem>>, %arg2: memref<1x128xf32, #tpu.memory_space<vmem>>, %arg3: memref<50x128xf32, #tpu.memory_space<vmem>>) attributes {dimension_semantics = [], scalar_prefetch = 0 : i64, scratch_operands = 0 : i64, tpu.core_type = #tpu.core_type<tc>} {
    %c0 = arith.constant 0 : index
    %c0_0 = arith.constant 0 : index
    %0 = vector.load %arg1[%c0, %c0_0] : memref<256x128xf32, #tpu.memory_space<vmem>>, vector<256x128xf32>
    %c0_1 = arith.constant 0 : index
    %c0_2 = arith.constant 0 : index
    %c0_3 = arith.constant 0 : index
    %1 = vector.load %arg0[%c0_1, %c0_2, %c0_3] : memref<4x50x256xf32, #tpu.memory_space<vmem>>, vector<1x50x256xf32>
    %2 = vector.shape_cast %1 : vector<1x50x256xf32> to vector<50x256xf32>
    %cst = arith.constant dense<0.000000e+00> : vector<50x128xf32>
    %3 = tpu.matmul %2, %0, %cst {dimension_numbers = #tpu.dot_dimension_numbers<[1], [0], [0], [1], [0, 0, 1, 1], [], []>} : vector<50x256xf32>, vector<256x128xf32>, vector<50x128xf32> -> vector<50x128xf32>
    %c1 = arith.constant 1 : index
    %c0_4 = arith.constant 0 : index
    %c0_5 = arith.constant 0 : index
    %4 = vector.load %arg0[%c1, %c0_4, %c0_5] : memref<4x50x256xf32, #tpu.memory_space<vmem>>, vector<1x50x256xf32>
    %5 = vector.shape_cast %4 : vector<1x50x256xf32> to vector<50x256xf32>
    %cst_6 = arith.constant dense<0.000000e+00> : vector<50x128xf32>
    %6 = tpu.matmul %5, %0, %cst_6 {dimension_numbers = #tpu.dot_dimension_numbers<[1], [0], [0], [1], [0, 0, 1, 1], [], []>} : vector<50x256xf32>, vector<256x128xf32>, vector<50x128xf32> -> vector<50x128xf32>
    %7 = arith.maximumf %3, %6 : vector<50x128xf32>
    %c2 = arith.constant 2 : index
    %c0_7 = arith.constant 0 : index
    %c0_8 = arith.constant 0 : index
    %8 = vector.load %arg0[%c2, %c0_7, %c0_8] : memref<4x50x256xf32, #tpu.memory_space<vmem>>, vector<1x50x256xf32>
    %9 = vector.shape_cast %8 : vector<1x50x256xf32> to vector<50x256xf32>
    %cst_9 = arith.constant dense<0.000000e+00> : vector<50x128xf32>
    %10 = tpu.matmul %9, %0, %cst_9 {dimension_numbers = #tpu.dot_dimension_numbers<[1], [0], [0], [1], [0, 0, 1, 1], [], []>} : vector<50x256xf32>, vector<256x128xf32>, vector<50x128xf32> -> vector<50x128xf32>
    %11 = arith.maximumf %7, %10 : vector<50x128xf32>
    %c3 = arith.constant 3 : index
    %c0_10 = arith.constant 0 : index
    %c0_11 = arith.constant 0 : index
    %12 = vector.load %arg0[%c3, %c0_10, %c0_11] : memref<4x50x256xf32, #tpu.memory_space<vmem>>, vector<1x50x256xf32>
    %13 = vector.shape_cast %12 : vector<1x50x256xf32> to vector<50x256xf32>
    %cst_12 = arith.constant dense<0.000000e+00> : vector<50x128xf32>
    %14 = tpu.matmul %13, %0, %cst_12 {dimension_numbers = #tpu.dot_dimension_numbers<[1], [0], [0], [1], [0, 0, 1, 1], [], []>} : vector<50x256xf32>, vector<256x128xf32>, vector<50x128xf32> -> vector<50x128xf32>
    %15 = arith.maximumf %11, %14 : vector<50x128xf32>
    %c0_13 = arith.constant 0 : index
    %c0_14 = arith.constant 0 : index
    %16 = vector.load %arg2[%c0_13, %c0_14] : memref<1x128xf32, #tpu.memory_space<vmem>>, vector<1x128xf32>
    %17 = vector.broadcast %16 : vector<1x128xf32> to vector<50x128xf32>
    %18 = arith.addf %15, %17 : vector<50x128xf32>
    %cst_15 = arith.constant 0.000000e+00 : f32
    %19 = vector.broadcast %cst_15 : f32 to vector<50x128xf32>
    %20 = arith.maximumf %18, %19 : vector<50x128xf32>
    %c0_16 = arith.constant 0 : index
    %c0_17 = arith.constant 0 : index
    %21 = vector.load %arg3[%c0_16, %c0_17] : memref<50x128xf32, #tpu.memory_space<vmem>>, vector<50x128xf32>
    tpu.vector_store %arg3[%c0_16, %c0_17], %20 {strides = array<i32>} : memref<50x128xf32, #tpu.memory_space<vmem>>, vector<50x128xf32>,
    return
  }
}

module attributes {stable_mosaic.version = 11 : i64} {
  func.func @_fc_chain_kernel(%arg0: memref<2x512xf32, #tpu.memory_space<vmem>>, %arg1: memref<512x128xf32, #tpu.memory_space<vmem>>, %arg2: memref<1x128xf32, #tpu.memory_space<vmem>>, %arg3: memref<128x128xf32, #tpu.memory_space<vmem>>, %arg4: memref<1x128xf32, #tpu.memory_space<vmem>>, %arg5: memref<128x128xf32, #tpu.memory_space<vmem>>, %arg6: memref<1x128xf32, #tpu.memory_space<vmem>>, %arg7: memref<2x128xf32, #tpu.memory_space<vmem>>) attributes {dimension_semantics = [], scalar_prefetch = 0 : i64, scratch_operands = 0 : i64, tpu.core_type = #tpu.core_type<tc>} {
    %c0 = arith.constant 0 : index
    %c0_0 = arith.constant 0 : index
    %0 = vector.load %arg0[%c0, %c0_0] : memref<2x512xf32, #tpu.memory_space<vmem>>, vector<2x512xf32>
    %c0_1 = arith.constant 0 : index
    %c0_2 = arith.constant 0 : index
    %1 = vector.load %arg1[%c0_1, %c0_2] : memref<512x128xf32, #tpu.memory_space<vmem>>, vector<512x128xf32>
    %cst = arith.constant dense<0.000000e+00> : vector<2x128xf32>
    %2 = tpu.matmul %0, %1, %cst {dimension_numbers = #tpu.dot_dimension_numbers<[1], [0], [0], [1], [0, 0, 1, 1], [], []>} : vector<2x512xf32>, vector<512x128xf32>, vector<2x128xf32> -> vector<2x128xf32>
    %c0_3 = arith.constant 0 : index
    %c0_4 = arith.constant 0 : index
    %3 = vector.load %arg2[%c0_3, %c0_4] : memref<1x128xf32, #tpu.memory_space<vmem>>, vector<1x128xf32>
    %4 = vector.broadcast %3 : vector<1x128xf32> to vector<2x128xf32>
    %5 = arith.addf %2, %4 : vector<2x128xf32>
    %cst_5 = arith.constant 0.000000e+00 : f32
    %6 = vector.broadcast %cst_5 : f32 to vector<2x128xf32>
    %7 = arith.maximumf %5, %6 : vector<2x128xf32>
    %c0_6 = arith.constant 0 : index
    %c0_7 = arith.constant 0 : index
    %8 = vector.load %arg3[%c0_6, %c0_7] : memref<128x128xf32, #tpu.memory_space<vmem>>, vector<128x128xf32>
    %cst_8 = arith.constant dense<0.000000e+00> : vector<2x128xf32>
    %9 = tpu.matmul %7, %8, %cst_8 {dimension_numbers = #tpu.dot_dimension_numbers<[1], [0], [0], [1], [0, 0, 1, 1], [], []>} : vector<2x128xf32>, vector<128x128xf32>, vector<2x128xf32> -> vector<2x128xf32>
    %c0_9 = arith.constant 0 : index
    %c0_10 = arith.constant 0 : index
    %10 = vector.load %arg4[%c0_9, %c0_10] : memref<1x128xf32, #tpu.memory_space<vmem>>, vector<1x128xf32>
    %11 = vector.broadcast %10 : vector<1x128xf32> to vector<2x128xf32>
    %12 = arith.addf %9, %11 : vector<2x128xf32>
    %cst_11 = arith.constant 0.000000e+00 : f32
    %13 = vector.broadcast %cst_11 : f32 to vector<2x128xf32>
    %14 = arith.maximumf %12, %13 : vector<2x128xf32>
    %c0_12 = arith.constant 0 : index
    %c0_13 = arith.constant 0 : index
    %15 = vector.load %arg5[%c0_12, %c0_13] : memref<128x128xf32, #tpu.memory_space<vmem>>, vector<128x128xf32>
    %cst_14 = arith.constant dense<0.000000e+00> : vector<2x128xf32>
    %16 = tpu.matmul %14, %15, %cst_14 {dimension_numbers = #tpu.dot_dimension_numbers<[1], [0], [0], [1], [0, 0, 1, 1], [], []>} : vector<2x128xf32>, vector<128x128xf32>, vector<2x128xf32> -> vector<2x128xf32>
    %c0_15 = arith.constant 0 : index
    %c0_16 = arith.constant 0 : index
    %17 = vector.load %arg6[%c0_15, %c0_16] : memref<1x128xf32, #tpu.memory_space<vmem>>, vector<1x128xf32>
    %18 = vector.broadcast %17 : vector<1x128xf32> to vector<2x128xf32>
    %19 = arith.addf %16, %18 : vector<2x128xf32>
    %c0_17 = arith.constant 0 : index
    %c0_18 = arith.constant 0 : index
    %20 = vector.load %arg7[%c0_17, %c0_18] : memref<2x128xf32, #tpu.memory_space<vmem>>, vector<2x128xf32>
    tpu.vector_store %arg7[%c0_17, %c0_18], %19 {strides = array<i32>} : memref<2x128xf32, #tpu.memory_space<vmem>>, vector<2x128xf32>,
    return
  }
}

</mosaic_0001>

<bundles_post_ra>
// kernel: lenet_forward.3
= control target key start
LH: loop header
LB: loop body
LE: loop exit
PB: predicated region body
PF: predicated region fallthrough
CT: control target
= control target key end

     0   :  { %v2997_v0 = vmov 0.0|0.0   ;;  %vm2998_vm0 = vmmov 0   ;;  %v2999_v6 = vmov 0.0   ;;  %s4770_s1 = inlined_call_operand.vmem [shape: f32[128,128], index: 1, kind: input, shape index: {}]   ;;  %s4771_s0 = inlined_call_operand.vmem [shape: f32[4,392,128], index: 0, kind: input, shape index: {}]   ;;  %s4772_s2 = inlined_call_operand.vmem [shape: f32[1,128], index: 2, kind: input, shape index: {}]   ;;  %s4773_s3 = inlined_call_operand.vmem [shape: f32[392,128], index: 3, kind: output, shape index: {}]  }
   0x1   :  { %2898 = vmatprep.subr.bf16.mxu0 %v2997_v0  ;;  %v14_v1 = vld [vmem:[%s4770_s1] sm:$0xff]  ;;  %v15_v2 = vld [vmem:[%s4770_s1 + $0x8] sm:$0xff]  ;;  %2922 = vmatprep.subr.bf16.mxu1 %v2997_v0  ;;  %v16_v3 = vld [vmem:[%s4770_s1 + $0x10] sm:$0xff] }
   0x2   :  { %v3031_v4 = vpack.c.bf16 %v15_v2, %v14_v1  ;;  %v17_v5 = vld [vmem:[%s4770_s1 + $0x18] sm:$0xff]  ;;  %2214 = vmatprep.mubr.msk.f32.mxu0 %vm2998_vm0, %v2999_v6  ;;  %2393 = vmatprep.mubr.msk.f32.mxu1 %vm2998_vm0, %v2999_v6  ;;  %v18_v8 = vld [vmem:[%s4770_s1 + $0x20] sm:$0xff]  ;;  %v19_v9 = vld [vmem:[%s4770_s1 + $0x28] sm:$0xff] }
   0x3   :  { %v3042_v7 = vpack.c.bf16 %v17_v5, %v16_v3  ;;  %v3054_v10 = vpack.c.bf16 %v19_v9, %v18_v8  ;;  %v20_v11 = vld [vmem:[%s4770_s1 + $0x30] sm:$0xff]  ;;  %v21_v12 = vld [vmem:[%s4770_s1 + $0x38] sm:$0xff]  ;;  %v22_v14 = vld [vmem:[%s4770_s1 + $0x40] sm:$0xff] }
   0x4   :  { %2900 = vmatpush3.bf16.msra.mxu0 %v3031_v4  ;;  %2924 = vmatpush3.bf16.msra.mxu1 %v3031_v4  ;;  %v3066_v13 = vpack.c.bf16 %v21_v12, %v20_v11  ;;  %v23_v15 = vld [vmem:[%s4770_s1 + $0x48] sm:$0xff]  ;;  %v24_v17 = vld [vmem:[%s4770_s1 + $0x50] sm:$0xff]  ;;  %v25_v18 = vld [vmem:[%s4770_s1 + $0x58] sm:$0xff] }
   0x5   :  { %2901 = vmatprep.subr.bf16.mxu0 %v2997_v0  ;;  %2925 = vmatprep.subr.bf16.mxu1 %v2997_v0  ;;  %v3078_v16 = vpack.c.bf16 %v23_v15, %v22_v14  ;;  %v3090_v19 = vpack.c.bf16 %v25_v18, %v24_v17  ;;  %v26_v20 = vld [vmem:[%s4770_s1 + $0x60] sm:$0xff]  ;;  %v27_v21 = vld [vmem:[%s4770_s1 + $0x68] sm:$0xff]  ;;  %v28_v23 = vld [vmem:[%s4770_s1 + $0x70] sm:$0xff] }
   0x6   :  { %v3102_v22 = vpack.c.bf16 %v27_v21, %v26_v20  ;;  %v29_v24 = vld [vmem:[%s4770_s1 + $0x78] sm:$0xff]  ;;  %v30_v26 = vld [vmem:[%s4771_s0] sm:$0xff]  ;;  %v1774_v27 = vld [vmem:[%s4771_s0 + $0x188] sm:$0xff] }
   0x7   :  { %v3114_v25 = vpack.c.bf16 %v29_v24, %v28_v23  ;;  %v31_v28 = vld [vmem:[%s4771_s0 + $0x8] sm:$0xff]  ;;  %v1775_v29 = vld [vmem:[%s4771_s0 + $0x190] sm:$0xff]  ;;  %v1776_v31 = vld [vmem:[%s4771_s0 + $0x198] sm:$0xff] }
   0x8   :  { %2903 = vmatpush3.bf16.msra.mxu0 %v3042_v7  ;;  %2927 = vmatpush3.bf16.msra.mxu1 %v3042_v7  ;;  %v32_v30 = vld [vmem:[%s4771_s0 + $0x10] sm:$0xff]  ;;  %v33_v32 = vld [vmem:[%s4771_s0 + $0x18] sm:$0xff]  ;;  %v1777_v33 = vld [vmem:[%s4771_s0 + $0x1a0] sm:$0xff] }
   0x9   :  { %2904 = vmatprep.subr.bf16.mxu0 %v2997_v0  ;;  %2928 = vmatprep.subr.bf16.mxu1 %v2997_v0  ;;  %v34_v34 = vld [vmem:[%s4771_s0 + $0x20] sm:$0xff]  ;;  %v1778_v35 = vld [vmem:[%s4771_s0 + $0x1a8] sm:$0xff]  ;;  %v1779_v37 = vld [vmem:[%s4771_s0 + $0x1b0] sm:$0xff] }
   0xa   :  { %v35_v36 = vld [vmem:[%s4771_s0 + $0x28] sm:$0xff]  ;;  %v36_v38 = vld [vmem:[%s4771_s0 + $0x30] sm:$0xff]  ;;  %v1780_v39 = vld [vmem:[%s4771_s0 + $0x1b8] sm:$0xff] }
   0xb   :  { %v37_v40 = vld [vmem:[%s4771_s0 + $0x38] sm:$0xff]  ;;  %v1781_v41 = vld [vmem:[%s4771_s0 + $0x1c0] sm:$0xff]  ;;  %v1782_v43 = vld [vmem:[%s4771_s0 + $0x1c8] sm:$0xff] }
   0xc   :  { %2906 = vmatpush3.bf16.msra.mxu0 %v3054_v10  ;;  %2930 = vmatpush3.bf16.msra.mxu1 %v3054_v10  ;;  %v38_v42 = vld [vmem:[%s4771_s0 + $0x40] sm:$0xff]  ;;  %v39_v44 = vld [vmem:[%s4771_s0 + $0x48] sm:$0xff]  ;;  %v1783_v45 = vld [vmem:[%s4771_s0 + $0x1d0] sm:$0xff] }
   0xd   :  { %2907 = vmatprep.subr.bf16.mxu0 %v2997_v0  ;;  %2931 = vmatprep.subr.bf16.mxu1 %v2997_v0  ;;  %v40_v46 = vld [vmem:[%s4771_s0 + $0x50] sm:$0xff]  ;;  %v1784_v47 = vld [vmem:[%s4771_s0 + $0x1d8] sm:$0xff]  ;;  %v1785_v49 = vld [vmem:[%s4771_s0 + $0x1e0] sm:$0xff] }
   0xe   :  { %v41_v48 = vld [vmem:[%s4771_s0 + $0x58] sm:$0xff]  ;;  %v42_v50 = vld [vmem:[%s4771_s0 + $0x60] sm:$0xff]  ;;  %v1786_v51 = vld [vmem:[%s4771_s0 + $0x1e8] sm:$0xff] }
   0xf   :  { %v43_v52 = vld [vmem:[%s4771_s0 + $0x68] sm:$0xff]  ;;  %v1787_v53 = vld [vmem:[%s4771_s0 + $0x1f0] sm:$0xff]  ;;  %v1788_v55 = vld [vmem:[%s4771_s0 + $0x1f8] sm:$0xff] }
  0x10   :  { %2909 = vmatpush3.bf16.msra.mxu0 %v3066_v13  ;;  %2933 = vmatpush3.bf16.msra.mxu1 %v3066_v13  ;;  %v44_v54 = vld [vmem:[%s4771_s0 + $0x70] sm:$0xff]  ;;  %v45_v56 = vld [vmem:[%s4771_s0 + $0x78] sm:$0xff]  ;;  %v1789_v57 = vld [vmem:[%s4771_s0 + $0x200] sm:$0xff] }
  0x11   :  { %2910 = vmatprep.subr.bf16.mxu0 %v2997_v0  ;;  %2934 = vmatprep.subr.bf16.mxu1 %v2997_v0  ;;  %v46_v58 = vld [vmem:[%s4771_s0 + $0x80] sm:$0xff]  ;;  %v1790_v59 = vld [vmem:[%s4771_s0 + $0x208] sm:$0xff]  ;;  %v1791_v61 = vld [vmem:[%s4771_s0 + $0x210] sm:$0xff] }
  0x12   :  { %v47_v60 = vld [vmem:[%s4771_s0 + $0x88] sm:$0xff]  ;;  %v48_v62 = vld [vmem:[%s4771_s0 + $0x90] sm:$0xff]  ;;  %v1792_v63 = vld [vmem:[%s4771_s0 + $0x218] sm:$0xff] }
  0x13   :  { %v1793_v1 = vld [vmem:[%s4771_s0 + $0x220] sm:$0xff]  ;;  %v1794_v3 = vld [vmem:[%s4771_s0 + $0x228] sm:$0xff]  ;;  %v1795_v5 = vld [vmem:[%s4771_s0 + $0x230] sm:$0xff] }
  0x14   :  { %2912 = vmatpush3.bf16.msra.mxu0 %v3078_v16  ;;  %2936 = vmatpush3.bf16.msra.mxu1 %v3078_v16  ;;  %v50_v2 = vld [vmem:[%s4771_s0 + $0xa0] sm:$0xff]  ;;  %v1796_v8 = vld [vmem:[%s4771_s0 + $0x238] sm:$0xff]  ;;  %v1798_v12 = vld [vmem:[%s4771_s0 + $0x248] sm:$0xff] }
  0x15   :  { %2913 = vmatprep.subr.bf16.mxu0 %v2997_v0  ;;  %2937 = vmatprep.subr.bf16.mxu1 %v2997_v0  ;;  %v53_v9 = vld [vmem:[%s4771_s0 + $0xb8] sm:$0xff]  ;;  %v54_v11 = vld [vmem:[%s4771_s0 + $0xc0] sm:$0xff]  ;;  %v1799_v14 = vld [vmem:[%s4771_s0 + $0x250] sm:$0xff] }
  0x16   :  { %v56_v15 = vld [vmem:[%s4771_s0 + $0xd0] sm:$0xff]  ;;  %v57_v17 = vld [vmem:[%s4771_s0 + $0xd8] sm:$0xff]  ;;  %v1801_v18 = vld [vmem:[%s4771_s0 + $0x260] sm:$0xff] }
  0x17   :  { %v1802_v20 = vld [vmem:[%s4771_s0 + $0x268] sm:$0xff]  ;;  %v60_v23 = vld [vmem:[%s4771_s0 + $0xf0] sm:$0xff]  ;;  %v1804_v24 = vld [vmem:[%s4771_s0 + $0x278] sm:$0xff] }
  0x18   :  { %2915 = vmatpush3.bf16.msra.mxu0 %v3090_v19  ;;  %2939 = vmatpush3.bf16.msra.mxu1 %v3090_v19  ;;  %v59_v21 = vld [vmem:[%s4771_s0 + $0xe8] sm:$0xff] }
  0x19   :  { %2916 = vmatprep.subr.bf16.mxu0 %v2997_v0  ;;  %2940 = vmatprep.subr.bf16.mxu1 %v2997_v0 }
  0x1c   :  { %2918 = vmatpush3.bf16.msra.mxu0 %v3102_v22  ;;  %2942 = vmatpush3.bf16.msra.mxu1 %v3102_v22 }
  0x1d   :  { %2919 = vmatprep.subr.bf16.mxu0 %v2997_v0  ;;  %2943 = vmatprep.subr.bf16.mxu1 %v2997_v0 }
  0x20   :  { %2921 = vmatpush3.bf16.msra.mxu0 %v3114_v25  ;;  %2945 = vmatpush3.bf16.msra.mxu1 %v3114_v25 }
  0x21   :  { %2946 = vmatprep.subr.bf16.mxu0 %v2997_v0  ;;  %2970 = vmatprep.subr.bf16.mxu1 %v2997_v0 }
  0x23   :  { %2215 = vmatmul.mubr.f32.vlgmr.msra.gmra.mrb[0].mxu0 %v30_v26  ;;  %2394 = vmatmul.mubr.f32.vlgmr.msra.gmra.mrb[0].mxu1 %v1774_v27  ;;  %v1805_v26 = vld [vmem:[%s4771_s0 + $0x280] sm:$0xff] }
  0x24   :  { %2948 = vmatpush3.bf16.msra.mxu0 %v3031_v4  ;;  %2217 = vmatprep.mubr.msk.f32.mxu0 %vm2998_vm0, %v2999_v6  ;;  %v62_v27 = vld [vmem:[%s4771_s0 + $0x100] sm:$0xff] }
  0x25   :  { %2972 = vmatpush3.bf16.msra.mxu1 %v3031_v4  ;;  %2396 = vmatprep.mubr.msk.f32.mxu1 %vm2998_vm0, %v2999_v6  ;;  %v51_v4 = vld [vmem:[%s4771_s0 + $0xa8] sm:$0xff] }
  0x26   :  { %2949 = vmatprep.subr.bf16.mxu0 %v2997_v0  ;;  %2973 = vmatprep.subr.bf16.mxu1 %v2997_v0 }
  0x27   :  { %2218 = vmatmul.mubr.f32.gmra.mrb[2].mxu0 %v31_v28  ;;  %2397 = vmatmul.mubr.f32.gmra.mrb[2].mxu1 %v1775_v29  ;;  %v1806_v28 = vld [vmem:[%s4771_s0 + $0x288] sm:$0xff] }
  0x28   :  { %2220 = vmatprep.mubr.msk.f32.mxu0 %vm2998_vm0, %v2999_v6  ;;  %2399 = vmatprep.mubr.msk.f32.mxu1 %vm2998_vm0, %v2999_v6  ;;  %v63_v29 = vld [vmem:[%s4771_s0 + $0x108] sm:$0xff] }
  0x29   :  { %2951 = vmatpush3.bf16.msra.mxu0 %v3042_v7  ;;  %2975 = vmatpush3.bf16.msra.mxu1 %v3042_v7  ;;  %v52_v7 = vld [vmem:[%s4771_s0 + $0xb0] sm:$0xff] }
  0x2a   :  { %2952 = vmatprep.subr.bf16.mxu0 %v2997_v0  ;;  %2976 = vmatprep.subr.bf16.mxu1 %v2997_v0 }
  0x2b   :  { %2221 = vmatmul.mubr.f32.gmra.mrb[4].mxu0 %v32_v30  ;;  %2400 = vmatmul.mubr.f32.gmra.mrb[4].mxu1 %v1776_v31  ;;  %v1807_v30 = vld [vmem:[%s4771_s0 + $0x290] sm:$0xff] }
  0x2c   :  { %2223 = vmatprep.mubr.msk.f32.mxu0 %vm2998_vm0, %v2999_v6  ;;  %2402 = vmatprep.mubr.msk.f32.mxu1 %vm2998_vm0, %v2999_v6  ;;  %v64_v31 = vld [vmem:[%s4771_s0 + $0x110] sm:$0xff] }
  0x2d   :  { %2954 = vmatpush3.bf16.msra.mxu0 %v3054_v10  ;;  %2978 = vmatpush3.bf16.msra.mxu1 %v3054_v10  ;;  %v1797_v10 = vld [vmem:[%s4771_s0 + $0x240] sm:$0xff] }
  0x2e   :  { %2955 = vmatprep.subr.bf16.mxu0 %v2997_v0  ;;  %2979 = vmatprep.subr.bf16.mxu1 %v2997_v0 }
  0x2f   :  { %2224 = vmatmul.mubr.f32.gmra.mrb[6].mxu0 %v33_v32  ;;  %2403 = vmatmul.mubr.f32.gmra.mrb[6].mxu1 %v1777_v33  ;;  %v1808_v32 = vld [vmem:[%s4771_s0 + $0x298] sm:$0xff] }
  0x30   :  { %2226 = vmatprep.mubr.msk.f32.mxu0 %vm2998_vm0, %v2999_v6  ;;  %2405 = vmatprep.mubr.msk.f32.mxu1 %vm2998_vm0, %v2999_v6  ;;  %v65_v33 = vld [vmem:[%s4771_s0 + $0x118] sm:$0xff] }
  0x31   :  { %2957 = vmatpush3.bf16.msra.mxu0 %v3066_v13  ;;  %2981 = vmatpush3.bf16.msra.mxu1 %v3066_v13  ;;  %v55_v13 = vld [vmem:[%s4771_s0 + $0xc8] sm:$0xff] }
  0x32   :  { %2958 = vmatprep.subr.bf16.mxu0 %v2997_v0  ;;  %2982 = vmatprep.subr.bf16.mxu1 %v2997_v0 }
  0x33   :  { %2227 = vmatmul.mubr.f32.gmra.mrb[8].mxu0 %v34_v34  ;;  %2406 = vmatmul.mubr.f32.gmra.mrb[8].mxu1 %v1778_v35  ;;  %v1809_v34 = vld [vmem:[%s4771_s0 + $0x2a0] sm:$0xff] }
  0x34   :  { %2229 = vmatprep.mubr.msk.f32.mxu0 %vm2998_vm0, %v2999_v6  ;;  %2408 = vmatprep.mubr.msk.f32.mxu1 %vm2998_vm0, %v2999_v6  ;;  %v66_v35 = vld [vmem:[%s4771_s0 + $0x120] sm:$0xff] }
  0x35   :  { %2960 = vmatpush3.bf16.msra.mxu0 %v3078_v16  ;;  %2984 = vmatpush3.bf16.msra.mxu1 %v3078_v16  ;;  %v1800_v16 = vld [vmem:[%s4771_s0 + $0x258] sm:$0xff] }
  0x36   :  { %2961 = vmatprep.subr.bf16.mxu0 %v2997_v0  ;;  %2985 = vmatprep.subr.bf16.mxu1 %v2997_v0 }
  0x37   :  { %2230 = vmatmul.mubr.f32.gmra.mrb[10].mxu0 %v35_v36  ;;  %2409 = vmatmul.mubr.f32.gmra.mrb[10].mxu1 %v1779_v37  ;;  %v1810_v36 = vld [vmem:[%s4771_s0 + $0x2a8] sm:$0xff] }
  0x38   :  { %2232 = vmatprep.mubr.msk.f32.mxu0 %vm2998_vm0, %v2999_v6  ;;  %2411 = vmatprep.mubr.msk.f32.mxu1 %vm2998_vm0, %v2999_v6  ;;  %v67_v37 = vld [vmem:[%s4771_s0 + $0x128] sm:$0xff] }
  0x39   :  { %2963 = vmatpush3.bf16.msra.mxu0 %v3090_v19  ;;  %2987 = vmatpush3.bf16.msra.mxu1 %v3090_v19  ;;  %v58_v19 = vld [vmem:[%s4771_s0 + $0xe0] sm:$0xff] }
  0x3a   :  { %2964 = vmatprep.subr.bf16.mxu0 %v2997_v0  ;;  %2988 = vmatprep.subr.bf16.mxu1 %v2997_v0 }
  0x3b   :  { %2233 = vmatmul.mubr.f32.gmra.mrb[12].mxu0 %v36_v38  ;;  %2412 = vmatmul.mubr.f32.gmra.mrb[12].mxu1 %v1780_v39  ;;  %v1811_v38 = vld [vmem:[%s4771_s0 + $0x2b0] sm:$0xff] }
  0x3c   :  { %2235 = vmatprep.mubr.msk.f32.mxu0 %vm2998_vm0, %v2999_v6  ;;  %2414 = vmatprep.mubr.msk.f32.mxu1 %vm2998_vm0, %v2999_v6  ;;  %v68_v39 = vld [vmem:[%s4771_s0 + $0x130] sm:$0xff] }
  0x3d   :  { %2966 = vmatpush3.bf16.msra.mxu0 %v3102_v22  ;;  %2990 = vmatpush3.bf16.msra.mxu1 %v3102_v22  ;;  %v1803_v22 = vld [vmem:[%s4771_s0 + $0x270] sm:$0xff] }
  0x3e   :  { %2967 = vmatprep.subr.bf16.mxu0 %v2997_v0  ;;  %2991 = vmatprep.subr.bf16.mxu1 %v2997_v0  ;;  %v49_v0 = vld [vmem:[%s4771_s0 + $0x98] sm:$0xff] }
  0x3f   :  { %2236 = vmatmul.mubr.f32.gmra.mrb[14].mxu0 %v37_v40  ;;  %2415 = vmatmul.mubr.f32.gmra.mrb[14].mxu1 %v1781_v41  ;;  %v1812_v40 = vld [vmem:[%s4771_s0 + $0x2b8] sm:$0xff] }
  0x40   :  { %2238 = vmatprep.mubr.msk.f32.mxu0 %vm2998_vm0, %v2999_v6  ;;  %2417 = vmatprep.mubr.msk.f32.mxu1 %vm2998_vm0, %v2999_v6  ;;  %v69_v41 = vld [vmem:[%s4771_s0 + $0x138] sm:$0xff] }
  0x41   :  { %2969 = vmatpush3.bf16.msra.mxu0 %v3114_v25  ;;  %2993 = vmatpush3.bf16.msra.mxu1 %v3114_v25  ;;  %v61_v25 = vld [vmem:[%s4771_s0 + $0xf8] sm:$0xff] }
  0x43   :  { %2239 = vmatmul.mubr.f32.gmra.mrb[16].mxu0 %v38_v42  ;;  %2418 = vmatmul.mubr.f32.gmra.mrb[16].mxu1 %v1782_v43  ;;  %v1813_v42 = vld [vmem:[%s4771_s0 + $0x2c0] sm:$0xff] }
  0x44   :  { %2241 = vmatprep.mubr.msk.f32.mxu0 %vm2998_vm0, %v2999_v6  ;;  %2420 = vmatprep.mubr.msk.f32.mxu1 %vm2998_vm0, %v2999_v6  ;;  %v70_v43 = vld [vmem:[%s4771_s0 + $0x140] sm:$0xff] }
  0x47   :  { %2242 = vmatmul.mubr.f32.gmra.mrb[18].mxu0 %v39_v44  ;;  %2421 = vmatmul.mubr.f32.gmra.mrb[18].mxu1 %v1783_v45  ;;  %v1814_v44 = vld [vmem:[%s4771_s0 + $0x2c8] sm:$0xff] }
  0x48   :  { %2244 = vmatprep.mubr.msk.f32.mxu0 %vm2998_vm0, %v2999_v6  ;;  %2423 = vmatprep.mubr.msk.f32.mxu1 %vm2998_vm0, %v2999_v6  ;;  %v71_v45 = vld [vmem:[%s4771_s0 + $0x148] sm:$0xff] }
  0x4b   :  { %2245 = vmatmul.mubr.f32.gmra.mrb[20].mxu0 %v40_v46  ;;  %2424 = vmatmul.mubr.f32.gmra.mrb[20].mxu1 %v1784_v47  ;;  %v1815_v46 = vld [vmem:[%s4771_s0 + $0x2d0] sm:$0xff] }
  0x4c   :  { %2247 = vmatprep.mubr.msk.f32.mxu0 %vm2998_vm0, %v2999_v6  ;;  %2426 = vmatprep.mubr.msk.f32.mxu1 %vm2998_vm0, %v2999_v6  ;;  %v72_v47 = vld [vmem:[%s4771_s0 + $0x150] sm:$0xff] }
  0x4f   :  { %2248 = vmatmul.mubr.f32.gmra.mrb[22].mxu0 %v41_v48  ;;  %2427 = vmatmul.mubr.f32.gmra.mrb[22].mxu1 %v1785_v49  ;;  %v1816_v48 = vld [vmem:[%s4771_s0 + $0x2d8] sm:$0xff] }
  0x50   :  { %2250 = vmatprep.mubr.msk.f32.mxu0 %vm2998_vm0, %v2999_v6  ;;  %2429 = vmatprep.mubr.msk.f32.mxu1 %vm2998_vm0, %v2999_v6  ;;  %v73_v49 = vld [vmem:[%s4771_s0 + $0x158] sm:$0xff] }
  0x53   :  { %2251 = vmatmul.mubr.f32.gmra.mrb[24].mxu0 %v42_v50  ;;  %2430 = vmatmul.mubr.f32.gmra.mrb[24].mxu1 %v1786_v51  ;;  %v1817_v50 = vld [vmem:[%s4771_s0 + $0x2e0] sm:$0xff] }
  0x54   :  { %2253 = vmatprep.mubr.msk.f32.mxu0 %vm2998_vm0, %v2999_v6  ;;  %2432 = vmatprep.mubr.msk.f32.mxu1 %vm2998_vm0, %v2999_v6  ;;  %v74_v51 = vld [vmem:[%s4771_s0 + $0x160] sm:$0xff] }
  0x57   :  { %2254 = vmatmul.mubr.f32.gmra.mrb[26].mxu0 %v43_v52  ;;  %2433 = vmatmul.mubr.f32.gmra.mrb[26].mxu1 %v1787_v53  ;;  %v1818_v52 = vld [vmem:[%s4771_s0 + $0x2e8] sm:$0xff] }
  0x58   :  { %2256 = vmatprep.mubr.msk.f32.mxu0 %vm2998_vm0, %v2999_v6  ;;  %2435 = vmatprep.mubr.msk.f32.mxu1 %vm2998_vm0, %v2999_v6  ;;  %v75_v53 = vld [vmem:[%s4771_s0 + $0x168] sm:$0xff] }
  0x5b   :  { %2257 = vmatmul.mubr.f32.gmra.mrb[28].mxu0 %v44_v54  ;;  %2436 = vmatmul.mubr.f32.gmra.mrb[28].mxu1 %v1788_v55  ;;  %v1819_v54 = vld [vmem:[%s4771_s0 + $0x2f0] sm:$0xff] }
  0x5c   :  { %2259 = vmatprep.mubr.msk.f32.mxu0 %vm2998_vm0, %v2999_v6  ;;  %2438 = vmatprep.mubr.msk.f32.mxu1 %vm2998_vm0, %v2999_v6  ;;  %v76_v55 = vld [vmem:[%s4771_s0 + $0x170] sm:$0xff] }
  0x5f   :  { %2260 = vmatmul.mubr.f32.gmra.mrb[30].mxu0 %v45_v56  ;;  %2439 = vmatmul.mubr.f32.gmra.mrb[30].mxu1 %v1789_v57  ;;  %v1820_v56 = vld [vmem:[%s4771_s0 + $0x2f8] sm:$0xff] }
  0x60   :  { %2262 = vmatprep.mubr.msk.f32.mxu0 %vm2998_vm0, %v2999_v6  ;;  %2441 = vmatprep.mubr.msk.f32.mxu1 %vm2998_vm0, %v2999_v6  ;;  %v77_v57 = vld [vmem:[%s4771_s0 + $0x178] sm:$0xff] }
  0x63   :  { %2263 = vmatmul.mubr.f32.gmra.mrb[32].mxu0 %v46_v58  ;;  %2442 = vmatmul.mubr.f32.gmra.mrb[32].mxu1 %v1790_v59  ;;  %v1821_v58 = vld [vmem:[%s4771_s0 + $0x300] sm:$0xff] }
  0x64   :  { %2265 = vmatprep.mubr.msk.f32.mxu0 %vm2998_vm0, %v2999_v6  ;;  %2444 = vmatprep.mubr.msk.f32.mxu1 %vm2998_vm0, %v2999_v6  ;;  %v78_v59 = vld [vmem:[%s4771_s0 + $0x180] sm:$0xff] }
  0x67   :  { %2266 = vmatmul.mubr.f32.gmra.mrb[34].mxu0 %v47_v60  ;;  %2445 = vmatmul.mubr.f32.gmra.mrb[34].mxu1 %v1791_v61  ;;  %v1822_v60 = vld [vmem:[%s4771_s0 + $0x308] sm:$0xff]  ;;  %v1823_v61 = vld [vmem:[%s4771_s0 + $0x310] sm:$0xff] }
  0x68   :  { %2268 = vmatprep.mubr.msk.f32.mxu0 %vm2998_vm0, %v2999_v6  ;;  %2447 = vmatprep.mubr.msk.f32.mxu1 %vm2998_vm0, %v2999_v6 }
  0x6b   :  { %2269 = vmatmul.mubr.f32.gmra.mrb[36].mxu0 %v48_v62  ;;  %2448 = vmatmul.mubr.f32.gmra.mrb[36].mxu1 %v1792_v63  ;;  %v1872_v62 = vld [vmem:[%s4771_s0 + $0x498] sm:$0xff] }
  0x6c   :  { %2271 = vmatprep.mubr.msk.f32.mxu0 %vm2998_vm0, %v2999_v6  ;;  %2450 = vmatprep.mubr.msk.f32.mxu1 %vm2998_vm0, %v2999_v6  ;;  %v1824_v63 = vld [vmem:[%s4771_s0 + $0x318] sm:$0xff] }
  0x6f   :  { %2272 = vmatmul.mubr.f32.gmra.mrb[38].mxu0 %v49_v0  ;;  %2451 = vmatmul.mubr.f32.gmra.mrb[38].mxu1 %v1793_v1  ;;  %v1873_v0 = vld [vmem:[%s4771_s0 + $0x4a0] sm:$0xff] }
  0x70   :  { %2274 = vmatprep.mubr.msk.f32.mxu0 %vm2998_vm0, %v2999_v6  ;;  %2453 = vmatprep.mubr.msk.f32.mxu1 %vm2998_vm0, %v2999_v6  ;;  %v1825_v1 = vld [vmem:[%s4771_s0 + $0x320] sm:$0xff] }
  0x73   :  { %2275 = vmatmul.mubr.f32.gmra.mrb[40].mxu0 %v50_v2  ;;  %2454 = vmatmul.mubr.f32.gmra.mrb[40].mxu1 %v1794_v3  ;;  %v1874_v2 = vld [vmem:[%s4771_s0 + $0x4a8] sm:$0xff] }
  0x74   :  { %2277 = vmatprep.mubr.msk.f32.mxu0 %vm2998_vm0, %v2999_v6  ;;  %2456 = vmatprep.mubr.msk.f32.mxu1 %vm2998_vm0, %v2999_v6  ;;  %v1826_v3 = vld [vmem:[%s4771_s0 + $0x328] sm:$0xff] }
  0x77   :  { %2278 = vmatmul.mubr.f32.gmra.mrb[42].mxu0 %v51_v4  ;;  %2457 = vmatmul.mubr.f32.gmra.mrb[42].mxu1 %v1795_v5  ;;  %v1875_v4 = vld [vmem:[%s4771_s0 + $0x4b0] sm:$0xff] }
  0x78   :  { %2280 = vmatprep.mubr.msk.f32.mxu0 %vm2998_vm0, %v2999_v6  ;;  %2459 = vmatprep.mubr.msk.f32.mxu1 %vm2998_vm0, %v2999_v6  ;;  %v1827_v5 = vld [vmem:[%s4771_s0 + $0x330] sm:$0xff] }
  0x7b   :  { %2281 = vmatmul.mubr.f32.gmra.mrb[44].mxu0 %v52_v7  ;;  %2460 = vmatmul.mubr.f32.gmra.mrb[44].mxu1 %v1796_v8  ;;  %v1876_v7 = vld [vmem:[%s4771_s0 + $0x4b8] sm:$0xff] }
  0x7c   :  { %2283 = vmatprep.mubr.msk.f32.mxu0 %vm2998_vm0, %v2999_v6  ;;  %2462 = vmatprep.mubr.msk.f32.mxu1 %vm2998_vm0, %v2999_v6 }
  0x7f   :  { %2284 = vmatmul.mubr.f32.gmra.mrb[46].mxu0 %v53_v9  ;;  %2463 = vmatmul.mubr.f32.gmra.mrb[46].mxu1 %v1797_v10 }
  0x80   :  { %2286 = vmatprep.mubr.msk.f32.mxu0 %vm2998_vm0, %v2999_v6  ;;  %2465 = vmatprep.mubr.msk.f32.mxu1 %vm2998_vm0, %v2999_v6 }
  0x83   :  { %2287 = vmatmul.mubr.f32.gmra.mrb[48].mxu0 %v54_v11  ;;  %2466 = vmatmul.mubr.f32.gmra.mrb[48].mxu1 %v1798_v12 }
  0x84   :  { %2289 = vmatprep.mubr.msk.f32.mxu0 %vm2998_vm0, %v2999_v6  ;;  %2468 = vmatprep.mubr.msk.f32.mxu1 %vm2998_vm0, %v2999_v6 }
  0x87   :  { %2290 = vmatmul.mubr.f32.gmra.mrb[50].mxu0 %v55_v13  ;;  %2469 = vmatmul.mubr.f32.gmra.mrb[50].mxu1 %v1799_v14  ;;  %v1828_v13 = vld [vmem:[%s4771_s0 + $0x338] sm:$0xff]  ;;  %v1877_v14 = vld [vmem:[%s4771_s0 + $0x4c0] sm:$0xff] }
  0x88   :  { %2292 = vmatprep.mubr.msk.f32.mxu0 %vm2998_vm0, %v2999_v6  ;;  %2471 = vmatprep.mubr.msk.f32.mxu1 %vm2998_vm0, %v2999_v6 }
  0x8b   :  { %2293 = vmatmul.mubr.f32.gmra.mrb[52].mxu0 %v56_v15  ;;  %2472 = vmatmul.mubr.f32.gmra.mrb[52].mxu1 %v1800_v16 }
  0x8c   :  { %2295 = vmatprep.mubr.msk.f32.mxu0 %vm2998_vm0, %v2999_v6  ;;  %2474 = vmatprep.mubr.msk.f32.mxu1 %vm2998_vm0, %v2999_v6 }
  0x8f   :  { %2296 = vmatmul.mubr.f32.gmra.mrb[54].mxu0 %v57_v17  ;;  %2475 = vmatmul.mubr.f32.gmra.mrb[54].mxu1 %v1801_v18  ;;  %v1855_v18 = vld [vmem:[%s4771_s0 + $0x410] sm:$0xff] }
  0x90   :  { %2298 = vmatprep.mubr.msk.f32.mxu0 %vm2998_vm0, %v2999_v6  ;;  %2477 = vmatprep.mubr.msk.f32.mxu1 %vm2998_vm0, %v2999_v6 }
  0x93   :  { %2299 = vmatmul.mubr.f32.gmra.mrb[56].mxu0 %v58_v19  ;;  %2478 = vmatmul.mubr.f32.gmra.mrb[56].mxu1 %v1802_v20  ;;  %v1829_v20 = vld [vmem:[%s4771_s0 + $0x340] sm:$0xff] }
  0x94   :  { %2301 = vmatprep.mubr.msk.f32.mxu0 %vm2998_vm0, %v2999_v6  ;;  %2480 = vmatprep.mubr.msk.f32.mxu1 %vm2998_vm0, %v2999_v6 }
  0x97   :  { %2302 = vmatmul.mubr.f32.gmra.mrb[58].mxu0 %v59_v21  ;;  %2481 = vmatmul.mubr.f32.gmra.mrb[58].mxu1 %v1803_v22  ;;  %v1878_v21 = vld [vmem:[%s4771_s0 + $0x4c8] sm:$0xff] }
  0x98   :  { %2304 = vmatprep.mubr.msk.f32.mxu0 %vm2998_vm0, %v2999_v6  ;;  %2483 = vmatprep.mubr.msk.f32.mxu1 %vm2998_vm0, %v2999_v6 }
  0x9b   :  { %2305 = vmatmul.mubr.f32.gmra.mrb[60].mxu0 %v60_v23  ;;  %2484 = vmatmul.mubr.f32.gmra.mrb[60].mxu1 %v1804_v24 }
  0x9c   :  { %2307 = vmatprep.mubr.msk.f32.mxu0 %vm2998_vm0, %v2999_v6  ;;  %2486 = vmatprep.mubr.msk.f32.mxu1 %vm2998_vm0, %v2999_v6 }
  0x9f   :  { %2308 = vmatmul.mubr.f32.gmra.mrb[62].mxu0 %v61_v25  ;;  %2487 = vmatmul.mubr.f32.gmra.mrb[62].mxu1 %v1805_v26 }
  0xa0   :  { %2310 = vmatprep.mubr.msk.f32.mxu0 %vm2998_vm0, %v2999_v6  ;;  %2489 = vmatprep.mubr.msk.f32.mxu1 %vm2998_vm0, %v2999_v6 }
  0xa3   :  { %2311 = vmatmul.mubr.f32.gmra.mrb[64].mxu0 %v62_v27  ;;  %2490 = vmatmul.mubr.f32.gmra.mrb[64].mxu1 %v1806_v28  ;;  %v1830_v27 = vld [vmem:[%s4771_s0 + $0x348] sm:$0xff]  ;;  %v1879_v28 = vld [vmem:[%s4771_s0 + $0x4d0] sm:$0xff] }
  0xa4   :  { %2313 = vmatprep.mubr.msk.f32.mxu0 %vm2998_vm0, %v2999_v6  ;;  %2492 = vmatprep.mubr.msk.f32.mxu1 %vm2998_vm0, %v2999_v6 }
  0xa7   :  { %2314 = vmatmul.mubr.f32.gmra.mrb[66].mxu0 %v63_v29  ;;  %2493 = vmatmul.mubr.f32.gmra.mrb[66].mxu1 %v1807_v30 }
  0xa8   :  { %2316 = vmatprep.mubr.msk.f32.mxu0 %vm2998_vm0, %v2999_v6  ;;  %2495 = vmatprep.mubr.msk.f32.mxu1 %vm2998_vm0, %v2999_v6 }
  0xab   :  { %2317 = vmatmul.mubr.f32.gmra.mrb[68].mxu0 %v64_v31  ;;  %2496 = vmatmul.mubr.f32.gmra.mrb[68].mxu1 %v1808_v32  ;;  %v1854_v32 = vld [vmem:[%s4771_s0 + $0x408] sm:$0xff] }
  0xac   :  { %2319 = vmatprep.mubr.msk.f32.mxu0 %vm2998_vm0, %v2999_v6  ;;  %2498 = vmatprep.mubr.msk.f32.mxu1 %vm2998_vm0, %v2999_v6 }
  0xaf   :  { %2320 = vmatmul.mubr.f32.gmra.mrb[70].mxu0 %v65_v33  ;;  %2499 = vmatmul.mubr.f32.gmra.mrb[70].mxu1 %v1809_v34  ;;  %v1831_v34 = vld [vmem:[%s4771_s0 + $0x350] sm:$0xff] }
  0xb0   :  { %2322 = vmatprep.mubr.msk.f32.mxu0 %vm2998_vm0, %v2999_v6  ;;  %2501 = vmatprep.mubr.msk.f32.mxu1 %vm2998_vm0, %v2999_v6 }
  0xb3   :  { %2323 = vmatmul.mubr.f32.gmra.mrb[72].mxu0 %v66_v35  ;;  %2502 = vmatmul.mubr.f32.gmra.mrb[72].mxu1 %v1810_v36  ;;  %v1880_v35 = vld [vmem:[%s4771_s0 + $0x4d8] sm:$0xff] }
  0xb4   :  { %2325 = vmatprep.mubr.msk.f32.mxu0 %vm2998_vm0, %v2999_v6  ;;  %2504 = vmatprep.mubr.msk.f32.mxu1 %vm2998_vm0, %v2999_v6 }
  0xb7   :  { %2326 = vmatmul.mubr.f32.gmra.mrb[74].mxu0 %v67_v37  ;;  %2505 = vmatmul.mubr.f32.gmra.mrb[74].mxu1 %v1811_v38 }
  0xb8   :  { %2328 = vmatprep.mubr.msk.f32.mxu0 %vm2998_vm0, %v2999_v6  ;;  %2507 = vmatprep.mubr.msk.f32.mxu1 %vm2998_vm0, %v2999_v6 }
  0xbb   :  { %2329 = vmatmul.mubr.f32.gmra.mrb[76].mxu0 %v68_v39  ;;  %2508 = vmatmul.mubr.f32.gmra.mrb[76].mxu1 %v1812_v40 }
  0xbc   :  { %2331 = vmatprep.mubr.msk.f32.mxu0 %vm2998_vm0, %v2999_v6  ;;  %2510 = vmatprep.mubr.msk.f32.mxu1 %vm2998_vm0, %v2999_v6 }
  0xbf   :  { %2332 = vmatmul.mubr.f32.gmra.mrb[78].mxu0 %v69_v41  ;;  %2511 = vmatmul.mubr.f32.gmra.mrb[78].mxu1 %v1813_v42  ;;  %v1832_v41 = vld [vmem:[%s4771_s0 + $0x358] sm:$0xff]  ;;  %v1881_v42 = vld [vmem:[%s4771_s0 + $0x4e0] sm:$0xff] }
  0xc0   :  { %2334 = vmatprep.mubr.msk.f32.mxu0 %vm2998_vm0, %v2999_v6  ;;  %2513 = vmatprep.mubr.msk.f32.mxu1 %vm2998_vm0, %v2999_v6 }
  0xc3   :  { %2335 = vmatmul.mubr.f32.gmra.mrb[80].mxu0 %v70_v43  ;;  %2514 = vmatmul.mubr.f32.gmra.mrb[80].mxu1 %v1814_v44 }
  0xc4   :  { %2337 = vmatprep.mubr.msk.f32.mxu0 %vm2998_vm0, %v2999_v6  ;;  %2516 = vmatprep.mubr.msk.f32.mxu1 %vm2998_vm0, %v2999_v6 }
  0xc7   :  { %2338 = vmatmul.mubr.f32.gmra.mrb[82].mxu0 %v71_v45  ;;  %2517 = vmatmul.mubr.f32.gmra.mrb[82].mxu1 %v1815_v46  ;;  %v1853_v46 = vld [vmem:[%s4771_s0 + $0x400] sm:$0xff] }
  0xc8   :  { %2340 = vmatprep.mubr.msk.f32.mxu0 %vm2998_vm0, %v2999_v6  ;;  %2519 = vmatprep.mubr.msk.f32.mxu1 %vm2998_vm0, %v2999_v6 }
  0xcb   :  { %2341 = vmatmul.mubr.f32.gmra.mrb[84].mxu0 %v72_v47  ;;  %2520 = vmatmul.mubr.f32.gmra.mrb[84].mxu1 %v1816_v48  ;;  %v1833_v48 = vld [vmem:[%s4771_s0 + $0x360] sm:$0xff] }
  0xcc   :  { %2343 = vmatprep.mubr.msk.f32.mxu0 %vm2998_vm0, %v2999_v6  ;;  %2522 = vmatprep.mubr.msk.f32.mxu1 %vm2998_vm0, %v2999_v6 }
  0xcf   :  { %2344 = vmatmul.mubr.f32.gmra.mrb[86].mxu0 %v73_v49  ;;  %2523 = vmatmul.mubr.f32.gmra.mrb[86].mxu1 %v1817_v50  ;;  %v1882_v49 = vld [vmem:[%s4771_s0 + $0x4e8] sm:$0xff] }
  0xd0   :  { %2346 = vmatprep.mubr.msk.f32.mxu0 %vm2998_vm0, %v2999_v6  ;;  %2525 = vmatprep.mubr.msk.f32.mxu1 %vm2998_vm0, %v2999_v6 }
  0xd3   :  { %2347 = vmatmul.mubr.f32.gmra.mrb[88].mxu0 %v74_v51  ;;  %2526 = vmatmul.mubr.f32.gmra.mrb[88].mxu1 %v1818_v52 }
  0xd4   :  { %2349 = vmatprep.mubr.msk.f32.mxu0 %vm2998_vm0, %v2999_v6  ;;  %2528 = vmatprep.mubr.msk.f32.mxu1 %vm2998_vm0, %v2999_v6 }
  0xd7   :  { %2350 = vmatmul.mubr.f32.gmra.mrb[90].mxu0 %v75_v53  ;;  %2529 = vmatmul.mubr.f32.gmra.mrb[90].mxu1 %v1819_v54 }
  0xd8   :  { %2352 = vmatprep.mubr.msk.f32.mxu0 %vm2998_vm0, %v2999_v6  ;;  %2531 = vmatprep.mubr.msk.f32.mxu1 %vm2998_vm0, %v2999_v6 }
  0xdb   :  { %2353 = vmatmul.mubr.f32.gmra.mrb[92].mxu0 %v76_v55  ;;  %2532 = vmatmul.mubr.f32.gmra.mrb[92].mxu1 %v1820_v56  ;;  %v1834_v55 = vld [vmem:[%s4771_s0 + $0x368] sm:$0xff]  ;;  %v1883_v56 = vld [vmem:[%s4771_s0 + $0x4f0] sm:$0xff] }
  0xdc   :  { %2355 = vmatprep.mubr.msk.f32.mxu0 %vm2998_vm0, %v2999_v6  ;;  %2534 = vmatprep.mubr.msk.f32.mxu1 %vm2998_vm0, %v2999_v6 }
  0xdf   :  { %2356 = vmatmul.mubr.f32.gmra.mrb[94].mxu0 %v77_v57  ;;  %2535 = vmatmul.mubr.f32.gmra.mrb[94].mxu1 %v1821_v58 }
  0xe0   :  { %2358 = vmatprep.mubr.msk.f32.mxu0 %vm2998_vm0, %v2999_v6  ;;  %2537 = vmatprep.mubr.msk.f32.mxu1 %vm2998_vm0, %v2999_v6 }
  0xe3   :  { %2359 = vmatmul.mubr.f32.gmra.mrb[96].mxu0 %v78_v59  ;;  %2538 = vmatmul.mubr.f32.gmra.mrb[96].mxu1 %v1822_v60  ;;  %v1852_v60 = vld [vmem:[%s4771_s0 + $0x3f8] sm:$0xff] }
  0xe4   :  { %2572 = vmatprep.mubr.msk.f32.mxu0 %vm2998_vm0, %v2999_v6  ;;  %2751 = vmatprep.mubr.msk.f32.mxu1 %vm2998_vm0, %v2999_v6 }
  0xe7   :  { %2573 = vmatmul.mubr.f32.vlgmr.msra.gmra.mrb[98].mxu0 %v1823_v61  ;;  %2752 = vmatmul.mubr.f32.vlgmr.msra.gmra.mrb[98].mxu1 %v1872_v62  ;;  %v1835_v62 = vld [vmem:[%s4771_s0 + $0x370] sm:$0xff] }
  0xe8   :  { %2575 = vmatprep.mubr.msk.f32.mxu0 %vm2998_vm0, %v2999_v6  ;;  %2754 = vmatprep.mubr.msk.f32.mxu1 %vm2998_vm0, %v2999_v6 }
  0xeb   :  { %2576 = vmatmul.mubr.f32.gmra.mrb[100].mxu0 %v1824_v63  ;;  %2755 = vmatmul.mubr.f32.gmra.mrb[100].mxu1 %v1873_v0  ;;  %v1884_v63 = vld [vmem:[%s4771_s0 + $0x4f8] sm:$0xff] }
  0xec   :  { %2578 = vmatprep.mubr.msk.f32.mxu0 %vm2998_vm0, %v2999_v6  ;;  %2757 = vmatprep.mubr.msk.f32.mxu1 %vm2998_vm0, %v2999_v6 }
  0xef   :  { %2579 = vmatmul.mubr.f32.gmra.mrb[102].mxu0 %v1825_v1  ;;  %2758 = vmatmul.mubr.f32.gmra.mrb[102].mxu1 %v1874_v2 }
  0xf0   :  { %2581 = vmatprep.mubr.msk.f32.mxu0 %vm2998_vm0, %v2999_v6  ;;  %2760 = vmatprep.mubr.msk.f32.mxu1 %vm2998_vm0, %v2999_v6 }
  0xf3   :  { %2582 = vmatmul.mubr.f32.gmra.mrb[104].mxu0 %v1826_v3  ;;  %2761 = vmatmul.mubr.f32.gmra.mrb[104].mxu1 %v1875_v4 }
  0xf4   :  { %2584 = vmatprep.mubr.msk.f32.mxu0 %vm2998_vm0, %v2999_v6  ;;  %2763 = vmatprep.mubr.msk.f32.mxu1 %vm2998_vm0, %v2999_v6 }
  0xf6   :  { %v3688_v8 = vpop.f32.mrb[0].mxu0  ;;  %v3690_v9 = vpop.f32.mrb[0].mxu1 }
  0xf7   :  { %v2216_v10 = vpop.f32.mrb[1].mxu0  ;;  %2585 = vmatmul.mubr.f32.gmra.mrb[106].mxu0 %v1827_v5  ;;  %v2395_v12 = vpop.f32.mrb[1].mxu1  ;;  %2764 = vmatmul.mubr.f32.gmra.mrb[106].mxu1 %v1876_v7  ;;  %v1836_v5 = vld [vmem:[%s4771_s0 + $0x378] sm:$0xff]  ;;  %v1885_v7 = vld [vmem:[%s4771_s0 + $0x500] sm:$0xff] }
  0xf8   :  { %2587 = vmatprep.mubr.msk.f32.mxu0 %vm2998_vm0, %v2999_v6  ;;  %2766 = vmatprep.mubr.msk.f32.mxu1 %vm2998_vm0, %v2999_v6 }
  0xfa   :  { %v3704_v15 = vpop.f32.mrb[2].mxu0  ;;  %v3706_v16 = vpop.f32.mrb[2].mxu1 }
  0xfb   :  { %v2219_v17 = vpop.f32.mrb[3].mxu0  ;;  %2588 = vmatmul.mubr.f32.gmra.mrb[108].mxu0 %v1828_v13  ;;  %v2398_v19 = vpop.f32.mrb[3].mxu1  ;;  %2767 = vmatmul.mubr.f32.gmra.mrb[108].mxu1 %v1877_v14  ;;  %v1851_v14 = vld [vmem:[%s4771_s0 + $0x3f0] sm:$0xff] }
  0xfc   :  { %2590 = vmatprep.mubr.msk.f32.mxu0 %vm2998_vm0, %v2999_v6  ;;  %2769 = vmatprep.mubr.msk.f32.mxu1 %vm2998_vm0, %v2999_v6  ;;  %v1837_v19 = vld [vmem:[%s4771_s0 + $0x380] sm:$0xff] }
  0xfe   :  { %v3720_v22 = vpop.f32.mrb[4].mxu0  ;;  %v3722_v23 = vpop.f32.mrb[4].mxu1 }
  0xff   :  { %v2222_v24 = vpop.f32.mrb[5].mxu0  ;;  %2591 = vmatmul.mubr.f32.gmra.mrb[110].mxu0 %v1829_v20  ;;  %v2401_v26 = vpop.f32.mrb[5].mxu1  ;;  %2770 = vmatmul.mubr.f32.gmra.mrb[110].mxu1 %v1878_v21  ;;  %v1886_v20 = vld [vmem:[%s4771_s0 + $0x508] sm:$0xff] }
 0x100   :  { %2593 = vmatprep.mubr.msk.f32.mxu0 %vm2998_vm0, %v2999_v6  ;;  %2772 = vmatprep.mubr.msk.f32.mxu1 %vm2998_vm0, %v2999_v6 }
 0x102   :  { %v3736_v29 = vpop.f32.mrb[6].mxu0  ;;  %v3738_v30 = vpop.f32.mrb[6].mxu1 }
 0x103   :  { %v2225_v31 = vpop.f32.mrb[7].mxu0  ;;  %2594 = vmatmul.mubr.f32.gmra.mrb[112].mxu0 %v1830_v27  ;;  %v2404_v33 = vpop.f32.mrb[7].mxu1  ;;  %2773 = vmatmul.mubr.f32.gmra.mrb[112].mxu1 %v1879_v28 }
 0x104   :  { %2596 = vmatprep.mubr.msk.f32.mxu0 %vm2998_vm0, %v2999_v6  ;;  %2775 = vmatprep.mubr.msk.f32.mxu1 %vm2998_vm0, %v2999_v6  ;;  %v1838_v31 = vld [vmem:[%s4771_s0 + $0x388] sm:$0xff]  ;;  %v1887_v33 = vld [vmem:[%s4771_s0 + $0x510] sm:$0xff] }
 0x106   :  { %v3752_v36 = vpop.f32.mrb[8].mxu0  ;;  %v3754_v37 = vpop.f32.mrb[8].mxu1 }
 0x107   :  { %v2228_v38 = vpop.f32.mrb[9].mxu0  ;;  %2597 = vmatmul.mubr.f32.gmra.mrb[114].mxu0 %v1831_v34  ;;  %v2407_v40 = vpop.f32.mrb[9].mxu1  ;;  %2776 = vmatmul.mubr.f32.gmra.mrb[114].mxu1 %v1880_v35 }
 0x108   :  { %2599 = vmatprep.mubr.msk.f32.mxu0 %vm2998_vm0, %v2999_v6  ;;  %2778 = vmatprep.mubr.msk.f32.mxu1 %vm2998_vm0, %v2999_v6  ;;  %v1850_v40 = vld [vmem:[%s4771_s0 + $0x3e8] sm:$0xff] }
 0x10a   :  { %v3768_v43 = vpop.f32.mrb[10].mxu0  ;;  %v3770_v44 = vpop.f32.mrb[10].mxu1 }
 0x10b   :  { %v2231_v45 = vpop.f32.mrb[11].mxu0  ;;  %2600 = vmatmul.mubr.f32.gmra.mrb[116].mxu0 %v1832_v41  ;;  %v2410_v47 = vpop.f32.mrb[11].mxu1  ;;  %2779 = vmatmul.mubr.f32.gmra.mrb[116].mxu1 %v1881_v42  ;;  %v1839_v42 = vld [vmem:[%s4771_s0 + $0x390] sm:$0xff] }
 0x10c   :  { %2602 = vmatprep.mubr.msk.f32.mxu0 %vm2998_vm0, %v2999_v6  ;;  %2781 = vmatprep.mubr.msk.f32.mxu1 %vm2998_vm0, %v2999_v6  ;;  %v1888_v45 = vld [vmem:[%s4771_s0 + $0x518] sm:$0xff] }
 0x10e   :  { %v3784_v50 = vpop.f32.mrb[12].mxu0  ;;  %v3786_v51 = vpop.f32.mrb[12].mxu1 }
 0x10f   :  { %v2234_v52 = vpop.f32.mrb[13].mxu0  ;;  %2603 = vmatmul.mubr.f32.gmra.mrb[118].mxu0 %v1833_v48  ;;  %v2413_v54 = vpop.f32.mrb[13].mxu1  ;;  %2782 = vmatmul.mubr.f32.gmra.mrb[118].mxu1 %v1882_v49 }
 0x110   :  { %2605 = vmatprep.mubr.msk.f32.mxu0 %vm2998_vm0, %v2999_v6  ;;  %2784 = vmatprep.mubr.msk.f32.mxu1 %vm2998_vm0, %v2999_v6 }
 0x112   :  { %v3800_v57 = vpop.f32.mrb[14].mxu0  ;;  %v3802_v58 = vpop.f32.mrb[14].mxu1 }
 0x113   :  { %v2237_v59 = vpop.f32.mrb[15].mxu0  ;;  %2606 = vmatmul.mubr.f32.gmra.mrb[120].mxu0 %v1834_v55  ;;  %v2416_v61 = vpop.f32.mrb[15].mxu1  ;;  %2785 = vmatmul.mubr.f32.gmra.mrb[120].mxu1 %v1883_v56  ;;  %v1840_v55 = vld [vmem:[%s4771_s0 + $0x398] sm:$0xff]  ;;  %v1889_v56 = vld [vmem:[%s4771_s0 + $0x520] sm:$0xff] }
 0x114   :  { %2608 = vmatprep.mubr.msk.f32.mxu0 %vm2998_vm0, %v2999_v6  ;;  %2787 = vmatprep.mubr.msk.f32.mxu1 %vm2998_vm0, %v2999_v6 }
 0x116   :  { %v3816_v0 = vpop.f32.mrb[16].mxu0  ;;  %v3818_v1 = vpop.f32.mrb[16].mxu1 }
 0x117   :  { %v2240_v2 = vpop.f32.mrb[17].mxu0  ;;  %2609 = vmatmul.mubr.f32.gmra.mrb[122].mxu0 %v1835_v62  ;;  %v2419_v4 = vpop.f32.mrb[17].mxu1  ;;  %2788 = vmatmul.mubr.f32.gmra.mrb[122].mxu1 %v1884_v63  ;;  %v1849_v63 = vld [vmem:[%s4771_s0 + $0x3e0] sm:$0xff] }
 0x118   :  { %2611 = vmatprep.mubr.msk.f32.mxu0 %vm2998_vm0, %v2999_v6  ;;  %2790 = vmatprep.mubr.msk.f32.mxu1 %vm2998_vm0, %v2999_v6  ;;  %v1841_v4 = vld [vmem:[%s4771_s0 + $0x3a0] sm:$0xff] }
 0x11a   :  { %v3832_v10 = vpop.f32.mrb[18].mxu0  ;;  %v3834_v12 = vpop.f32.mrb[18].mxu1 }
 0x11b   :  { %v2243_v13 = vpop.f32.mrb[19].mxu0  ;;  %2612 = vmatmul.mubr.f32.gmra.mrb[124].mxu0 %v1836_v5  ;;  %v2422_v17 = vpop.f32.mrb[19].mxu1  ;;  %2791 = vmatmul.mubr.f32.gmra.mrb[124].mxu1 %v1885_v7  ;;  %v1890_v5 = vld [vmem:[%s4771_s0 + $0x528] sm:$0xff] }
 0x11c   :  { %2614 = vmatprep.mubr.msk.f32.mxu0 %vm2998_vm0, %v2999_v6  ;;  %2793 = vmatprep.mubr.msk.f32.mxu1 %vm2998_vm0, %v2999_v6 }
 0x11e   :  { %v3848_v21 = vpop.f32.mrb[20].mxu0  ;;  %v3850_v24 = vpop.f32.mrb[20].mxu1 }
 0x11f   :  { %v2246_v26 = vpop.f32.mrb[21].mxu0  ;;  %2615 = vmatmul.mubr.f32.gmra.mrb[126].mxu0 %v1837_v19  ;;  %v2425_v28 = vpop.f32.mrb[21].mxu1  ;;  %2794 = vmatmul.mubr.f32.gmra.mrb[126].mxu1 %v1886_v20 }
 0x120   :  { %2617 = vmatprep.mubr.msk.f32.mxu0 %vm2998_vm0, %v2999_v6  ;;  %2796 = vmatprep.mubr.msk.f32.mxu1 %vm2998_vm0, %v2999_v6  ;;  %v1842_v26 = vld [vmem:[%s4771_s0 + $0x3a8] sm:$0xff]  ;;  %v1891_v28 = vld [vmem:[%s4771_s0 + $0x530] sm:$0xff] }
 0x122   :  { %v3864_v34 = vpop.f32.mrb[22].mxu0  ;;  %v3866_v35 = vpop.f32.mrb[22].mxu1 }
 0x123   :  { %v2249_v38 = vpop.f32.mrb[23].mxu0  ;;  %2618 = vmatmul.mubr.f32.gmra.mrb[128].mxu0 %v1838_v31  ;;  %v2428_v41 = vpop.f32.mrb[23].mxu1  ;;  %2797 = vmatmul.mubr.f32.gmra.mrb[128].mxu1 %v1887_v33 }
 0x124   :  { %2620 = vmatprep.mubr.msk.f32.mxu0 %vm2998_vm0, %v2999_v6  ;;  %2799 = vmatprep.mubr.msk.f32.mxu1 %vm2998_vm0, %v2999_v6  ;;  %v1848_v41 = vld [vmem:[%s4771_s0 + $0x3d8] sm:$0xff] }
 0x126   :  { %v3880_v47 = vpop.f32.mrb[24].mxu0  ;;  %v3882_v48 = vpop.f32.mrb[24].mxu1 }
 0x127   :  { %v2252_v49 = vpop.f32.mrb[25].mxu0  ;;  %2621 = vmatmul.mubr.f32.gmra.mrb[130].mxu0 %v1839_v42  ;;  %v2431_v54 = vpop.f32.mrb[25].mxu1  ;;  %2800 = vmatmul.mubr.f32.gmra.mrb[130].mxu1 %v1888_v45  ;;  %v1843_v45 = vld [vmem:[%s4771_s0 + $0x3b0] sm:$0xff] }
 0x128   :  { %2623 = vmatprep.mubr.msk.f32.mxu0 %vm2998_vm0, %v2999_v6  ;;  %2802 = vmatprep.mubr.msk.f32.mxu1 %vm2998_vm0, %v2999_v6  ;;  %v1892_v49 = vld [vmem:[%s4771_s0 + $0x538] sm:$0xff] }
 0x12a   :  { %v3896_v59 = vpop.f32.mrb[26].mxu0  ;;  %v3898_v61 = vpop.f32.mrb[26].mxu1 }
 0x12b   :  { %v2255_v62 = vpop.f32.mrb[27].mxu0  ;;  %2624 = vmatmul.mubr.f32.gmra.mrb[132].mxu0 %v1840_v55  ;;  %v2434_v2 = vpop.f32.mrb[27].mxu1  ;;  %2803 = vmatmul.mubr.f32.gmra.mrb[132].mxu1 %v1889_v56 }
 0x12c   :  { %2626 = vmatprep.mubr.msk.f32.mxu0 %vm2998_vm0, %v2999_v6  ;;  %2805 = vmatprep.mubr.msk.f32.mxu1 %vm2998_vm0, %v2999_v6 }
 0x12e   :  { %v3912_v7 = vpop.f32.mrb[28].mxu0  ;;  %v3914_v13 = vpop.f32.mrb[28].mxu1 }
 0x12f   :  { %v2258_v17 = vpop.f32.mrb[29].mxu0  ;;  %2627 = vmatmul.mubr.f32.gmra.mrb[134].mxu0 %v1841_v4  ;;  %v2437_v20 = vpop.f32.mrb[29].mxu1  ;;  %2806 = vmatmul.mubr.f32.gmra.mrb[134].mxu1 %v1890_v5  ;;  %v1844_v4 = vld [vmem:[%s4771_s0 + $0x3b8] sm:$0xff]  ;;  %v1893_v5 = vld [vmem:[%s4771_s0 + $0x540] sm:$0xff] }
 0x130   :  { %2629 = vmatprep.mubr.msk.f32.mxu0 %vm2998_vm0, %v2999_v6  ;;  %2808 = vmatprep.mubr.msk.f32.mxu1 %vm2998_vm0, %v2999_v6 }
 0x132   :  { %v3928_v31 = vpop.f32.mrb[30].mxu0  ;;  %v3930_v33 = vpop.f32.mrb[30].mxu1 }
 0x133   :  { %v2261_v38 = vpop.f32.mrb[31].mxu0  ;;  %2630 = vmatmul.mubr.f32.gmra.mrb[136].mxu0 %v1842_v26  ;;  %v2440_v42 = vpop.f32.mrb[31].mxu1  ;;  %2809 = vmatmul.mubr.f32.gmra.mrb[136].mxu1 %v1891_v28  ;;  %v1847_v28 = vld [vmem:[%s4771_s0 + $0x3d0] sm:$0xff] }
 0x134   :  { %2632 = vmatprep.mubr.msk.f32.mxu0 %vm2998_vm0, %v2999_v6  ;;  %2811 = vmatprep.mubr.msk.f32.mxu1 %vm2998_vm0, %v2999_v6  ;;  %v1845_v42 = vld [vmem:[%s4771_s0 + $0x3c0] sm:$0xff] }
 0x136   :  { %v3944_v54 = vpop.f32.mrb[32].mxu0  ;;  %v3946_v55 = vpop.f32.mrb[32].mxu1 }
 0x137   :  { %v2264_v56 = vpop.f32.mrb[33].mxu0  ;;  %2633 = vmatmul.mubr.f32.gmra.mrb[138].mxu0 %v1843_v45  ;;  %v2443_v2 = vpop.f32.mrb[33].mxu1  ;;  %2812 = vmatmul.mubr.f32.gmra.mrb[138].mxu1 %v1892_v49  ;;  %v1894_v45 = vld [vmem:[%s4771_s0 + $0x548] sm:$0xff] }
 0x138   :  { %2635 = vmatprep.mubr.msk.f32.mxu0 %vm2998_vm0, %v2999_v6  ;;  %2814 = vmatprep.mubr.msk.f32.mxu1 %vm2998_vm0, %v2999_v6 }
 0x13a   :  { %v3960_v17 = vpop.f32.mrb[34].mxu0  ;;  %v3962_v20 = vpop.f32.mrb[34].mxu1 }
 0x13b   :  { %v2267_v26 = vpop.f32.mrb[35].mxu0  ;;  %2636 = vmatmul.mubr.f32.gmra.mrb[140].mxu0 %v1844_v4  ;;  %v2446_v38 = vpop.f32.mrb[35].mxu1  ;;  %2815 = vmatmul.mubr.f32.gmra.mrb[140].mxu1 %v1893_v5 }
 0x13c   :  { %2638 = vmatprep.mubr.msk.f32.mxu0 %vm2998_vm0, %v2999_v6  ;;  %2817 = vmatprep.mubr.msk.f32.mxu1 %vm2998_vm0, %v2999_v6  ;;  %v1846_v26 = vld [vmem:[%s4771_s0 + $0x3c8] sm:$0xff]  ;;  %v1895_v38 = vld [vmem:[%s4771_s0 + $0x550] sm:$0xff] }
 0x13e   :  { %v3976_v49 = vpop.f32.mrb[36].mxu0  ;;  %v3978_v56 = vpop.f32.mrb[36].mxu1 }
 0x13f   :  { %v2270_v2 = vpop.f32.mrb[37].mxu0  ;;  %2639 = vmatmul.mubr.f32.gmra.mrb[142].mxu0 %v1845_v42  ;;  %v2449_v5 = vpop.f32.mrb[37].mxu1  ;;  %2818 = vmatmul.mubr.f32.gmra.mrb[142].mxu1 %v1894_v45 }
 0x140   :  { %2641 = vmatprep.mubr.msk.f32.mxu0 %vm2998_vm0, %v2999_v6  ;;  %2820 = vmatprep.mubr.msk.f32.mxu1 %vm2998_vm0, %v2999_v6 }
 0x142   :  { %v3992_v2 = vpop.f32.mrb[38].mxu0  ;;  %v3994_v4 = vpop.f32.mrb[38].mxu1 }
 0x143   :  { %v2273_v42 = vpop.f32.mrb[39].mxu0  ;;  %2642 = vmatmul.mubr.f32.gmra.mrb[144].mxu0 %v1846_v26  ;;  %v2452_v5 = vpop.f32.mrb[39].mxu1  ;;  %2821 = vmatmul.mubr.f32.gmra.mrb[144].mxu1 %v1895_v38 }
 0x144   :  { %2644 = vmatprep.mubr.msk.f32.mxu0 %vm2998_vm0, %v2999_v6  ;;  %2823 = vmatprep.mubr.msk.f32.mxu1 %vm2998_vm0, %v2999_v6  ;;  %v1896_v42 = vld [vmem:[%s4771_s0 + $0x558] sm:$0xff] }
 0x146   :  { %v4008_v62 = vpop.f32.mrb[40].mxu0  ;;  %v4010_v45 = vpop.f32.mrb[40].mxu1 }
 0x147   :  { %v2276_v26 = vpop.f32.mrb[41].mxu0  ;;  %2645 = vmatmul.mubr.f32.gmra.mrb[146].mxu0 %v1847_v28  ;;  %v2455_v5 = vpop.f32.mrb[41].mxu1  ;;  %2824 = vmatmul.mubr.f32.gmra.mrb[146].mxu1 %v1896_v42 }
 0x148   :  { %2647 = vmatprep.mubr.msk.f32.mxu0 %vm2998_vm0, %v2999_v6  ;;  %2826 = vmatprep.mubr.msk.f32.mxu1 %vm2998_vm0, %v2999_v6  ;;  %v1897_v26 = vld [vmem:[%s4771_s0 + $0x560] sm:$0xff] }
 0x14a   :  { %v4024_v19 = vpop.f32.mrb[42].mxu0  ;;  %v4026_v38 = vpop.f32.mrb[42].mxu1 }
 0x14b   :  { %v2279_v28 = vpop.f32.mrb[43].mxu0  ;;  %2648 = vmatmul.mubr.f32.gmra.mrb[148].mxu0 %v1848_v41  ;;  %v2458_v5 = vpop.f32.mrb[43].mxu1  ;;  %2827 = vmatmul.mubr.f32.gmra.mrb[148].mxu1 %v1897_v26 }
 0x14c   :  { %2650 = vmatprep.mubr.msk.f32.mxu0 %vm2998_vm0, %v2999_v6  ;;  %2829 = vmatprep.mubr.msk.f32.mxu1 %vm2998_vm0, %v2999_v6  ;;  %v1898_v28 = vld [vmem:[%s4771_s0 + $0x568] sm:$0xff] }
 0x14e   :  { %v4040_v52 = vpop.f32.mrb[44].mxu0  ;;  %v4042_v42 = vpop.f32.mrb[44].mxu1 }
 0x14f   :  { %v2282_v41 = vpop.f32.mrb[45].mxu0  ;;  %2651 = vmatmul.mubr.f32.gmra.mrb[150].mxu0 %v1849_v63  ;;  %v2461_v5 = vpop.f32.mrb[45].mxu1  ;;  %2830 = vmatmul.mubr.f32.gmra.mrb[150].mxu1 %v1898_v28 }
 0x150   :  { %2653 = vmatprep.mubr.msk.f32.mxu0 %vm2998_vm0, %v2999_v6  ;;  %2832 = vmatprep.mubr.msk.f32.mxu1 %vm2998_vm0, %v2999_v6  ;;  %v1899_v41 = vld [vmem:[%s4771_s0 + $0x570] sm:$0xff] }
 0x152   :  { %v4056_v27 = vpop.f32.mrb[46].mxu0  ;;  %v4058_v26 = vpop.f32.mrb[46].mxu1 }
 0x153   :  { %v2285_v63 = vpop.f32.mrb[47].mxu0  ;;  %2654 = vmatmul.mubr.f32.gmra.mrb[152].mxu0 %v1850_v40  ;;  %v2464_v5 = vpop.f32.mrb[47].mxu1  ;;  %2833 = vmatmul.mubr.f32.gmra.mrb[152].mxu1 %v1899_v41 }
 0x154   :  { %2656 = vmatprep.mubr.msk.f32.mxu0 %vm2998_vm0, %v2999_v6  ;;  %2835 = vmatprep.mubr.msk.f32.mxu1 %vm2998_vm0, %v2999_v6  ;;  %v1900_v63 = vld [vmem:[%s4771_s0 + $0x578] sm:$0xff] }
 0x156   :  { %v4072_v3 = vpop.f32.mrb[48].mxu0  ;;  %v4074_v28 = vpop.f32.mrb[48].mxu1 }
 0x157   :  { %4823 = vst [vmem:[#allocation2_spill] sm:$0xff] %v4074_v28  ;;  %v2288_v40 = vpop.f32.mrb[49].mxu0  ;;  %2657 = vmatmul.mubr.f32.gmra.mrb[154].mxu0 %v1851_v14  ;;  %v2467_v5 = vpop.f32.mrb[49].mxu1  ;;  %2836 = vmatmul.mubr.f32.gmra.mrb[154].mxu1 %v1900_v63 }
 0x158   :  { %2659 = vmatprep.mubr.msk.f32.mxu0 %vm2998_vm0, %v2999_v6  ;;  %2838 = vmatprep.mubr.msk.f32.mxu1 %vm2998_vm0, %v2999_v6  ;;  %v1901_v40 = vld [vmem:[%s4771_s0 + $0x580] sm:$0xff] }
 0x15a   :  { %v4088_v53 = vpop.f32.mrb[50].mxu0  ;;  %v4090_v41 = vpop.f32.mrb[50].mxu1 }
 0x15b   :  { %4824 = vst [vmem:[#allocation3_spill] sm:$0xff] %v4088_v53  ;;  %4825 = vst [vmem:[#allocation4_spill] sm:$0xff] %v4090_v41  ;;  %v2291_v14 = vpop.f32.mrb[51].mxu0  ;;  %2660 = vmatmul.mubr.f32.gmra.mrb[156].mxu0 %v1852_v60  ;;  %v2470_v5 = vpop.f32.mrb[51].mxu1  ;;  %2839 = vmatmul.mubr.f32.gmra.mrb[156].mxu1 %v1901_v40 }
 0x15c   :  { %2662 = vmatprep.mubr.msk.f32.mxu0 %vm2998_vm0, %v2999_v6  ;;  %2841 = vmatprep.mubr.msk.f32.mxu1 %vm2998_vm0, %v2999_v6  ;;  %v1902_v14 = vld [vmem:[%s4771_s0 + $0x588] sm:$0xff] }
 0x15e   :  { %v4104_v39 = vpop.f32.mrb[52].mxu0  ;;  %v4106_v63 = vpop.f32.mrb[52].mxu1 }
 0x15f   :  { %4826 = vst [vmem:[#allocation5_spill] sm:$0xff] %v4104_v39  ;;  %4827 = vst [vmem:[#allocation6_spill] sm:$0xff] %v4106_v63  ;;  %v2294_v60 = vpop.f32.mrb[53].mxu0  ;;  %2663 = vmatmul.mubr.f32.gmra.mrb[158].mxu0 %v1853_v46  ;;  %v2473_v5 = vpop.f32.mrb[53].mxu1  ;;  %2842 = vmatmul.mubr.f32.gmra.mrb[158].mxu1 %v1902_v14 }
 0x160   :  { %2665 = vmatprep.mubr.msk.f32.mxu0 %vm2998_vm0, %v2999_v6  ;;  %2844 = vmatprep.mubr.msk.f32.mxu1 %vm2998_vm0, %v2999_v6  ;;  %v1903_v60 = vld [vmem:[%s4771_s0 + $0x590] sm:$0xff] }
 0x162   :  { %v4120_v25 = vpop.f32.mrb[54].mxu0  ;;  %v4122_v40 = vpop.f32.mrb[54].mxu1 }
 0x163   :  { %4828 = vst [vmem:[#allocation7_spill] sm:$0xff] %v4120_v25  ;;  %4829 = vst [vmem:[#allocation8_spill] sm:$0xff] %v4122_v40  ;;  %v2297_v46 = vpop.f32.mrb[55].mxu0  ;;  %2666 = vmatmul.mubr.f32.gmra.mrb[160].mxu0 %v1854_v32  ;;  %v2476_v5 = vpop.f32.mrb[55].mxu1  ;;  %2845 = vmatmul.mubr.f32.gmra.mrb[160].mxu1 %v1903_v60  ;;  %v1856_v40 = vld [vmem:[%s4771_s0 + $0x418] sm:$0xff] }
 0x164   :  { %2668 = vmatprep.mubr.msk.f32.mxu0 %vm2998_vm0, %v2999_v6  ;;  %2847 = vmatprep.mubr.msk.f32.mxu1 %vm2998_vm0, %v2999_v6  ;;  %v1904_v46 = vld [vmem:[%s4771_s0 + $0x598] sm:$0xff] }
 0x166   :  { %v4136_v11 = vpop.f32.mrb[56].mxu0  ;;  %v4138_v14 = vpop.f32.mrb[56].mxu1 }
 0x167   :  { %4830 = vst [vmem:[#allocation9_spill] sm:$0xff] %v4136_v11  ;;  %4831 = vst [vmem:[#allocation10_spill] sm:$0xff] %v4138_v14  ;;  %v2300_v32 = vpop.f32.mrb[57].mxu0  ;;  %2669 = vmatmul.mubr.f32.gmra.mrb[162].mxu0 %v1855_v18  ;;  %v2479_v5 = vpop.f32.mrb[57].mxu1  ;;  %2848 = vmatmul.mubr.f32.gmra.mrb[162].mxu1 %v1904_v46  ;;  %v1857_v14 = vld [vmem:[%s4771_s0 + $0x420] sm:$0xff] }
 0x168   :  { %2671 = vmatprep.mubr.msk.f32.mxu0 %vm2998_vm0, %v2999_v6  ;;  %2850 = vmatprep.mubr.msk.f32.mxu1 %vm2998_vm0, %v2999_v6  ;;  %v1905_v32 = vld [vmem:[%s4771_s0 + $0x5a0] sm:$0xff] }
 0x16a   :  { %v4152_v25 = vpop.f32.mrb[58].mxu0  ;;  %v4154_v60 = vpop.f32.mrb[58].mxu1 }
 0x16b   :  { %4832 = vst [vmem:[#allocation11_spill] sm:$0xff] %v4152_v25  ;;  %4833 = vst [vmem:[#allocation12_spill] sm:$0xff] %v4154_v60  ;;  %v2303_v18 = vpop.f32.mrb[59].mxu0  ;;  %2672 = vmatmul.mubr.f32.gmra.mrb[164].mxu0 %v1856_v40  ;;  %v2482_v5 = vpop.f32.mrb[59].mxu1  ;;  %2851 = vmatmul.mubr.f32.gmra.mrb[164].mxu1 %v1905_v32  ;;  %v1858_v60 = vld [vmem:[%s4771_s0 + $0x428] sm:$0xff] }
 0x16c   :  { %2674 = vmatprep.mubr.msk.f32.mxu0 %vm2998_vm0, %v2999_v6  ;;  %2853 = vmatprep.mubr.msk.f32.mxu1 %vm2998_vm0, %v2999_v6  ;;  %v1906_v18 = vld [vmem:[%s4771_s0 + $0x5a8] sm:$0xff] }
 0x16e   :  { %v4168_v11 = vpop.f32.mrb[60].mxu0  ;;  %v4170_v46 = vpop.f32.mrb[60].mxu1 }
 0x16f   :  { %4834 = vst [vmem:[#allocation13_spill] sm:$0xff] %v4168_v11  ;;  %4835 = vst [vmem:[#allocation14_spill] sm:$0xff] %v4170_v46  ;;  %v2306_v40 = vpop.f32.mrb[61].mxu0  ;;  %2675 = vmatmul.mubr.f32.gmra.mrb[166].mxu0 %v1857_v14  ;;  %v2485_v5 = vpop.f32.mrb[61].mxu1  ;;  %2854 = vmatmul.mubr.f32.gmra.mrb[166].mxu1 %v1906_v18  ;;  %v1859_v46 = vld [vmem:[%s4771_s0 + $0x430] sm:$0xff] }
 0x170   :  { %2677 = vmatprep.mubr.msk.f32.mxu0 %vm2998_vm0, %v2999_v6  ;;  %2856 = vmatprep.mubr.msk.f32.mxu1 %vm2998_vm0, %v2999_v6  ;;  %v1907_v40 = vld [vmem:[%s4771_s0 + $0x5b0] sm:$0xff] }
 0x172   :  { %v4184_v25 = vpop.f32.mrb[62].mxu0  ;;  %v4186_v32 = vpop.f32.mrb[62].mxu1 }
 0x173   :  { %4836 = vst [vmem:[#allocation15_spill] sm:$0xff] %v4184_v25  ;;  %4837 = vst [vmem:[#allocation16_spill] sm:$0xff] %v4186_v32  ;;  %v2309_v14 = vpop.f32.mrb[63].mxu0  ;;  %2678 = vmatmul.mubr.f32.gmra.mrb[168].mxu0 %v1858_v60  ;;  %v2488_v5 = vpop.f32.mrb[63].mxu1  ;;  %2857 = vmatmul.mubr.f32.gmra.mrb[168].mxu1 %v1907_v40  ;;  %v1860_v32 = vld [vmem:[%s4771_s0 + $0x438] sm:$0xff] }
 0x174   :  { %2680 = vmatprep.mubr.msk.f32.mxu0 %vm2998_vm0, %v2999_v6  ;;  %2859 = vmatprep.mubr.msk.f32.mxu1 %vm2998_vm0, %v2999_v6  ;;  %v1908_v14 = vld [vmem:[%s4771_s0 + $0x5b8] sm:$0xff] }
 0x176   :  { %v4200_v11 = vpop.f32.mrb[64].mxu0  ;;  %v4202_v18 = vpop.f32.mrb[64].mxu1 }
 0x177   :  { %4838 = vst [vmem:[#allocation17_spill] sm:$0xff] %v4200_v11  ;;  %4839 = vst [vmem:[#allocation18_spill] sm:$0xff] %v4202_v18  ;;  %v2312_v60 = vpop.f32.mrb[65].mxu0  ;;  %2681 = vmatmul.mubr.f32.gmra.mrb[170].mxu0 %v1859_v46  ;;  %v2491_v5 = vpop.f32.mrb[65].mxu1  ;;  %2860 = vmatmul.mubr.f32.gmra.mrb[170].mxu1 %v1908_v14  ;;  %v1861_v18 = vld [vmem:[%s4771_s0 + $0x440] sm:$0xff] }
 0x178   :  { %2683 = vmatprep.mubr.msk.f32.mxu0 %vm2998_vm0, %v2999_v6  ;;  %2862 = vmatprep.mubr.msk.f32.mxu1 %vm2998_vm0, %v2999_v6  ;;  %v1909_v60 = vld [vmem:[%s4771_s0 + $0x5c0] sm:$0xff] }
 0x17a   :  { %v4216_v25 = vpop.f32.mrb[66].mxu0  ;;  %v4218_v40 = vpop.f32.mrb[66].mxu1 }
 0x17b   :  { %4840 = vst [vmem:[#allocation19_spill] sm:$0xff] %v4216_v25  ;;  %4841 = vst [vmem:[#allocation20_spill] sm:$0xff] %v4218_v40  ;;  %v2315_v46 = vpop.f32.mrb[67].mxu0  ;;  %2684 = vmatmul.mubr.f32.gmra.mrb[172].mxu0 %v1860_v32  ;;  %v2494_v5 = vpop.f32.mrb[67].mxu1  ;;  %2863 = vmatmul.mubr.f32.gmra.mrb[172].mxu1 %v1909_v60  ;;  %v1862_v40 = vld [vmem:[%s4771_s0 + $0x448] sm:$0xff] }
 0x17c   :  { %2686 = vmatprep.mubr.msk.f32.mxu0 %vm2998_vm0, %v2999_v6  ;;  %2865 = vmatprep.mubr.msk.f32.mxu1 %vm2998_vm0, %v2999_v6  ;;  %v1910_v46 = vld [vmem:[%s4771_s0 + $0x5c8] sm:$0xff] }
 0x17e   :  { %v4232_v11 = vpop.f32.mrb[68].mxu0  ;;  %v4234_v14 = vpop.f32.mrb[68].mxu1 }
 0x17f   :  { %4842 = vst [vmem:[#allocation21_spill] sm:$0xff] %v4232_v11  ;;  %4843 = vst [vmem:[#allocation22_spill] sm:$0xff] %v4234_v14  ;;  %v2318_v32 = vpop.f32.mrb[69].mxu0  ;;  %2687 = vmatmul.mubr.f32.gmra.mrb[174].mxu0 %v1861_v18  ;;  %v2497_v5 = vpop.f32.mrb[69].mxu1  ;;  %2866 = vmatmul.mubr.f32.gmra.mrb[174].mxu1 %v1910_v46  ;;  %v1863_v14 = vld [vmem:[%s4771_s0 + $0x450] sm:$0xff] }
 0x180   :  { %2689 = vmatprep.mubr.msk.f32.mxu0 %vm2998_vm0, %v2999_v6  ;;  %2868 = vmatprep.mubr.msk.f32.mxu1 %vm2998_vm0, %v2999_v6  ;;  %v1911_v32 = vld [vmem:[%s4771_s0 + $0x5d0] sm:$0xff] }
 0x182   :  { %v4248_v25 = vpop.f32.mrb[70].mxu0  ;;  %v4250_v60 = vpop.f32.mrb[70].mxu1 }
 0x183   :  { %4844 = vst [vmem:[#allocation23_spill] sm:$0xff] %v4248_v25  ;;  %4845 = vst [vmem:[#allocation24_spill] sm:$0xff] %v4250_v60  ;;  %v2321_v18 = vpop.f32.mrb[71].mxu0  ;;  %2690 = vmatmul.mubr.f32.gmra.mrb[176].mxu0 %v1862_v40  ;;  %v2500_v5 = vpop.f32.mrb[71].mxu1  ;;  %2869 = vmatmul.mubr.f32.gmra.mrb[176].mxu1 %v1911_v32  ;;  %v1864_v60 = vld [vmem:[%s4771_s0 + $0x458] sm:$0xff] }
 0x184   :  { %2692 = vmatprep.mubr.msk.f32.mxu0 %vm2998_vm0, %v2999_v6  ;;  %2871 = vmatprep.mubr.msk.f32.mxu1 %vm2998_vm0, %v2999_v6  ;;  %v1912_v18 = vld [vmem:[%s4771_s0 + $0x5d8] sm:$0xff] }
 0x186   :  { %v4264_v11 = vpop.f32.mrb[72].mxu0  ;;  %v4266_v46 = vpop.f32.mrb[72].mxu1 }
 0x187   :  { %4846 = vst [vmem:[#allocation25_spill] sm:$0xff] %v4264_v11  ;;  %4847 = vst [vmem:[#allocation26_spill] sm:$0xff] %v4266_v46  ;;  %v2324_v40 = vpop.f32.mrb[73].mxu0  ;;  %2693 = vmatmul.mubr.f32.gmra.mrb[178].mxu0 %v1863_v14  ;;  %v2503_v5 = vpop.f32.mrb[73].mxu1  ;;  %2872 = vmatmul.mubr.f32.gmra.mrb[178].mxu1 %v1912_v18  ;;  %v1865_v46 = vld [vmem:[%s4771_s0 + $0x460] sm:$0xff] }
 0x188   :  { %2695 = vmatprep.mubr.msk.f32.mxu0 %vm2998_vm0, %v2999_v6  ;;  %2874 = vmatprep.mubr.msk.f32.mxu1 %vm2998_vm0, %v2999_v6  ;;  %v1913_v40 = vld [vmem:[%s4771_s0 + $0x5e0] sm:$0xff] }
 0x18a   :  { %v4280_v25 = vpop.f32.mrb[74].mxu0  ;;  %v4282_v32 = vpop.f32.mrb[74].mxu1 }
 0x18b   :  { %4848 = vst [vmem:[#allocation27_spill] sm:$0xff] %v4280_v25  ;;  %4849 = vst [vmem:[#allocation28_spill] sm:$0xff] %v4282_v32  ;;  %v2327_v14 = vpop.f32.mrb[75].mxu0  ;;  %2696 = vmatmul.mubr.f32.gmra.mrb[180].mxu0 %v1864_v60  ;;  %v2506_v5 = vpop.f32.mrb[75].mxu1  ;;  %2875 = vmatmul.mubr.f32.gmra.mrb[180].mxu1 %v1913_v40  ;;  %v1866_v32 = vld [vmem:[%s4771_s0 + $0x468] sm:$0xff] }
 0x18c   :  { %2698 = vmatprep.mubr.msk.f32.mxu0 %vm2998_vm0, %v2999_v6  ;;  %2877 = vmatprep.mubr.msk.f32.mxu1 %vm2998_vm0, %v2999_v6  ;;  %v1914_v14 = vld [vmem:[%s4771_s0 + $0x5e8] sm:$0xff] }
 0x18e   :  { %v4296_v11 = vpop.f32.mrb[76].mxu0  ;;  %v4298_v18 = vpop.f32.mrb[76].mxu1 }
 0x18f   :  { %4850 = vst [vmem:[#allocation29_spill] sm:$0xff] %v4296_v11  ;;  %4851 = vst [vmem:[#allocation30_spill] sm:$0xff] %v4298_v18  ;;  %v2330_v60 = vpop.f32.mrb[77].mxu0  ;;  %2699 = vmatmul.mubr.f32.gmra.mrb[182].mxu0 %v1865_v46  ;;  %v2509_v5 = vpop.f32.mrb[77].mxu1  ;;  %2878 = vmatmul.mubr.f32.gmra.mrb[182].mxu1 %v1914_v14  ;;  %v1867_v18 = vld [vmem:[%s4771_s0 + $0x470] sm:$0xff] }
 0x190   :  { %2701 = vmatprep.mubr.msk.f32.mxu0 %vm2998_vm0, %v2999_v6  ;;  %2880 = vmatprep.mubr.msk.f32.mxu1 %vm2998_vm0, %v2999_v6  ;;  %v1915_v60 = vld [vmem:[%s4771_s0 + $0x5f0] sm:$0xff] }
 0x192   :  { %v4312_v25 = vpop.f32.mrb[78].mxu0  ;;  %v4314_v40 = vpop.f32.mrb[78].mxu1 }
 0x193   :  { %4852 = vst [vmem:[#allocation31_spill] sm:$0xff] %v4312_v25  ;;  %4853 = vst [vmem:[#allocation32_spill] sm:$0xff] %v4314_v40  ;;  %v2333_v46 = vpop.f32.mrb[79].mxu0  ;;  %2702 = vmatmul.mubr.f32.gmra.mrb[184].mxu0 %v1866_v32  ;;  %v2512_v5 = vpop.f32.mrb[79].mxu1  ;;  %2881 = vmatmul.mubr.f32.gmra.mrb[184].mxu1 %v1915_v60  ;;  %v1868_v40 = vld [vmem:[%s4771_s0 + $0x478] sm:$0xff] }
 0x194   :  { %2704 = vmatprep.mubr.msk.f32.mxu0 %vm2998_vm0, %v2999_v6  ;;  %2883 = vmatprep.mubr.msk.f32.mxu1 %vm2998_vm0, %v2999_v6  ;;  %v1916_v46 = vld [vmem:[%s4771_s0 + $0x5f8] sm:$0xff] }
 0x196   :  { %v4328_v11 = vpop.f32.mrb[80].mxu0  ;;  %v4330_v14 = vpop.f32.mrb[80].mxu1 }
 0x197   :  { %4854 = vst [vmem:[#allocation33_spill] sm:$0xff] %v4328_v11  ;;  %4855 = vst [vmem:[#allocation34_spill] sm:$0xff] %v4330_v14  ;;  %v2336_v32 = vpop.f32.mrb[81].mxu0  ;;  %2705 = vmatmul.mubr.f32.gmra.mrb[186].mxu0 %v1867_v18  ;;  %v2515_v5 = vpop.f32.mrb[81].mxu1  ;;  %2884 = vmatmul.mubr.f32.gmra.mrb[186].mxu1 %v1916_v46  ;;  %v1869_v14 = vld [vmem:[%s4771_s0 + $0x480] sm:$0xff] }
 0x198   :  { %2707 = vmatprep.mubr.msk.f32.mxu0 %vm2998_vm0, %v2999_v6  ;;  %2886 = vmatprep.mubr.msk.f32.mxu1 %vm2998_vm0, %v2999_v6  ;;  %v1917_v32 = vld [vmem:[%s4771_s0 + $0x600] sm:$0xff] }
 0x19a   :  { %v4344_v25 = vpop.f32.mrb[82].mxu0  ;;  %v4346_v60 = vpop.f32.mrb[82].mxu1 }
 0x19b   :  { %4856 = vst [vmem:[#allocation35_spill] sm:$0xff] %v4344_v25  ;;  %4857 = vst [vmem:[#allocation36_spill] sm:$0xff] %v4346_v60  ;;  %v2339_v18 = vpop.f32.mrb[83].mxu0  ;;  %2708 = vmatmul.mubr.f32.gmra.mrb[188].mxu0 %v1868_v40  ;;  %v2518_v5 = vpop.f32.mrb[83].mxu1  ;;  %2887 = vmatmul.mubr.f32.gmra.mrb[188].mxu1 %v1917_v32  ;;  %v1870_v60 = vld [vmem:[%s4771_s0 + $0x488] sm:$0xff] }
 0x19c   :  { %2710 = vmatprep.mubr.msk.f32.mxu0 %vm2998_vm0, %v2999_v6  ;;  %2889 = vmatprep.mubr.msk.f32.mxu1 %vm2998_vm0, %v2999_v6  ;;  %v1918_v18 = vld [vmem:[%s4771_s0 + $0x608] sm:$0xff] }
 0x19e   :  { %v4360_v11 = vpop.f32.mrb[84].mxu0  ;;  %v4362_v46 = vpop.f32.mrb[84].mxu1 }
 0x19f   :  { %4858 = vst [vmem:[#allocation37_spill] sm:$0xff] %v4360_v11  ;;  %4859 = vst [vmem:[#allocation38_spill] sm:$0xff] %v4362_v46  ;;  %v2342_v40 = vpop.f32.mrb[85].mxu0  ;;  %2711 = vmatmul.mubr.f32.gmra.mrb[190].mxu0 %v1869_v14  ;;  %v2521_v5 = vpop.f32.mrb[85].mxu1  ;;  %2890 = vmatmul.mubr.f32.gmra.mrb[190].mxu1 %v1918_v18  ;;  %v1871_v46 = vld [vmem:[%s4771_s0 + $0x490] sm:$0xff] }
 0x1a0   :  { %2713 = vmatprep.mubr.msk.f32.mxu0 %vm2998_vm0, %v2999_v6  ;;  %2892 = vmatprep.mubr.msk.f32.mxu1 %vm2998_vm0, %v2999_v6  ;;  %v1919_v40 = vld [vmem:[%s4771_s0 + $0x610] sm:$0xff] }
 0x1a2   :  { %v4376_v25 = vpop.f32.mrb[86].mxu0  ;;  %v4378_v32 = vpop.f32.mrb[86].mxu1 }
 0x1a3   :  { %4860 = vst [vmem:[#allocation39_spill] sm:$0xff] %v4376_v25  ;;  %4861 = vst [vmem:[#allocation40_spill] sm:$0xff] %v4378_v32  ;;  %v2345_v14 = vpop.f32.mrb[87].mxu0  ;;  %2714 = vmatmul.mubr.f32.gmra.mrb[192].mxu0 %v1870_v60  ;;  %v2524_v5 = vpop.f32.mrb[87].mxu1  ;;  %2893 = vmatmul.mubr.f32.gmra.mrb[192].mxu1 %v1919_v40 }
 0x1a4   :  { %2716 = vmatprep.mubr.msk.f32.mxu0 %vm2998_vm0, %v2999_v6  ;;  %2895 = vmatprep.mubr.msk.f32.mxu1 %vm2998_vm0, %v2999_v6  ;;  %v1920_v14 = vld [vmem:[%s4771_s0 + $0x618] sm:$0xff] }
 0x1a6   :  { %v4392_v11 = vpop.f32.mrb[88].mxu0  ;;  %v4394_v18 = vpop.f32.mrb[88].mxu1 }
 0x1a7   :  { %4862 = vst [vmem:[#allocation41_spill] sm:$0xff] %v4392_v11  ;;  %4863 = vst [vmem:[#allocation42_spill] sm:$0xff] %v4394_v18  ;;  %v2348_v60 = vpop.f32.mrb[89].mxu0  ;;  %2717 = vmatmul.mubr.f32.gmra.mrb[194].mxu0 %v1871_v46  ;;  %v2527_v5 = vpop.f32.mrb[89].mxu1  ;;  %2896 = vmatmul.mubr.f32.gmra.mrb[194].mxu1 %v1920_v14 }
 0x1aa   :  { %v4398_v32 = vpop.f32.mrb[90].mxu0  ;;  %v4400_v25 = vpop.f32.mrb[90].mxu1 }
 0x1ab   :  { %4864 = vst [vmem:[#allocation43_spill] sm:$0xff] %v4398_v32  ;;  %4865 = vst [vmem:[#allocation44_spill] sm:$0xff] %v4400_v25  ;;  %v2351_v6 = vpop.f32.mrb[91].mxu0  ;;  %v2530_v39 = vpop.f32.mrb[91].mxu1 }
 0x1ae   :  { %v4404_v41 = vpop.f32.mrb[92].mxu0  ;;  %v4406_v53 = vpop.f32.mrb[92].mxu1 }
 0x1af   :  { %4866 = vst [vmem:[#allocation45_spill] sm:$0xff] %v4404_v41  ;;  %4867 = vst [vmem:[#allocation46_spill] sm:$0xff] %v4406_v53  ;;  %v2354_v60 = vpop.f32.mrb[93].mxu0  ;;  %v2533_v46 = vpop.f32.mrb[93].mxu1  ;;  %v4872_v53 = vmax.f32 %v3688_v8, %v3690_v9 }
 0x1b2   :  { %v4410_v5 = vpop.f32.mrb[94].mxu0  ;;  %v4412_v14 = vpop.f32.mrb[94].mxu1 }
 0x1b3   :  { %4868 = vst [vmem:[#allocation47_spill] sm:$0xff] %v4410_v5  ;;  %4869 = vst [vmem:[#allocation48_spill] sm:$0xff] %v4412_v14  ;;  %v2357_v18 = vpop.f32.mrb[95].mxu0  ;;  %v2536_v11 = vpop.f32.mrb[95].mxu1 }
 0x1b4   :  { %v4428_v11 = vld [vmem:[%s4772_s2] ss:$0 sm:$0xff] }
 0x1b6   :  { %v4416_v63 = vpop.f32.mrb[96].mxu0  ;;  %v4418_v39 = vpop.f32.mrb[96].mxu1 }
 0x1b7   :  { %4870 = vst [vmem:[#allocation49_spill] sm:$0xff] %v4416_v63  ;;  %4871 = vst [vmem:[#allocation50_spill] sm:$0xff] %v4418_v39  ;;  %v2360_v25 = vpop.f32.mrb[97].mxu0  ;;  %v2539_v32 = vpop.f32.mrb[97].mxu1 }
 0x1b8   :  { %v4873_v32 = vmax.f32 %v3704_v15, %v3706_v16 }
 0x1ba   :  { %v914_v40 = vpop.f32.mrb[98].mxu0  ;;  %v1323_v46 = vpop.f32.mrb[98].mxu1 }
 0x1bb   :  { %v1158_v41 = vmax.f32 %v4872_v53, %v914_v40  ;;  %v2574_v18 = vpop.f32.mrb[99].mxu0  ;;  %v2753_v28 = vpop.f32.mrb[99].mxu1  ;;  %v4874_v40 = vmax.f32 %v3720_v22, %v3722_v23 }
 0x1bd   :  { %v1567_v6 = vmax.f32 %v1158_v41, %v1323_v46 }
 0x1be   :  { %v919_v14 = vpop.f32.mrb[100].mxu0  ;;  %v1328_v25 = vpop.f32.mrb[100].mxu1 }
 0x1bf   :  { %v1623_v5 = vadd.f32 %v4428_v11, %v1567_v6  ;;  %v1159_v60 = vmax.f32 %v4873_v32, %v919_v14  ;;  %v2577_v39 = vpop.f32.mrb[101].mxu0  ;;  %v2756_v63 = vpop.f32.mrb[101].mxu1 }
 0x1c0   :  { %v4875_v39 = vmax.f32 %v3736_v29, %v3738_v30 }
 0x1c1   :  { %v1672_v8 = vmax.f32 %v1623_v5, 0.0  ;;  %v1568_v9 = vmax.f32 %v1159_v60, %v1328_v25 }
 0x1c2   :  { %v924_v53 = vpop.f32.mrb[102].mxu0  ;;  %v1333_v28 = vpop.f32.mrb[102].mxu1 }
 0x1c3   :  { %1721 = vst [vmem:[%s4773_s3] sm:$0xff] %v1672_v8  ;;  %v1624_v41 = vadd.f32 %v4428_v11, %v1568_v9  ;;  %v1160_v6 = vmax.f32 %v4874_v40, %v924_v53  ;;  %v2580_v46 = vpop.f32.mrb[103].mxu0  ;;  %v2759_v18 = vpop.f32.mrb[103].mxu1 }
 0x1c5   :  { %v1673_v15 = vmax.f32 %v1624_v41, 0.0  ;;  %v1569_v16 = vmax.f32 %v1160_v6, %v1333_v28  ;;  %v4876_v28 = vmax.f32 %v3752_v36, %v3754_v37 }
 0x1c6   :  { %v929_v14 = vpop.f32.mrb[104].mxu0  ;;  %v1338_v63 = vpop.f32.mrb[104].mxu1 }
 0x1c7   :  { %1722 = vst [vmem:[%s4773_s3 + $0x8] sm:$0xff] %v1673_v15  ;;  %v1625_v5 = vadd.f32 %v4428_v11, %v1569_v16  ;;  %v1161_v60 = vmax.f32 %v4875_v39, %v929_v14  ;;  %v2583_v25 = vpop.f32.mrb[105].mxu0  ;;  %v2762_v32 = vpop.f32.mrb[105].mxu1  ;;  %v4877_v16 = vmax.f32 %v3768_v43, %v3770_v44 }
 0x1c8   :  { %v4878_v32 = vmax.f32 %v3784_v50, %v3786_v51 }
 0x1c9   :  { %v1674_v22 = vmax.f32 %v1625_v5, 0.0  ;;  %v1570_v23 = vmax.f32 %v1161_v60, %v1338_v63 }
 0x1ca   :  { %v934_v8 = vpop.f32.mrb[106].mxu0  ;;  %v1343_v9 = vpop.f32.mrb[106].mxu1 }
 0x1cb   :  { %1723 = vst [vmem:[%s4773_s3 + $0x10] sm:$0xff] %v1674_v22  ;;  %v1626_v53 = vadd.f32 %v4428_v11, %v1570_v23  ;;  %v1162_v41 = vmax.f32 %v4876_v28, %v934_v8  ;;  %v2586_v40 = vpop.f32.mrb[107].mxu0  ;;  %v2765_v6 = vpop.f32.mrb[107].mxu1 }
 0x1cd   :  { %v1675_v29 = vmax.f32 %v1626_v53, 0.0  ;;  %v1571_v30 = vmax.f32 %v1162_v41, %v1343_v9  ;;  %v4879_v41 = vmax.f32 %v3800_v57, %v3802_v58 }
 0x1ce   :  { %v939_v46 = vpop.f32.mrb[108].mxu0  ;;  %v1348_v18 = vpop.f32.mrb[108].mxu1 }
 0x1cf   :  { %1724 = vst [vmem:[%s4773_s3 + $0x18] sm:$0xff] %v1675_v29  ;;  %v1627_v15 = vadd.f32 %v4428_v11, %v1571_v30  ;;  %v1163_v14 = vmax.f32 %v4877_v16, %v939_v46  ;;  %v2589_v63 = vpop.f32.mrb[109].mxu0  ;;  %v2768_v5 = vpop.f32.mrb[109].mxu1 }
 0x1d1   :  { %v1676_v36 = vmax.f32 %v1627_v15, 0.0  ;;  %v1572_v37 = vmax.f32 %v1163_v14, %v1348_v18  ;;  %v4880_v15 = vmax.f32 %v3816_v0, %v3818_v1 }
 0x1d2   :  { %v944_v39 = vpop.f32.mrb[110].mxu0  ;;  %v1353_v60 = vpop.f32.mrb[110].mxu1 }
 0x1d3   :  { %1725 = vst [vmem:[%s4773_s3 + $0x20] sm:$0xff] %v1676_v36  ;;  %v1628_v25 = vadd.f32 %v4428_v11, %v1572_v37  ;;  %v1164_v22 = vmax.f32 %v4878_v32, %v944_v39  ;;  %v2592_v23 = vpop.f32.mrb[111].mxu0  ;;  %v2771_v8 = vpop.f32.mrb[111].mxu1  ;;  %v4881_v39 = vmax.f32 %v3832_v10, %v3834_v12 }
 0x1d5   :  { %v1677_v43 = vmax.f32 %v1628_v25, 0.0  ;;  %v1573_v44 = vmax.f32 %v1164_v22, %v1353_v60 }
 0x1d6   :  { %v949_v9 = vpop.f32.mrb[112].mxu0  ;;  %v1358_v53 = vpop.f32.mrb[112].mxu1 }
 0x1d7   :  { %1726 = vst [vmem:[%s4773_s3 + $0x28] sm:$0xff] %v1677_v43  ;;  %v1629_v28 = vadd.f32 %v4428_v11, %v1573_v44  ;;  %v1165_v40 = vmax.f32 %v4879_v41, %v949_v9  ;;  %v2595_v6 = vpop.f32.mrb[113].mxu0  ;;  %v2774_v29 = vpop.f32.mrb[113].mxu1  ;;  %v4882_v43 = vmax.f32 %v3848_v21, %v3850_v24 }
 0x1d8   :  { %v4883_v6 = vmax.f32 %v3864_v34, %v3866_v35 }
 0x1d9   :  { %v1678_v50 = vmax.f32 %v1629_v28, 0.0  ;;  %v1574_v51 = vmax.f32 %v1165_v40, %v1358_v53 }
 0x1da   :  { %v954_v30 = vpop.f32.mrb[114].mxu0  ;;  %v1363_v46 = vpop.f32.mrb[114].mxu1 }
 0x1db   :  { %1727 = vst [vmem:[%s4773_s3 + $0x30] sm:$0xff] %v1678_v50  ;;  %v1630_v18 = vadd.f32 %v4428_v11, %v1574_v51  ;;  %v1166_v16 = vmax.f32 %v4880_v15, %v954_v30  ;;  %v2598_v14 = vpop.f32.mrb[115].mxu0  ;;  %v2777_v63 = vpop.f32.mrb[115].mxu1  ;;  %v4884_v15 = vmax.f32 %v3880_v47, %v3882_v48 }
 0x1dd   :  { %v1679_v57 = vmax.f32 %v1630_v18, 0.0  ;;  %v1575_v58 = vmax.f32 %v1166_v16, %v1363_v46 }
 0x1de   :  { %v959_v5 = vpop.f32.mrb[116].mxu0  ;;  %v1368_v36 = vpop.f32.mrb[116].mxu1 }
 0x1df   :  { %1728 = vst [vmem:[%s4773_s3 + $0x38] sm:$0xff] %v1679_v57  ;;  %v1631_v37 = vadd.f32 %v4428_v11, %v1575_v58  ;;  %v1167_v60 = vmax.f32 %v4881_v39, %v959_v5  ;;  %v2601_v25 = vpop.f32.mrb[117].mxu0  ;;  %v2780_v32 = vpop.f32.mrb[117].mxu1 }
 0x1e1   :  { %v1680_v0 = vmax.f32 %v1631_v37, 0.0  ;;  %v1576_v1 = vmax.f32 %v1167_v60, %v1368_v36  ;;  %v4885_v36 = vmax.f32 %v3896_v59, %v3898_v61 }
 0x1e2   :  { %v964_v22 = vpop.f32.mrb[118].mxu0  ;;  %v1373_v23 = vpop.f32.mrb[118].mxu1 }
 0x1e3   :  { %1729 = vst [vmem:[%s4773_s3 + $0x40] sm:$0xff] %v1680_v0  ;;  %v1632_v8 = vadd.f32 %v4428_v11, %v1576_v1  ;;  %v1168_v44 = vmax.f32 %v4882_v43, %v964_v22  ;;  %v2604_v9 = vpop.f32.mrb[119].mxu0  ;;  %v2783_v53 = vpop.f32.mrb[119].mxu1  ;;  %v4886_v1 = vmax.f32 %v3912_v7, %v3914_v13 }
 0x1e4   :  { %v4887_v53 = vmax.f32 %v3928_v31, %v3930_v33 }
 0x1e5   :  { %v1681_v10 = vmax.f32 %v1632_v8, 0.0  ;;  %v1577_v12 = vmax.f32 %v1168_v44, %v1373_v23 }
 0x1e6   :  { %v969_v28 = vpop.f32.mrb[120].mxu0  ;;  %v1378_v41 = vpop.f32.mrb[120].mxu1 }
 0x1e7   :  { %1730 = vst [vmem:[%s4773_s3 + $0x48] sm:$0xff] %v1681_v10  ;;  %v1633_v40 = vadd.f32 %v4428_v11, %v1577_v12  ;;  %v1169_v29 = vmax.f32 %v4883_v6, %v969_v28  ;;  %v2607_v50 = vpop.f32.mrb[121].mxu0  ;;  %v2786_v51 = vpop.f32.mrb[121].mxu1 }
 0x1e9   :  { %v1682_v21 = vmax.f32 %v1633_v40, 0.0  ;;  %v1578_v24 = vmax.f32 %v1169_v29, %v1378_v41  ;;  %v4888_v29 = vmax.f32 %v3944_v54, %v3946_v55 }
 0x1ea   :  { %v974_v30 = vpop.f32.mrb[122].mxu0  ;;  %v1383_v46 = vpop.f32.mrb[122].mxu1 }
 0x1eb   :  { %1731 = vst [vmem:[%s4773_s3 + $0x50] sm:$0xff] %v1682_v21  ;;  %v1634_v18 = vadd.f32 %v4428_v11, %v1578_v24  ;;  %v1170_v16 = vmax.f32 %v4884_v15, %v974_v30  ;;  %v2610_v14 = vpop.f32.mrb[123].mxu0  ;;  %v2789_v63 = vpop.f32.mrb[123].mxu1 }
 0x1ed   :  { %v1683_v34 = vmax.f32 %v1634_v18, 0.0  ;;  %v1579_v35 = vmax.f32 %v1170_v16, %v1383_v46  ;;  %v4889_v18 = vmax.f32 %v3960_v17, %v3962_v20 }
 0x1ee   :  { %v979_v57 = vpop.f32.mrb[124].mxu0  ;;  %v1388_v58 = vpop.f32.mrb[124].mxu1 }
 0x1ef   :  { %1732 = vst [vmem:[%s4773_s3 + $0x58] sm:$0xff] %v1683_v34  ;;  %v1635_v5 = vadd.f32 %v4428_v11, %v1579_v35  ;;  %v1171_v37 = vmax.f32 %v4885_v36, %v979_v57  ;;  %v2613_v39 = vpop.f32.mrb[125].mxu0  ;;  %v2792_v60 = vpop.f32.mrb[125].mxu1  ;;  %v4890_v57 = vmax.f32 %v3976_v49, %v3978_v56 }
 0x1f1   :  { %v1684_v47 = vmax.f32 %v1635_v5, 0.0  ;;  %v1580_v48 = vmax.f32 %v1171_v37, %v1388_v58 }
 0x1f2   :  { %v984_v25 = vpop.f32.mrb[126].mxu0  ;;  %v1393_v32 = vpop.f32.mrb[126].mxu1 }
 0x1f3   :  { %1733 = vst [vmem:[%s4773_s3 + $0x60] sm:$0xff] %v1684_v47  ;;  %v1636_v0 = vadd.f32 %v4428_v11, %v1580_v48  ;;  %v1172_v22 = vmax.f32 %v4886_v1, %v984_v25  ;;  %v2616_v23 = vpop.f32.mrb[127].mxu0  ;;  %v2795_v8 = vpop.f32.mrb[127].mxu1  ;;  %v4891_v47 = vmax.f32 %v3992_v2, %v3994_v4 }
 0x1f4   :  { %v4892_v23 = vmax.f32 %v4008_v62, %v4010_v45 }
 0x1f5   :  { %v1685_v59 = vmax.f32 %v1636_v0, 0.0  ;;  %v1581_v61 = vmax.f32 %v1172_v22, %v1393_v32 }
 0x1f6   :  { %v989_v43 = vpop.f32.mrb[128].mxu0  ;;  %v1398_v44 = vpop.f32.mrb[128].mxu1 }
 0x1f7   :  { %1734 = vst [vmem:[%s4773_s3 + $0x68] sm:$0xff] %v1685_v59  ;;  %v1637_v9 = vadd.f32 %v4428_v11, %v1581_v61  ;;  %v1173_v10 = vmax.f32 %v4887_v53, %v989_v43  ;;  %v2619_v12 = vpop.f32.mrb[129].mxu0  ;;  %v2798_v28 = vpop.f32.mrb[129].mxu1  ;;  %v4893_v53 = vmax.f32 %v4024_v19, %v4026_v38 }
 0x1f9   :  { %v1686_v7 = vmax.f32 %v1637_v9, 0.0  ;;  %v1582_v13 = vmax.f32 %v1173_v10, %v1398_v44 }
 0x1fa   :  { %v994_v41 = vpop.f32.mrb[130].mxu0  ;;  %v1403_v40 = vpop.f32.mrb[130].mxu1 }
 0x1fb   :  { %1735 = vst [vmem:[%s4773_s3 + $0x70] sm:$0xff] %v1686_v7  ;;  %v1638_v6 = vadd.f32 %v4428_v11, %v1582_v13  ;;  %v1174_v50 = vmax.f32 %v4888_v29, %v994_v41  ;;  %v2622_v51 = vpop.f32.mrb[131].mxu0  ;;  %v2801_v21 = vpop.f32.mrb[131].mxu1 }
 0x1fd   :  { %v1687_v31 = vmax.f32 %v1638_v6, 0.0  ;;  %v1583_v33 = vmax.f32 %v1174_v50, %v1403_v40  ;;  %v4894_v40 = vmax.f32 %v4040_v52, %v4042_v42 }
 0x1fe   :  { %v999_v24 = vpop.f32.mrb[132].mxu0  ;;  %v1408_v30 = vpop.f32.mrb[132].mxu1 }
 0x1ff   :  { %1736 = vst [vmem:[%s4773_s3 + $0x78] sm:$0xff] %v1687_v31  ;;  %v1639_v46 = vadd.f32 %v4428_v11, %v1583_v33  ;;  %v1175_v15 = vmax.f32 %v4889_v18, %v999_v24  ;;  %v2625_v16 = vpop.f32.mrb[133].mxu0  ;;  %v2804_v14 = vpop.f32.mrb[133].mxu1  ;;  %v4895_v33 = vmax.f32 %v4056_v27, %v4058_v26 }
 0x200   :  { %v4896_v14 = vld [vmem:[#allocation2_spill] sm:$0xff] }
 0x201   :  { %v1688_v54 = vmax.f32 %v1639_v46, 0.0  ;;  %v1584_v55 = vmax.f32 %v1175_v15, %v1408_v30 }
 0x202   :  { %v1004_v63 = vpop.f32.mrb[134].mxu0  ;;  %v1413_v34 = vpop.f32.mrb[134].mxu1 }
 0x203   :  { %1737 = vst [vmem:[%s4773_s3 + $0x80] sm:$0xff] %v1688_v54  ;;  %v1640_v35 = vadd.f32 %v4428_v11, %v1584_v55  ;;  %v1176_v58 = vmax.f32 %v4890_v57, %v1004_v63  ;;  %v2628_v5 = vpop.f32.mrb[135].mxu0  ;;  %v2807_v36 = vpop.f32.mrb[135].mxu1  ;;  %v4897_v54 = vmax.f32 %v4072_v3, %v4896_v14 }
 0x204   :  { %v4898_v5 = vld [vmem:[#allocation3_spill] sm:$0xff]  ;;  %v4899_v36 = vld [vmem:[#allocation4_spill] sm:$0xff] }
 0x205   :  { %v1689_v17 = vmax.f32 %v1640_v35, 0.0  ;;  %v1585_v20 = vmax.f32 %v1176_v58, %v1413_v34 }
 0x206   :  { %v1009_v37 = vpop.f32.mrb[136].mxu0  ;;  %v1418_v39 = vpop.f32.mrb[136].mxu1 }
 0x207   :  { %1738 = vst [vmem:[%s4773_s3 + $0x88] sm:$0xff] %v1689_v17  ;;  %v1641_v60 = vadd.f32 %v4428_v11, %v1585_v20  ;;  %v1177_v48 = vmax.f32 %v4891_v47, %v1009_v37  ;;  %v2631_v25 = vpop.f32.mrb[137].mxu0  ;;  %v2810_v32 = vpop.f32.mrb[137].mxu1  ;;  %v4900_v17 = vmax.f32 %v4898_v5, %v4899_v36 }
 0x208   :  { %v4901_v32 = vld [vmem:[#allocation5_spill] sm:$0xff] }
 0x209   :  { %v1690_v49 = vmax.f32 %v1641_v60, 0.0  ;;  %v1586_v56 = vmax.f32 %v1177_v48, %v1418_v39 }
 0x20a   :  { %v1014_v0 = vpop.f32.mrb[138].mxu0  ;;  %v1423_v1 = vpop.f32.mrb[138].mxu1 }
 0x20b   :  { %1739 = vst [vmem:[%s4773_s3 + $0x90] sm:$0xff] %v1690_v49  ;;  %v1642_v22 = vadd.f32 %v4428_v11, %v1586_v56  ;;  %v1178_v8 = vmax.f32 %v4892_v23, %v1014_v0  ;;  %v2634_v59 = vpop.f32.mrb[139].mxu0  ;;  %v2813_v61 = vpop.f32.mrb[139].mxu1  ;;  %v4902_v49 = vld [vmem:[#allocation6_spill] sm:$0xff] }
 0x20c   :  { %v4903_v56 = vmax.f32 %v4901_v32, %v4902_v49 }
 0x20d   :  { %v1691_v4 = vmax.f32 %v1642_v22, 0.0  ;;  %v1587_v2 = vmax.f32 %v1178_v8, %v1423_v1 }
 0x20e   :  { %v1019_v43 = vpop.f32.mrb[140].mxu0  ;;  %v1428_v44 = vpop.f32.mrb[140].mxu1 }
 0x20f   :  { %1740 = vst [vmem:[%s4773_s3 + $0x98] sm:$0xff] %v1691_v4  ;;  %v1643_v9 = vadd.f32 %v4428_v11, %v1587_v2  ;;  %v1179_v10 = vmax.f32 %v4893_v53, %v1019_v43  ;;  %v2637_v12 = vpop.f32.mrb[141].mxu0  ;;  %v2816_v28 = vpop.f32.mrb[141].mxu1  ;;  %v4904_v2 = vld [vmem:[#allocation7_spill] sm:$0xff]  ;;  %v4905_v43 = vld [vmem:[#allocation8_spill] sm:$0xff] }
 0x211   :  { %v1692_v62 = vmax.f32 %v1643_v9, 0.0  ;;  %v1588_v45 = vmax.f32 %v1179_v10, %v1428_v44  ;;  %v4906_v44 = vmax.f32 %v4904_v2, %v4905_v43 }
 0x212   :  { %v1024_v7 = vpop.f32.mrb[142].mxu0  ;;  %v1433_v13 = vpop.f32.mrb[142].mxu1 }
 0x213   :  { %1741 = vst [vmem:[%s4773_s3 + $0xa0] sm:$0xff] %v1692_v62  ;;  %v1644_v41 = vadd.f32 %v4428_v11, %v1588_v45  ;;  %v1180_v6 = vmax.f32 %v4894_v40, %v1024_v7  ;;  %v2640_v29 = vpop.f32.mrb[143].mxu0  ;;  %v2819_v50 = vpop.f32.mrb[143].mxu1 }
 0x215   :  { %v1693_v19 = vmax.f32 %v1644_v41, 0.0  ;;  %v1589_v38 = vmax.f32 %v1180_v6, %v1433_v13  ;;  %v4907_v13 = vld [vmem:[#allocation9_spill] sm:$0xff]  ;;  %v4908_v41 = vld [vmem:[#allocation10_spill] sm:$0xff] }
 0x216   :  { %v1029_v51 = vpop.f32.mrb[144].mxu0  ;;  %v1438_v21 = vpop.f32.mrb[144].mxu1  ;;  %v4909_v40 = vmax.f32 %v4907_v13, %v4908_v41 }
 0x217   :  { %1742 = vst [vmem:[%s4773_s3 + $0xa8] sm:$0xff] %v1693_v19  ;;  %v1645_v31 = vadd.f32 %v4428_v11, %v1589_v38  ;;  %v1181_v24 = vmax.f32 %v4895_v33, %v1029_v51  ;;  %v2643_v30 = vpop.f32.mrb[145].mxu0  ;;  %v2822_v46 = vpop.f32.mrb[145].mxu1  ;;  %v4910_v33 = vld [vmem:[#allocation11_spill] sm:$0xff] }
 0x219   :  { %v1694_v52 = vmax.f32 %v1645_v31, 0.0  ;;  %v1590_v42 = vmax.f32 %v1181_v24, %v1438_v21  ;;  %v4911_v24 = vld [vmem:[#allocation12_spill] sm:$0xff] }
 0x21a   :  { %v1034_v18 = vpop.f32.mrb[146].mxu0  ;;  %v1443_v15 = vpop.f32.mrb[146].mxu1  ;;  %v4912_v30 = vmax.f32 %v4910_v33, %v4911_v24 }
 0x21b   :  { %1743 = vst [vmem:[%s4773_s3 + $0xb0] sm:$0xff] %v1694_v52  ;;  %v1646_v16 = vadd.f32 %v4428_v11, %v1590_v42  ;;  %v1182_v55 = vmax.f32 %v4897_v54, %v1034_v18  ;;  %v2646_v63 = vpop.f32.mrb[147].mxu0  ;;  %v2825_v34 = vpop.f32.mrb[147].mxu1 }
 0x21c   :  { %v4914_v63 = vld [vmem:[#allocation14_spill] sm:$0xff] }
 0x21d   :  { %v1695_v27 = vmax.f32 %v1646_v16, 0.0  ;;  %v1591_v26 = vmax.f32 %v1182_v55, %v1443_v15  ;;  %v4913_v55 = vld [vmem:[#allocation13_spill] sm:$0xff] }
 0x21e   :  { %v1039_v35 = vpop.f32.mrb[148].mxu0  ;;  %v1448_v57 = vpop.f32.mrb[148].mxu1  ;;  %v4915_v34 = vmax.f32 %v4913_v55, %v4914_v63 }
 0x21f   :  { %1744 = vst [vmem:[%s4773_s3 + $0xb8] sm:$0xff] %v1695_v27  ;;  %v1647_v58 = vadd.f32 %v4428_v11, %v1591_v26  ;;  %v1183_v20 = vmax.f32 %v4900_v17, %v1039_v35  ;;  %v2649_v37 = vpop.f32.mrb[149].mxu0  ;;  %v2828_v39 = vpop.f32.mrb[149].mxu1 }
 0x220   :  { %v4917_v37 = vld [vmem:[#allocation16_spill] sm:$0xff] }
 0x221   :  { %v1696_v3 = vmax.f32 %v1647_v58, 0.0  ;;  %v1592_v60 = vmax.f32 %v1183_v20, %v1448_v57  ;;  %v4916_v20 = vld [vmem:[#allocation15_spill] sm:$0xff] }
 0x222   :  { %v1044_v47 = vpop.f32.mrb[150].mxu0  ;;  %v1453_v48 = vpop.f32.mrb[150].mxu1  ;;  %v4918_v39 = vmax.f32 %v4916_v20, %v4917_v37 }
 0x223   :  { %1745 = vst [vmem:[%s4773_s3 + $0xc0] sm:$0xff] %v1696_v3  ;;  %v1648_v25 = vadd.f32 %v4428_v11, %v1592_v60  ;;  %v1184_v0 = vmax.f32 %v4903_v56, %v1044_v47  ;;  %v2652_v1 = vpop.f32.mrb[151].mxu0  ;;  %v2831_v22 = vpop.f32.mrb[151].mxu1 }
 0x224   :  { %v4920_v1 = vld [vmem:[#allocation18_spill] sm:$0xff] }
 0x225   :  { %v1697_v23 = vmax.f32 %v1648_v25, 0.0  ;;  %v1593_v8 = vmax.f32 %v1184_v0, %v1453_v48  ;;  %v4919_v0 = vld [vmem:[#allocation17_spill] sm:$0xff] }
 0x226   :  { %v1049_v59 = vpop.f32.mrb[152].mxu0  ;;  %v1458_v61 = vpop.f32.mrb[152].mxu1  ;;  %v4921_v22 = vmax.f32 %v4919_v0, %v4920_v1 }
 0x227   :  { %1746 = vst [vmem:[%s4773_s3 + $0xc8] sm:$0xff] %v1697_v23  ;;  %v1649_v4 = vadd.f32 %v4428_v11, %v1593_v8  ;;  %v1185_v9 = vmax.f32 %v4906_v44, %v1049_v59  ;;  %v2655_v53 = vpop.f32.mrb[153].mxu0  ;;  %v2834_v10 = vpop.f32.mrb[153].mxu1 }
 0x228   :  { %v4923_v53 = vld [vmem:[#allocation20_spill] sm:$0xff] }
 0x229   :  { %v1698_v12 = vmax.f32 %v1649_v4, 0.0  ;;  %v1594_v28 = vmax.f32 %v1185_v9, %v1458_v61  ;;  %v4922_v9 = vld [vmem:[#allocation19_spill] sm:$0xff] }
 0x22a   :  { %v1054_v62 = vpop.f32.mrb[154].mxu0  ;;  %v1463_v45 = vpop.f32.mrb[154].mxu1  ;;  %v4924_v10 = vmax.f32 %v4922_v9, %v4923_v53 }
 0x22b   :  { %1747 = vst [vmem:[%s4773_s3 + $0xd0] sm:$0xff] %v1698_v12  ;;  %v1650_v7 = vadd.f32 %v4428_v11, %v1594_v28  ;;  %v1186_v6 = vmax.f32 %v4909_v40, %v1054_v62  ;;  %v2658_v29 = vpop.f32.mrb[155].mxu0  ;;  %v2837_v50 = vpop.f32.mrb[155].mxu1 }
 0x22c   :  { %v4926_v29 = vld [vmem:[#allocation22_spill] sm:$0xff] }
 0x22d   :  { %v1699_v19 = vmax.f32 %v1650_v7, 0.0  ;;  %v1595_v38 = vmax.f32 %v1186_v6, %v1463_v45  ;;  %v4925_v6 = vld [vmem:[#allocation21_spill] sm:$0xff] }
 0x22e   :  { %v1059_v51 = vpop.f32.mrb[156].mxu0  ;;  %v1468_v21 = vpop.f32.mrb[156].mxu1  ;;  %v4927_v50 = vmax.f32 %v4925_v6, %v4926_v29 }
 0x22f   :  { %1748 = vst [vmem:[%s4773_s3 + $0xd8] sm:$0xff] %v1699_v19  ;;  %v1651_v31 = vadd.f32 %v4428_v11, %v1595_v38  ;;  %v1187_v46 = vmax.f32 %v4912_v30, %v1059_v51  ;;  %v2661_v52 = vpop.f32.mrb[157].mxu0  ;;  %v2840_v42 = vpop.f32.mrb[157].mxu1 }
 0x230   :  { %v4929_v52 = vld [vmem:[#allocation24_spill] sm:$0xff] }
 0x231   :  { %v1700_v18 = vmax.f32 %v1651_v31, 0.0  ;;  %v1596_v15 = vmax.f32 %v1187_v46, %v1468_v21  ;;  %v4928_v46 = vld [vmem:[#allocation23_spill] sm:$0xff] }
 0x232   :  { %v1064_v16 = vpop.f32.mrb[158].mxu0  ;;  %v1473_v14 = vpop.f32.mrb[158].mxu1  ;;  %v4930_v42 = vmax.f32 %v4928_v46, %v4929_v52 }
 0x233   :  { %1749 = vst [vmem:[%s4773_s3 + $0xe0] sm:$0xff] %v1700_v18  ;;  %v1652_v54 = vadd.f32 %v4428_v11, %v1596_v15  ;;  %v1188_v27 = vmax.f32 %v4915_v34, %v1064_v16  ;;  %v2664_v26 = vpop.f32.mrb[159].mxu0  ;;  %v2843_v35 = vpop.f32.mrb[159].mxu1 }
 0x234   :  { %v4932_v26 = vld [vmem:[#allocation26_spill] sm:$0xff] }
 0x235   :  { %v1701_v57 = vmax.f32 %v1652_v54, 0.0  ;;  %v1597_v58 = vmax.f32 %v1188_v27, %v1473_v14  ;;  %v4931_v27 = vld [vmem:[#allocation25_spill] sm:$0xff] }
 0x236   :  { %v1069_v5 = vpop.f32.mrb[160].mxu0  ;;  %v1478_v36 = vpop.f32.mrb[160].mxu1  ;;  %v4933_v35 = vmax.f32 %v4931_v27, %v4932_v26 }
 0x237   :  { %1750 = vst [vmem:[%s4773_s3 + $0xe8] sm:$0xff] %v1701_v57  ;;  %v1653_v17 = vadd.f32 %v4428_v11, %v1597_v58  ;;  %v1189_v3 = vmax.f32 %v4918_v39, %v1069_v5  ;;  %v2667_v60 = vpop.f32.mrb[161].mxu0  ;;  %v2846_v47 = vpop.f32.mrb[161].mxu1 }
 0x238   :  { %v4935_v60 = vld [vmem:[#allocation28_spill] sm:$0xff] }
 0x239   :  { %v1702_v48 = vmax.f32 %v1653_v17, 0.0  ;;  %v1598_v25 = vmax.f32 %v1189_v3, %v1478_v36  ;;  %v4934_v3 = vld [vmem:[#allocation27_spill] sm:$0xff] }
 0x23a   :  { %v1074_v32 = vpop.f32.mrb[162].mxu0  ;;  %v1483_v49 = vpop.f32.mrb[162].mxu1  ;;  %v4936_v47 = vmax.f32 %v4934_v3, %v4935_v60 }
 0x23b   :  { %1751 = vst [vmem:[%s4773_s3 + $0xf0] sm:$0xff] %v1702_v48  ;;  %v1654_v56 = vadd.f32 %v4428_v11, %v1598_v25  ;;  %v1190_v23 = vmax.f32 %v4921_v22, %v1074_v32  ;;  %v2670_v8 = vpop.f32.mrb[163].mxu0  ;;  %v2849_v59 = vpop.f32.mrb[163].mxu1 }
 0x23c   :  { %v4938_v8 = vld [vmem:[#allocation30_spill] sm:$0xff] }
 0x23d   :  { %v1703_v61 = vmax.f32 %v1654_v56, 0.0  ;;  %v1599_v4 = vmax.f32 %v1190_v23, %v1483_v49  ;;  %v4937_v23 = vld [vmem:[#allocation29_spill] sm:$0xff] }
 0x23e   :  { %v1079_v2 = vpop.f32.mrb[164].mxu0  ;;  %v1488_v43 = vpop.f32.mrb[164].mxu1  ;;  %v4939_v59 = vmax.f32 %v4937_v23, %v4938_v8 }
 0x23f   :  { %1752 = vst [vmem:[%s4773_s3 + $0xf8] sm:$0xff] %v1703_v61  ;;  %v1655_v44 = vadd.f32 %v4428_v11, %v1599_v4  ;;  %v1191_v12 = vmax.f32 %v4924_v10, %v1079_v2  ;;  %v2673_v28 = vpop.f32.mrb[165].mxu0  ;;  %v2852_v62 = vpop.f32.mrb[165].mxu1 }
 0x240   :  { %v4941_v28 = vld [vmem:[#allocation32_spill] sm:$0xff] }
 0x241   :  { %v1704_v45 = vmax.f32 %v1655_v44, 0.0  ;;  %v1600_v7 = vmax.f32 %v1191_v12, %v1488_v43  ;;  %v4940_v12 = vld [vmem:[#allocation31_spill] sm:$0xff] }
 0x242   :  { %v1084_v13 = vpop.f32.mrb[166].mxu0  ;;  %v1493_v41 = vpop.f32.mrb[166].mxu1  ;;  %v4942_v62 = vmax.f32 %v4940_v12, %v4941_v28 }
 0x243   :  { %1753 = vst [vmem:[%s4773_s3 + $0x100] sm:$0xff] %v1704_v45  ;;  %v1656_v40 = vadd.f32 %v4428_v11, %v1600_v7  ;;  %v1192_v19 = vmax.f32 %v4927_v50, %v1084_v13  ;;  %v2676_v38 = vpop.f32.mrb[167].mxu0  ;;  %v2855_v51 = vpop.f32.mrb[167].mxu1 }
 0x244   :  { %v4944_v38 = vld [vmem:[#allocation34_spill] sm:$0xff] }
 0x245   :  { %v1705_v21 = vmax.f32 %v1656_v40, 0.0  ;;  %v1601_v31 = vmax.f32 %v1192_v19, %v1493_v41  ;;  %v4943_v19 = vld [vmem:[#allocation33_spill] sm:$0xff] }
 0x246   :  { %v1089_v33 = vpop.f32.mrb[168].mxu0  ;;  %v1498_v24 = vpop.f32.mrb[168].mxu1  ;;  %v4945_v51 = vmax.f32 %v4943_v19, %v4944_v38 }
 0x247   :  { %1754 = vst [vmem:[%s4773_s3 + $0x108] sm:$0xff] %v1705_v21  ;;  %v1657_v30 = vadd.f32 %v4428_v11, %v1601_v31  ;;  %v1193_v18 = vmax.f32 %v4930_v42, %v1089_v33  ;;  %v2679_v15 = vpop.f32.mrb[169].mxu0  ;;  %v2858_v16 = vpop.f32.mrb[169].mxu1 }
 0x248   :  { %v4947_v15 = vld [vmem:[#allocation36_spill] sm:$0xff] }
 0x249   :  { %v1706_v14 = vmax.f32 %v1657_v30, 0.0  ;;  %v1602_v54 = vmax.f32 %v1193_v18, %v1498_v24  ;;  %v4946_v18 = vld [vmem:[#allocation35_spill] sm:$0xff] }
 0x24a   :  { %v1094_v55 = vpop.f32.mrb[170].mxu0  ;;  %v1503_v63 = vpop.f32.mrb[170].mxu1  ;;  %v4948_v16 = vmax.f32 %v4946_v18, %v4947_v15 }
 0x24b   :  { %1755 = vst [vmem:[%s4773_s3 + $0x110] sm:$0xff] %v1706_v14  ;;  %v1658_v34 = vadd.f32 %v4428_v11, %v1602_v54  ;;  %v1194_v57 = vmax.f32 %v4933_v35, %v1094_v55  ;;  %v2682_v58 = vpop.f32.mrb[171].mxu0  ;;  %v2861_v5 = vpop.f32.mrb[171].mxu1 }
 0x24c   :  { %v4950_v58 = vld [vmem:[#allocation38_spill] sm:$0xff] }
 0x24d   :  { %v1707_v36 = vmax.f32 %v1658_v34, 0.0  ;;  %v1603_v17 = vmax.f32 %v1194_v57, %v1503_v63  ;;  %v4949_v57 = vld [vmem:[#allocation37_spill] sm:$0xff] }
 0x24e   :  { %v1099_v20 = vpop.f32.mrb[172].mxu0  ;;  %v1508_v37 = vpop.f32.mrb[172].mxu1  ;;  %v4951_v5 = vmax.f32 %v4949_v57, %v4950_v58 }
 0x24f   :  { %1756 = vst [vmem:[%s4773_s3 + $0x118] sm:$0xff] %v1707_v36  ;;  %v1659_v39 = vadd.f32 %v4428_v11, %v1603_v17  ;;  %v1195_v48 = vmax.f32 %v4936_v47, %v1099_v20  ;;  %v2685_v25 = vpop.f32.mrb[173].mxu0  ;;  %v2864_v32 = vpop.f32.mrb[173].mxu1 }
 0x250   :  { %v4953_v25 = vld [vmem:[#allocation40_spill] sm:$0xff] }
 0x251   :  { %v1708_v49 = vmax.f32 %v1659_v39, 0.0  ;;  %v1604_v56 = vmax.f32 %v1195_v48, %v1508_v37  ;;  %v4952_v48 = vld [vmem:[#allocation39_spill] sm:$0xff] }
 0x252   :  { %v1104_v0 = vpop.f32.mrb[174].mxu0  ;;  %v1513_v1 = vpop.f32.mrb[174].mxu1  ;;  %v4954_v32 = vmax.f32 %v4952_v48, %v4953_v25 }
 0x253   :  { %1757 = vst [vmem:[%s4773_s3 + $0x120] sm:$0xff] %v1708_v49  ;;  %v1660_v22 = vadd.f32 %v4428_v11, %v1604_v56  ;;  %v1196_v61 = vmax.f32 %v4939_v59, %v1104_v0  ;;  %v2688_v4 = vpop.f32.mrb[175].mxu0  ;;  %v2867_v2 = vpop.f32.mrb[175].mxu1 }
 0x254   :  { %v4956_v4 = vld [vmem:[#allocation42_spill] sm:$0xff] }
 0x255   :  { %v1709_v43 = vmax.f32 %v1660_v22, 0.0  ;;  %v1605_v44 = vmax.f32 %v1196_v61, %v1513_v1  ;;  %v4955_v61 = vld [vmem:[#allocation41_spill] sm:$0xff] }
 0x256   :  { %v1109_v9 = vpop.f32.mrb[176].mxu0  ;;  %v1518_v53 = vpop.f32.mrb[176].mxu1  ;;  %v4957_v2 = vmax.f32 %v4955_v61, %v4956_v4 }
 0x257   :  { %1758 = vst [vmem:[%s4773_s3 + $0x128] sm:$0xff] %v1709_v43  ;;  %v1661_v10 = vadd.f32 %v4428_v11, %v1605_v44  ;;  %v1197_v45 = vmax.f32 %v4942_v62, %v1109_v9  ;;  %v2691_v7 = vpop.f32.mrb[177].mxu0  ;;  %v2870_v13 = vpop.f32.mrb[177].mxu1 }
 0x258   :  { %v4959_v7 = vld [vmem:[#allocation44_spill] sm:$0xff] }
 0x259   :  { %v1710_v41 = vmax.f32 %v1661_v10, 0.0  ;;  %v1606_v40 = vmax.f32 %v1197_v45, %v1518_v53  ;;  %v4958_v45 = vld [vmem:[#allocation43_spill] sm:$0xff] }
 0x25a   :  { %v1114_v6 = vpop.f32.mrb[178].mxu0  ;;  %v1523_v29 = vpop.f32.mrb[178].mxu1  ;;  %v4960_v13 = vmax.f32 %v4958_v45, %v4959_v7 }
 0x25b   :  { %1759 = vst [vmem:[%s4773_s3 + $0x130] sm:$0xff] %v1710_v41  ;;  %v1662_v50 = vadd.f32 %v4428_v11, %v1606_v40  ;;  %v1198_v21 = vmax.f32 %v4945_v51, %v1114_v6  ;;  %v2694_v31 = vpop.f32.mrb[179].mxu0  ;;  %v2873_v33 = vpop.f32.mrb[179].mxu1 }
 0x25c   :  { %v4962_v31 = vld [vmem:[#allocation46_spill] sm:$0xff] }
 0x25d   :  { %v1711_v24 = vmax.f32 %v1662_v50, 0.0  ;;  %v1607_v30 = vmax.f32 %v1198_v21, %v1523_v29  ;;  %v4961_v21 = vld [vmem:[#allocation45_spill] sm:$0xff] }
 0x25e   :  { %v1119_v46 = vpop.f32.mrb[180].mxu0  ;;  %v1528_v52 = vpop.f32.mrb[180].mxu1  ;;  %v4963_v33 = vmax.f32 %v4961_v21, %v4962_v31 }
 0x25f   :  { %1760 = vst [vmem:[%s4773_s3 + $0x138] sm:$0xff] %v1711_v24  ;;  %v1663_v42 = vadd.f32 %v4428_v11, %v1607_v30  ;;  %v1199_v14 = vmax.f32 %v4948_v16, %v1119_v46  ;;  %v2697_v54 = vpop.f32.mrb[181].mxu0  ;;  %v2876_v55 = vpop.f32.mrb[181].mxu1 }
 0x260   :  { %v4965_v54 = vld [vmem:[#allocation48_spill] sm:$0xff] }
 0x261   :  { %v1712_v63 = vmax.f32 %v1663_v42, 0.0  ;;  %v1608_v34 = vmax.f32 %v1199_v14, %v1528_v52  ;;  %v4964_v14 = vld [vmem:[#allocation47_spill] sm:$0xff] }
 0x262   :  { %v1124_v27 = vpop.f32.mrb[182].mxu0  ;;  %v1533_v26 = vpop.f32.mrb[182].mxu1  ;;  %v4966_v55 = vmax.f32 %v4964_v14, %v4965_v54 }
 0x263   :  { %1761 = vst [vmem:[%s4773_s3 + $0x140] sm:$0xff] %v1712_v63  ;;  %v1664_v35 = vadd.f32 %v4428_v11, %v1608_v34  ;;  %v1200_v36 = vmax.f32 %v4951_v5, %v1124_v27  ;;  %v2700_v17 = vpop.f32.mrb[183].mxu0  ;;  %v2879_v20 = vpop.f32.mrb[183].mxu1 }
 0x264   :  { %v4968_v17 = vld [vmem:[#allocation50_spill] sm:$0xff] }
 0x265   :  { %v1713_v37 = vmax.f32 %v1664_v35, 0.0  ;;  %v1609_v39 = vmax.f32 %v1200_v36, %v1533_v26  ;;  %v4967_v36 = vld [vmem:[#allocation49_spill] sm:$0xff] }
 0x266   :  { %v1129_v3 = vpop.f32.mrb[184].mxu0  ;;  %v1538_v60 = vpop.f32.mrb[184].mxu1  ;;  %v4969_v20 = vmax.f32 %v4967_v36, %v4968_v17 }
 0x267   :  { %1762 = vst [vmem:[%s4773_s3 + $0x148] sm:$0xff] %v1713_v37  ;;  %v1665_v47 = vadd.f32 %v4428_v11, %v1609_v39  ;;  %v1201_v49 = vmax.f32 %v4954_v32, %v1129_v3  ;;  %v2703_v56 = vpop.f32.mrb[185].mxu0  ;;  %v2882_v0 = vpop.f32.mrb[185].mxu1 }
 0x269   :  { %v1714_v1 = vmax.f32 %v1665_v47, 0.0  ;;  %v1610_v22 = vmax.f32 %v1201_v49, %v1538_v60 }
 0x26a   :  { %v1134_v23 = vpop.f32.mrb[186].mxu0  ;;  %v1543_v8 = vpop.f32.mrb[186].mxu1 }
 0x26b   :  { %1763 = vst [vmem:[%s4773_s3 + $0x150] sm:$0xff] %v1714_v1  ;;  %v1666_v59 = vadd.f32 %v4428_v11, %v1610_v22  ;;  %v1202_v43 = vmax.f32 %v4957_v2, %v1134_v23  ;;  %v2706_v44 = vpop.f32.mrb[187].mxu0  ;;  %v2885_v9 = vpop.f32.mrb[187].mxu1 }
 0x26d   :  { %v1715_v53 = vmax.f32 %v1666_v59, 0.0  ;;  %v1611_v10 = vmax.f32 %v1202_v43, %v1543_v8 }
 0x26e   :  { %v1139_v12 = vpop.f32.mrb[188].mxu0  ;;  %v1548_v28 = vpop.f32.mrb[188].mxu1 }
 0x26f   :  { %1764 = vst [vmem:[%s4773_s3 + $0x158] sm:$0xff] %v1715_v53  ;;  %v1667_v62 = vadd.f32 %v4428_v11, %v1611_v10  ;;  %v1203_v41 = vmax.f32 %v4960_v13, %v1139_v12  ;;  %v2709_v40 = vpop.f32.mrb[189].mxu0  ;;  %v2888_v6 = vpop.f32.mrb[189].mxu1 }
 0x271   :  { %v1716_v29 = vmax.f32 %v1667_v62, 0.0  ;;  %v1612_v50 = vmax.f32 %v1203_v41, %v1548_v28 }
 0x272   :  { %v1144_v19 = vpop.f32.mrb[190].mxu0  ;;  %v1553_v38 = vpop.f32.mrb[190].mxu1 }
 0x273   :  { %1765 = vst [vmem:[%s4773_s3 + $0x160] sm:$0xff] %v1716_v29  ;;  %v1668_v51 = vadd.f32 %v4428_v11, %v1612_v50  ;;  %v1204_v24 = vmax.f32 %v4963_v33, %v1144_v19  ;;  %v2712_v30 = vpop.f32.mrb[191].mxu0  ;;  %v2891_v46 = vpop.f32.mrb[191].mxu1 }
 0x275   :  { %v1717_v52 = vmax.f32 %v1668_v51, 0.0  ;;  %v1613_v42 = vmax.f32 %v1204_v24, %v1553_v38 }
 0x276   :  { %v1149_v18 = vpop.f32.mrb[192].mxu0  ;;  %v1558_v15 = vpop.f32.mrb[192].mxu1 }
 0x277   :  { %1766 = vst [vmem:[%s4773_s3 + $0x168] sm:$0xff] %v1717_v52  ;;  %v1669_v16 = vadd.f32 %v4428_v11, %v1613_v42  ;;  %v1205_v63 = vmax.f32 %v4966_v55, %v1149_v18  ;;  %v2715_v34 = vpop.f32.mrb[193].mxu0  ;;  %v2894_v27 = vpop.f32.mrb[193].mxu1 }
 0x279   :  { %v1718_v26 = vmax.f32 %v1669_v16, 0.0  ;;  %v1614_v35 = vmax.f32 %v1205_v63, %v1558_v15 }
 0x27a   :  { %v1154_v57 = vpop.f32.mrb[194].mxu0  ;;  %v1563_v58 = vpop.f32.mrb[194].mxu1 }
 0x27b   :  { %1767 = vst [vmem:[%s4773_s3 + $0x170] sm:$0xff] %v1718_v26  ;;  %v1670_v5 = vadd.f32 %v4428_v11, %v1614_v35  ;;  %v1206_v37 = vmax.f32 %v4969_v20, %v1154_v57  ;;  %v2718_v39 = vpop.f32.mrb[195].mxu0  ;;  %v2897_v3 = vpop.f32.mrb[195].mxu1 }
 0x27d   :  { %v1719_v60 = vmax.f32 %v1670_v5, 0.0  ;;  %v1615_v47 = vmax.f32 %v1206_v37, %v1563_v58 }
 0x27f   :  { %1768 = vst [vmem:[%s4773_s3 + $0x178] sm:$0xff] %v1719_v60  ;;  %v1671_v48 = vadd.f32 %v4428_v11, %v1615_v47 }
 0x281   :  { %v1720_v25 = vmax.f32 %v1671_v48, 0.0 }
 0x283   :  { %1769 = vst [vmem:[%s4773_s3 + $0x180] sm:$0xff] %v1720_v25 }

// kernel: lenet_forward.4
= control target key start
LH: loop header
LB: loop body
LE: loop exit
PB: predicated region body
PF: predicated region fallthrough
CT: control target
= control target key end

     0   :  { %s1387_s1 = inlined_call_operand.vmem [shape: f32[256,128], index: 1, kind: input, shape index: {}]   ;;  %s1388_s0 = inlined_call_operand.vmem [shape: f32[4,50,256], index: 0, kind: input, shape index: {}]   ;;  %s1389_s2 = inlined_call_operand.vmem [shape: f32[1,128], index: 2, kind: input, shape index: {}]   ;;  %s1390_s3 = inlined_call_operand.vmem [shape: f32[50,128], index: 3, kind: output, shape index: {}]  }
   0x1   :  { %v30_v0 = vld [vmem:[%s1387_s1 + $0x80] sm:$0xff]  ;;  %v31_v1 = vld [vmem:[%s1387_s1 + $0x88] sm:$0xff]  ;;  %v32_v5 = vld [vmem:[%s1387_s1 + $0x90] sm:$0xff] }
   0x2   :  { %v14_v2 = vld [vmem:[%s1387_s1] sm:$0xff]  ;;  %v970_v3 = vpack.c.bf16 %v31_v1, %v30_v0  ;;  %v15_v4 = vld [vmem:[%s1387_s1 + $0x8] sm:$0xff]  ;;  %v33_v6 = vld [vmem:[%s1387_s1 + $0x98] sm:$0xff] }
   0x3   :  { %v981_v7 = vpack.c.bf16 %v15_v4, %v14_v2  ;;  %v983_v8 = vpack.c.bf16 %v33_v6, %v32_v5  ;;  %v16_v9 = vld [vmem:[%s1387_s1 + $0x10] sm:$0xff]  ;;  %v17_v10 = vld [vmem:[%s1387_s1 + $0x18] sm:$0xff]  ;;  %v34_v11 = vld [vmem:[%s1387_s1 + $0xa0] sm:$0xff] }
   0x4   :  { %814 = vmatprep.subr.bf16.mxu0 %v970_v3  ;;  %846 = vmatprep.subr.bf16.mxu1 %v970_v3  ;;  %v35_v12 = vld [vmem:[%s1387_s1 + $0xa8] sm:$0xff]  ;;  %v1001_v13 = vpack.c.bf16 %v17_v10, %v16_v9  ;;  %v18_v15 = vld [vmem:[%s1387_s1 + $0x20] sm:$0xff]  ;;  %v36_v17 = vld [vmem:[%s1387_s1 + $0xb0] sm:$0xff] }
   0x5   :  { %816 = vmatpush3.bf16.msra.mxu0 %v981_v7  ;;  %848 = vmatpush3.bf16.msra.mxu1 %v981_v7  ;;  %v1005_v14 = vpack.c.bf16 %v35_v12, %v34_v11  ;;  %v19_v16 = vld [vmem:[%s1387_s1 + $0x28] sm:$0xff]  ;;  %v37_v18 = vld [vmem:[%s1387_s1 + $0xb8] sm:$0xff]  ;;  %v20_v21 = vld [vmem:[%s1387_s1 + $0x30] sm:$0xff] }
   0x6   :  { %818 = vmatprep.subr.bf16.mxu0 %v983_v8  ;;  %850 = vmatprep.subr.bf16.mxu1 %v983_v8  ;;  %v1021_v19 = vpack.c.bf16 %v19_v16, %v18_v15  ;;  %v1025_v20 = vpack.c.bf16 %v37_v18, %v36_v17  ;;  %v21_v22 = vld [vmem:[%s1387_s1 + $0x38] sm:$0xff]  ;;  %v38_v23 = vld [vmem:[%s1387_s1 + $0xc0] sm:$0xff]  ;;  %v39_v24 = vld [vmem:[%s1387_s1 + $0xc8] sm:$0xff] }
   0x7   :  { %v47_v25 = vld [vmem:[%s1388_s0 + $0x8] sm:$0xff]  ;;  %v559_v26 = vld [vmem:[%s1388_s0 + $0x78] sm:$0xff]  ;;  %v1047_v27 = vpack.c.bf16 %v21_v22, %v20_v21  ;;  %v1051_v28 = vpack.c.bf16 %v39_v24, %v38_v23  ;;  %v22_v29 = vld [vmem:[%s1387_s1 + $0x40] sm:$0xff] }
   0x8   :  { %124 = vmatprep.mubr.f32.mxu0 %v47_v25  ;;  %v23_v30 = vld [vmem:[%s1387_s1 + $0x48] sm:$0xff]  ;;  %v40_v31 = vld [vmem:[%s1387_s1 + $0xd0] sm:$0xff]  ;;  %v41_v32 = vld [vmem:[%s1387_s1 + $0xd8] sm:$0xff]  ;;  %239 = vmatprep.mubr.f32.mxu1 %v559_v26 }
   0x9   :  { %820 = vmatpush3.bf16.msra.mxu0 %v1001_v13  ;;  %852 = vmatpush3.bf16.msra.mxu1 %v1001_v13  ;;  %v1067_v33 = vpack.c.bf16 %v23_v30, %v22_v29  ;;  %v1071_v34 = vpack.c.bf16 %v41_v32, %v40_v31  ;;  %v24_v35 = vld [vmem:[%s1387_s1 + $0x50] sm:$0xff]  ;;  %v25_v36 = vld [vmem:[%s1387_s1 + $0x58] sm:$0xff]  ;;  %v42_v37 = vld [vmem:[%s1387_s1 + $0xe0] sm:$0xff] }
   0xa   :  { %822 = vmatprep.subr.bf16.mxu0 %v1005_v14  ;;  %854 = vmatprep.subr.bf16.mxu1 %v1005_v14  ;;  %v43_v38 = vld [vmem:[%s1387_s1 + $0xe8] sm:$0xff]  ;;  %v1087_v39 = vpack.c.bf16 %v25_v36, %v24_v35  ;;  %v26_v41 = vld [vmem:[%s1387_s1 + $0x60] sm:$0xff]  ;;  %v44_v43 = vld [vmem:[%s1387_s1 + $0xf0] sm:$0xff] }
   0xb   :  { %v1091_v40 = vpack.c.bf16 %v43_v38, %v42_v37  ;;  %v27_v42 = vld [vmem:[%s1387_s1 + $0x68] sm:$0xff]  ;;  %v45_v44 = vld [vmem:[%s1387_s1 + $0xf8] sm:$0xff]  ;;  %v28_v47 = vld [vmem:[%s1387_s1 + $0x70] sm:$0xff] }
   0xc   :  { %v1107_v45 = vpack.c.bf16 %v27_v42, %v26_v41  ;;  %v1111_v46 = vpack.c.bf16 %v45_v44, %v44_v43  ;;  %v29_v48 = vld [vmem:[%s1387_s1 + $0x78] sm:$0xff]  ;;  %v46_v50 = vld [vmem:[%s1388_s0] sm:$0xff]  ;;  %v558_v51 = vld [vmem:[%s1388_s0 + $0x70] sm:$0xff] }
   0xd   :  { %824 = vmatpush3.bf16.msra.mxu0 %v1021_v19  ;;  %856 = vmatpush3.bf16.msra.mxu1 %v1021_v19  ;;  %v1121_v49 = vpack.c.bf16 %v29_v48, %v28_v47  ;;  %v49_v52 = vld [vmem:[%s1388_s0 + $0x18] sm:$0xff]  ;;  %v561_v53 = vld [vmem:[%s1388_s0 + $0x88] sm:$0xff]  ;;  %v48_v54 = vld [vmem:[%s1388_s0 + $0x10] sm:$0xff] }
   0xe   :  { %826 = vmatprep.subr.bf16.mxu0 %v1025_v20  ;;  %858 = vmatprep.subr.bf16.mxu1 %v1025_v20  ;;  %v560_v55 = vld [vmem:[%s1388_s0 + $0x80] sm:$0xff]  ;;  %v51_v56 = vld [vmem:[%s1388_s0 + $0x28] sm:$0xff]  ;;  %v563_v57 = vld [vmem:[%s1388_s0 + $0x98] sm:$0xff] }
   0xf   :  { %v50_v58 = vld [vmem:[%s1388_s0 + $0x20] sm:$0xff]  ;;  %v562_v59 = vld [vmem:[%s1388_s0 + $0x90] sm:$0xff]  ;;  %v53_v60 = vld [vmem:[%s1388_s0 + $0x38] sm:$0xff] }
  0x10   :  { %v565_v61 = vld [vmem:[%s1388_s0 + $0xa8] sm:$0xff]  ;;  %v52_v62 = vld [vmem:[%s1388_s0 + $0x30] sm:$0xff]  ;;  %v564_v63 = vld [vmem:[%s1388_s0 + $0xa0] sm:$0xff] }
  0x11   :  { %828 = vmatpush3.bf16.msra.mxu0 %v1047_v27  ;;  %860 = vmatpush3.bf16.msra.mxu1 %v1047_v27  ;;  %v55_v0 = vld [vmem:[%s1388_s0 + $0x48] sm:$0xff]  ;;  %v567_v1 = vld [vmem:[%s1388_s0 + $0xb8] sm:$0xff]  ;;  %v54_v2 = vld [vmem:[%s1388_s0 + $0x40] sm:$0xff] }
  0x12   :  { %830 = vmatprep.subr.bf16.mxu0 %v1051_v28  ;;  %862 = vmatprep.subr.bf16.mxu1 %v1051_v28  ;;  %v57_v4 = vld [vmem:[%s1388_s0 + $0x58] sm:$0xff]  ;;  %v569_v5 = vld [vmem:[%s1388_s0 + $0xc8] sm:$0xff]  ;;  %v56_v6 = vld [vmem:[%s1388_s0 + $0x50] sm:$0xff] }
  0x13   :  { %v571_v9 = vld [vmem:[%s1388_s0 + $0xd8] sm:$0x3]  ;;  %v58_v10 = vld [vmem:[%s1388_s0 + $0x60] sm:$0x3]  ;;  %v570_v11 = vld [vmem:[%s1388_s0 + $0xd0] sm:$0x3] }
  0x14   :  { %v573_v12 = vld [vmem:[%s1388_s0 + $0xe8] sm:$0xff]  ;;  %v586_v15 = vld [vmem:[%s1388_s0 + $0x150] sm:$0xff]  ;;  %v575_v16 = vld [vmem:[%s1388_s0 + $0xf8] sm:$0xff] }
  0x15   :  { %832 = vmatpush3.bf16.msra.mxu0 %v1067_v33  ;;  %864 = vmatpush3.bf16.msra.mxu1 %v1067_v33  ;;  %v589_v17 = vld [vmem:[%s1388_s0 + $0x168] sm:$0xff]  ;;  %v574_v18 = vld [vmem:[%s1388_s0 + $0xf0] sm:$0xff]  ;;  %v591_v21 = vld [vmem:[%s1388_s0 + $0x178] sm:$0xff] }
  0x16   :  { %834 = vmatprep.subr.bf16.mxu0 %v1071_v34  ;;  %866 = vmatprep.subr.bf16.mxu1 %v1071_v34  ;;  %v576_v22 = vld [vmem:[%s1388_s0 + $0x100] sm:$0xff]  ;;  %v590_v23 = vld [vmem:[%s1388_s0 + $0x170] sm:$0xff]  ;;  %v579_v24 = vld [vmem:[%s1388_s0 + $0x118] sm:$0xff] }
  0x17   :  { %v593_v25 = vld [vmem:[%s1388_s0 + $0x188] sm:$0xff]  ;;  %v578_v26 = vld [vmem:[%s1388_s0 + $0x110] sm:$0xff]  ;;  %v595_v29 = vld [vmem:[%s1388_s0 + $0x198] sm:$0xff] }
  0x18   :  { %v580_v30 = vld [vmem:[%s1388_s0 + $0x120] sm:$0xff]  ;;  %v594_v31 = vld [vmem:[%s1388_s0 + $0x190] sm:$0xff]  ;;  %v583_v32 = vld [vmem:[%s1388_s0 + $0x138] sm:$0xff] }
  0x19   :  { %836 = vmatpush3.bf16.msra.mxu0 %v1087_v39  ;;  %868 = vmatpush3.bf16.msra.mxu1 %v1087_v39  ;;  %v596_v35 = vld [vmem:[%s1388_s0 + $0x1a0] sm:$0xff]  ;;  %v585_v36 = vld [vmem:[%s1388_s0 + $0x148] sm:$0x3]  ;;  %v599_v37 = vld [vmem:[%s1388_s0 + $0x1b8] sm:$0x3] }
  0x1a   :  { %838 = vmatprep.subr.bf16.mxu0 %v1091_v40  ;;  %870 = vmatprep.subr.bf16.mxu1 %v1091_v40  ;;  %v584_v38 = vld [vmem:[%s1388_s0 + $0x140] sm:$0x3] }
  0x1d   :  { %840 = vmatpush3.bf16.msra.mxu0 %v1107_v45  ;;  %872 = vmatpush3.bf16.msra.mxu1 %v1107_v45 }
  0x1e   :  { %842 = vmatprep.subr.bf16.mxu0 %v1111_v46  ;;  %874 = vmatprep.subr.bf16.mxu1 %v1111_v46 }
  0x21   :  { %844 = vmatpush3.bf16.msra.mxu0 %v1121_v49  ;;  %876 = vmatpush3.bf16.msra.mxu1 %v1121_v49 }
  0x22   :  { %878 = vmatprep.subr.bf16.mxu0 %v970_v3  ;;  %910 = vmatprep.subr.bf16.mxu1 %v970_v3  ;;  %v566_v3 = vld [vmem:[%s1388_s0 + $0xb0] sm:$0xff] }
  0x24   :  { %125 = vmatmul.mubr.f32.vlgmr.msra.gmra.mrb[0].mxu0 %v46_v50  ;;  %240 = vmatmul.mubr.f32.vlgmr.msra.gmra.mrb[0].mxu1 %v558_v51 }
  0x25   :  { %880 = vmatpush3.bf16.msra.mxu0 %v981_v7  ;;  %912 = vmatpush3.bf16.msra.mxu1 %v981_v7  ;;  %v568_v7 = vld [vmem:[%s1388_s0 + $0xc0] sm:$0xff] }
  0x26   :  { %882 = vmatprep.subr.bf16.mxu0 %v983_v8  ;;  %914 = vmatprep.subr.bf16.mxu1 %v983_v8  ;;  %v59_v8 = vld [vmem:[%s1388_s0 + $0x68] sm:$0x3] }
  0x27   :  { %129 = vmatprep.mubr.f32.mxu0 %v49_v52  ;;  %244 = vmatprep.mubr.f32.mxu1 %v561_v53 }
  0x28   :  { %130 = vmatmul.mubr.f32.gmra.mrb[2].mxu0 %v48_v54  ;;  %245 = vmatmul.mubr.f32.gmra.mrb[2].mxu1 %v560_v55 }
  0x29   :  { %884 = vmatpush3.bf16.msra.mxu0 %v1001_v13  ;;  %916 = vmatpush3.bf16.msra.mxu1 %v1001_v13  ;;  %v587_v13 = vld [vmem:[%s1388_s0 + $0x158] sm:$0xff] }
  0x2a   :  { %886 = vmatprep.subr.bf16.mxu0 %v1005_v14  ;;  %918 = vmatprep.subr.bf16.mxu1 %v1005_v14  ;;  %v572_v14 = vld [vmem:[%s1388_s0 + $0xe0] sm:$0xff] }
  0x2b   :  { %134 = vmatprep.mubr.f32.mxu0 %v51_v56  ;;  %249 = vmatprep.mubr.f32.mxu1 %v563_v57 }
  0x2c   :  { %135 = vmatmul.mubr.f32.gmra.mrb[4].mxu0 %v50_v58  ;;  %250 = vmatmul.mubr.f32.gmra.mrb[4].mxu1 %v562_v59 }
  0x2d   :  { %888 = vmatpush3.bf16.msra.mxu0 %v1021_v19  ;;  %920 = vmatpush3.bf16.msra.mxu1 %v1021_v19  ;;  %v588_v19 = vld [vmem:[%s1388_s0 + $0x160] sm:$0xff] }
  0x2e   :  { %890 = vmatprep.subr.bf16.mxu0 %v1025_v20  ;;  %922 = vmatprep.subr.bf16.mxu1 %v1025_v20  ;;  %v577_v20 = vld [vmem:[%s1388_s0 + $0x108] sm:$0xff] }
  0x2f   :  { %139 = vmatprep.mubr.f32.mxu0 %v53_v60  ;;  %254 = vmatprep.mubr.f32.mxu1 %v565_v61 }
  0x30   :  { %140 = vmatmul.mubr.f32.gmra.mrb[6].mxu0 %v52_v62  ;;  %255 = vmatmul.mubr.f32.gmra.mrb[6].mxu1 %v564_v63 }
  0x31   :  { %892 = vmatpush3.bf16.msra.mxu0 %v1047_v27  ;;  %924 = vmatpush3.bf16.msra.mxu1 %v1047_v27  ;;  %v592_v27 = vld [vmem:[%s1388_s0 + $0x180] sm:$0xff] }
  0x32   :  { %894 = vmatprep.subr.bf16.mxu0 %v1051_v28  ;;  %926 = vmatprep.subr.bf16.mxu1 %v1051_v28  ;;  %v581_v28 = vld [vmem:[%s1388_s0 + $0x128] sm:$0xff] }
  0x33   :  { %144 = vmatprep.mubr.f32.mxu0 %v55_v0  ;;  %259 = vmatprep.mubr.f32.mxu1 %v567_v1 }
  0x34   :  { %145 = vmatmul.mubr.f32.gmra.mrb[8].mxu0 %v54_v2  ;;  %260 = vmatmul.mubr.f32.gmra.mrb[8].mxu1 %v566_v3 }
  0x35   :  { %896 = vmatpush3.bf16.msra.mxu0 %v1067_v33  ;;  %928 = vmatpush3.bf16.msra.mxu1 %v1067_v33  ;;  %v597_v33 = vld [vmem:[%s1388_s0 + $0x1a8] sm:$0xff] }
  0x36   :  { %898 = vmatprep.subr.bf16.mxu0 %v1071_v34  ;;  %930 = vmatprep.subr.bf16.mxu1 %v1071_v34  ;;  %v582_v34 = vld [vmem:[%s1388_s0 + $0x130] sm:$0xff] }
  0x37   :  { %149 = vmatprep.mubr.f32.mxu0 %v57_v4  ;;  %264 = vmatprep.mubr.f32.mxu1 %v569_v5 }
  0x38   :  { %150 = vmatmul.mubr.f32.gmra.mrb[10].mxu0 %v56_v6  ;;  %265 = vmatmul.mubr.f32.gmra.mrb[10].mxu1 %v568_v7 }
  0x39   :  { %900 = vmatpush3.bf16.msra.mxu0 %v1087_v39  ;;  %932 = vmatpush3.bf16.msra.mxu1 %v1087_v39  ;;  %v598_v39 = vld [vmem:[%s1388_s0 + $0x1b0] sm:$0x3] }
  0x3a   :  { %902 = vmatprep.subr.bf16.mxu0 %v1091_v40  ;;  %934 = vmatprep.subr.bf16.mxu1 %v1091_v40 }
  0x3b   :  { %154 = vmatprep.mubr.f32.mxu0 %v59_v8  ;;  %269 = vmatprep.mubr.f32.mxu1 %v571_v9 }
  0x3c   :  { %155 = vmatmul.mubr.f32.gmra.mrb[12].mxu0 %v58_v10  ;;  %270 = vmatmul.mubr.f32.gmra.mrb[12].mxu1 %v570_v11 }
  0x3d   :  { %904 = vmatpush3.bf16.msra.mxu0 %v1107_v45  ;;  %936 = vmatpush3.bf16.msra.mxu1 %v1107_v45 }
  0x3e   :  { %906 = vmatprep.subr.bf16.mxu0 %v1111_v46  ;;  %938 = vmatprep.subr.bf16.mxu1 %v1111_v46 }
  0x3f   :  { %361 = vmatprep.mubr.f32.mxu0 %v573_v12  ;;  %483 = vmatprep.mubr.f32.mxu1 %v587_v13 }
  0x41   :  { %908 = vmatpush3.bf16.msra.mxu0 %v1121_v49  ;;  %940 = vmatpush3.bf16.msra.mxu1 %v1121_v49 }
  0x44   :  { %362 = vmatmul.mubr.f32.vlgmr.msra.gmra.mrb[14].mxu0 %v572_v14  ;;  %484 = vmatmul.mubr.f32.vlgmr.msra.gmra.mrb[14].mxu1 %v586_v15 }
  0x45   :  { %366 = vmatprep.mubr.f32.mxu0 %v575_v16  ;;  %488 = vmatprep.mubr.f32.mxu1 %v589_v17 }
  0x48   :  { %367 = vmatmul.mubr.f32.gmra.mrb[16].mxu0 %v574_v18  ;;  %489 = vmatmul.mubr.f32.gmra.mrb[16].mxu1 %v588_v19 }
  0x49   :  { %371 = vmatprep.mubr.f32.mxu0 %v577_v20  ;;  %493 = vmatprep.mubr.f32.mxu1 %v591_v21 }
  0x4c   :  { %372 = vmatmul.mubr.f32.gmra.mrb[18].mxu0 %v576_v22  ;;  %494 = vmatmul.mubr.f32.gmra.mrb[18].mxu1 %v590_v23 }
  0x4d   :  { %376 = vmatprep.mubr.f32.mxu0 %v579_v24  ;;  %498 = vmatprep.mubr.f32.mxu1 %v593_v25 }
  0x50   :  { %377 = vmatmul.mubr.f32.gmra.mrb[20].mxu0 %v578_v26  ;;  %499 = vmatmul.mubr.f32.gmra.mrb[20].mxu1 %v592_v27 }
  0x51   :  { %381 = vmatprep.mubr.f32.mxu0 %v581_v28  ;;  %503 = vmatprep.mubr.f32.mxu1 %v595_v29 }
  0x54   :  { %382 = vmatmul.mubr.f32.gmra.mrb[22].mxu0 %v580_v30  ;;  %504 = vmatmul.mubr.f32.gmra.mrb[22].mxu1 %v594_v31 }
  0x55   :  { %386 = vmatprep.mubr.f32.mxu0 %v583_v32  ;;  %508 = vmatprep.mubr.f32.mxu1 %v597_v33 }
  0x58   :  { %387 = vmatmul.mubr.f32.gmra.mrb[24].mxu0 %v582_v34  ;;  %509 = vmatmul.mubr.f32.gmra.mrb[24].mxu1 %v596_v35  ;;  %v1348_v34 = vld [vmem:[%s1389_s2] ss:$0 sm:$0xff] }
  0x59   :  { %391 = vmatprep.mubr.f32.mxu0 %v585_v36  ;;  %513 = vmatprep.mubr.f32.mxu1 %v599_v37 }
  0x5c   :  { %392 = vmatmul.mubr.f32.gmra.mrb[26].mxu0 %v584_v38  ;;  %514 = vmatmul.mubr.f32.gmra.mrb[26].mxu1 %v598_v39 }
  0xf7   :  { %v633_v40 = vpop.f32.mrb[0].mxu0  ;;  %v686_v41 = vpop.f32.mrb[0].mxu1 }
  0xf8   :  { %v634_v42 = vpop.f32.mrb[1].mxu0  ;;  %v687_v43 = vpop.f32.mrb[1].mxu1 }
  0xf9   :  { %v635_v44 = vadd.f32 %v634_v42, %v633_v40  ;;  %v688_v45 = vadd.f32 %v687_v43, %v686_v41 }
  0xfb   :  { %v275_v46 = vmax.f32 %v635_v44, %v688_v45  ;;  %v636_v47 = vpop.f32.mrb[2].mxu0  ;;  %v689_v48 = vpop.f32.mrb[2].mxu1 }
  0xfc   :  { %v637_v49 = vpop.f32.mrb[3].mxu0  ;;  %v690_v50 = vpop.f32.mrb[3].mxu1 }
  0xfd   :  { %v638_v51 = vadd.f32 %v637_v49, %v636_v47  ;;  %v691_v52 = vadd.f32 %v690_v50, %v689_v48 }
  0xff   :  { %v276_v53 = vmax.f32 %v638_v51, %v691_v52  ;;  %v639_v54 = vpop.f32.mrb[4].mxu0  ;;  %v692_v55 = vpop.f32.mrb[4].mxu1 }
 0x100   :  { %v640_v56 = vpop.f32.mrb[5].mxu0  ;;  %v693_v57 = vpop.f32.mrb[5].mxu1 }
 0x101   :  { %v641_v58 = vadd.f32 %v640_v56, %v639_v54  ;;  %v694_v59 = vadd.f32 %v693_v57, %v692_v55 }
 0x103   :  { %v277_v60 = vmax.f32 %v641_v58, %v694_v59  ;;  %v642_v61 = vpop.f32.mrb[6].mxu0  ;;  %v695_v62 = vpop.f32.mrb[6].mxu1 }
 0x104   :  { %v643_v63 = vpop.f32.mrb[7].mxu0  ;;  %v696_v0 = vpop.f32.mrb[7].mxu1 }
 0x105   :  { %v1321_v1 = vadd.f32 %v643_v63, %v642_v61  ;;  %v1323_v2 = vadd.f32 %v696_v0, %v695_v62 }
 0x107   :  { %v278_v3 = vmax.f32 %v1321_v1, %v1323_v2  ;;  %v645_v4 = vpop.f32.mrb[8].mxu0  ;;  %v698_v5 = vpop.f32.mrb[8].mxu1 }
 0x108   :  { %v646_v6 = vpop.f32.mrb[9].mxu0  ;;  %v699_v7 = vpop.f32.mrb[9].mxu1 }
 0x109   :  { %v1327_v8 = vadd.f32 %v646_v6, %v645_v4  ;;  %v1329_v9 = vadd.f32 %v699_v7, %v698_v5 }
 0x10b   :  { %v279_v10 = vmax.f32 %v1327_v8, %v1329_v9  ;;  %v648_v11 = vpop.f32.mrb[10].mxu0  ;;  %v701_v12 = vpop.f32.mrb[10].mxu1 }
 0x10c   :  { %v649_v13 = vpop.f32.mrb[11].mxu0  ;;  %v702_v14 = vpop.f32.mrb[11].mxu1 }
 0x10d   :  { %v1333_v15 = vadd.f32 %v649_v13, %v648_v11  ;;  %v1335_v16 = vadd.f32 %v702_v14, %v701_v12 }
 0x10f   :  { %v280_v17 = vmax.f32 %v1333_v15, %v1335_v16  ;;  %v651_v18 = vpop.f32.mrb[12].mxu0  ;;  %v704_v19 = vpop.f32.mrb[12].mxu1 }
 0x110   :  { %v652_v20 = vpop.f32.mrb[13].mxu0  ;;  %v705_v21 = vpop.f32.mrb[13].mxu1 }
 0x111   :  { %v1339_v22 = vadd.f32 %v652_v20, %v651_v18  ;;  %v1341_v23 = vadd.f32 %v705_v21, %v704_v19 }
 0x113   :  { %v281_v24 = vmax.f32 %v1339_v22, %v1341_v23 }
 0x117   :  { %v739_v25 = vpop.f32.mrb[14].mxu0  ;;  %v792_v26 = vpop.f32.mrb[14].mxu1 }
 0x118   :  { %v740_v27 = vpop.f32.mrb[15].mxu0  ;;  %v793_v28 = vpop.f32.mrb[15].mxu1 }
 0x119   :  { %v741_v29 = vadd.f32 %v740_v27, %v739_v25  ;;  %v794_v30 = vadd.f32 %v793_v28, %v792_v26 }
 0x11b   :  { %v397_v31 = vmax.f32 %v275_v46, %v741_v29  ;;  %v742_v32 = vpop.f32.mrb[16].mxu0  ;;  %v795_v33 = vpop.f32.mrb[16].mxu1 }
 0x11c   :  { %v743_v35 = vpop.f32.mrb[17].mxu0  ;;  %v796_v36 = vpop.f32.mrb[17].mxu1 }
 0x11d   :  { %v519_v37 = vmax.f32 %v397_v31, %v794_v30  ;;  %v744_v38 = vadd.f32 %v743_v35, %v742_v32  ;;  %v797_v39 = vadd.f32 %v796_v36, %v795_v33 }
 0x11f   :  { %v533_v40 = vadd.f32 %v1348_v34, %v519_v37  ;;  %v398_v41 = vmax.f32 %v276_v53, %v744_v38  ;;  %v745_v42 = vpop.f32.mrb[18].mxu0  ;;  %v798_v43 = vpop.f32.mrb[18].mxu1 }
 0x120   :  { %v746_v44 = vpop.f32.mrb[19].mxu0  ;;  %v799_v45 = vpop.f32.mrb[19].mxu1 }
 0x121   :  { %v540_v46 = vmax.f32 %v533_v40, 0.0  ;;  %v520_v47 = vmax.f32 %v398_v41, %v797_v39  ;;  %v747_v48 = vadd.f32 %v746_v44, %v745_v42  ;;  %v800_v49 = vadd.f32 %v799_v45, %v798_v43 }
 0x123   :  { %547 = vst [vmem:[%s1390_s3] sm:$0xff] %v540_v46  ;;  %v534_v50 = vadd.f32 %v1348_v34, %v520_v47  ;;  %v399_v51 = vmax.f32 %v277_v60, %v747_v48  ;;  %v748_v52 = vpop.f32.mrb[20].mxu0  ;;  %v801_v54 = vpop.f32.mrb[20].mxu1 }
 0x124   :  { %v749_v55 = vpop.f32.mrb[21].mxu0  ;;  %v802_v56 = vpop.f32.mrb[21].mxu1 }
 0x125   :  { %v541_v53 = vmax.f32 %v534_v50, 0.0  ;;  %v521_v57 = vmax.f32 %v399_v51, %v800_v49  ;;  %v750_v58 = vadd.f32 %v749_v55, %v748_v52  ;;  %v803_v59 = vadd.f32 %v802_v56, %v801_v54 }
 0x127   :  { %548 = vst [vmem:[%s1390_s3 + $0x8] sm:$0xff] %v541_v53  ;;  %v535_v61 = vadd.f32 %v1348_v34, %v521_v57  ;;  %v400_v62 = vmax.f32 %v278_v3, %v750_v58  ;;  %v751_v63 = vpop.f32.mrb[22].mxu0  ;;  %v804_v0 = vpop.f32.mrb[22].mxu1 }
 0x128   :  { %v752_v1 = vpop.f32.mrb[23].mxu0  ;;  %v805_v2 = vpop.f32.mrb[23].mxu1 }
 0x129   :  { %v542_v60 = vmax.f32 %v535_v61, 0.0  ;;  %v522_v4 = vmax.f32 %v400_v62, %v803_v59  ;;  %v753_v5 = vadd.f32 %v752_v1, %v751_v63  ;;  %v806_v6 = vadd.f32 %v805_v2, %v804_v0 }
 0x12b   :  { %549 = vst [vmem:[%s1390_s3 + $0x10] sm:$0xff] %v542_v60  ;;  %v536_v7 = vadd.f32 %v1348_v34, %v522_v4  ;;  %v401_v11 = vmax.f32 %v279_v10, %v753_v5  ;;  %v754_v12 = vpop.f32.mrb[24].mxu0  ;;  %v807_v3 = vpop.f32.mrb[24].mxu1 }
 0x12c   :  { %v755_v13 = vpop.f32.mrb[25].mxu0  ;;  %v808_v14 = vpop.f32.mrb[25].mxu1 }
 0x12d   :  { %v543_v18 = vmax.f32 %v536_v7, 0.0  ;;  %v523_v19 = vmax.f32 %v401_v11, %v806_v6  ;;  %v756_v20 = vadd.f32 %v755_v13, %v754_v12  ;;  %v809_v21 = vadd.f32 %v808_v14, %v807_v3 }
 0x12f   :  { %550 = vst [vmem:[%s1390_s3 + $0x18] sm:$0xff] %v543_v18  ;;  %v537_v25 = vadd.f32 %v1348_v34, %v523_v19  ;;  %v402_v26 = vmax.f32 %v280_v17, %v756_v20  ;;  %v757_v8 = vpop.f32.mrb[26].mxu0  ;;  %v810_v9 = vpop.f32.mrb[26].mxu1 }
 0x130   :  { %v758_v10 = vpop.f32.mrb[27].mxu0  ;;  %v811_v27 = vpop.f32.mrb[27].mxu1 }
 0x131   :  { %v544_v28 = vmax.f32 %v537_v25, 0.0  ;;  %v524_v29 = vmax.f32 %v402_v26, %v809_v21  ;;  %v759_v30 = vadd.f32 %v758_v10, %v757_v8  ;;  %v812_v31 = vadd.f32 %v811_v27, %v810_v9 }
 0x133   :  { %551 = vst [vmem:[%s1390_s3 + $0x20] sm:$0xff] %v544_v28  ;;  %v538_v32 = vadd.f32 %v1348_v34, %v524_v29  ;;  %v403_v33 = vmax.f32 %v281_v24, %v759_v30 }
 0x135   :  { %v545_v15 = vmax.f32 %v538_v32, 0.0  ;;  %v525_v16 = vmax.f32 %v403_v33, %v812_v31 }
 0x137   :  { %552 = vst [vmem:[%s1390_s3 + $0x28] sm:$0xff] %v545_v15  ;;  %v539_v17 = vadd.f32 %v1348_v34, %v525_v16 }
 0x139   :  { %v546_v35 = vmax.f32 %v539_v17, 0.0 }
 0x13b   :  { %553 = vst [vmem:[%s1390_s3 + $0x30] sm:$0x3] %v546_v35 }

// kernel: lenet_forward.5
= control target key start
LH: loop header
LB: loop body
LE: loop exit
PB: predicated region body
PF: predicated region fallthrough
CT: control target
= control target key end

     0   :  { %v783_v47 = vmov 1983009808   ;;  %v104_v49 = vlaneseq  ;;  %s1156_s0 = inlined_call_operand.vmem [shape: f32[2,512], index: 0, kind: input, shape index: {}]   ;;  %s1157_s1 = inlined_call_operand.vmem [shape: f32[512,128], index: 1, kind: input, shape index: {}]   ;;  %s1158_s2 = inlined_call_operand.vmem [shape: f32[1,128], index: 2, kind: input, shape index: {}]   ;;  %s1159_s3 = inlined_call_operand.vmem [shape: f32[128,128], index: 3, kind: input, shape index: {}]   ;;  %s1160_s4 = inlined_call_operand.vmem [shape: f32[1,128], index: 4, kind: input, shape index: {}]   ;;  %s1161_s5 = inlined_call_operand.vmem [shape: f32[128,128], index: 5, kind: input, shape index: {}]   ;;  %s1162_s6 = inlined_call_operand.vmem [shape: f32[1,128], index: 6, kind: input, shape index: {}]   ;;  %s1163_s7 = inlined_call_operand.hbm [shape: f32[2,128], index: 7, kind: output, shape index: {}]  }
   0x1   :  { %v44_v0 = vld [vmem:[%s1157_s1 + $0x80] sm:$0xff]  ;;  %v45_v1 = vld [vmem:[%s1157_s1 + $0x88] sm:$0xff]  ;;  %v46_v11 = vld [vmem:[%s1157_s1 + $0x90] sm:$0xff]  ;;  %v102_v48 = vunpack.c.l.s4 %v783_v47 }
   0x2   :  { %v28_v2 = vld [vmem:[%s1157_s1] sm:$0xff]  ;;  %v641_v3 = vpack.c.bf16 %v45_v1, %v44_v0  ;;  %v29_v4 = vld [vmem:[%s1157_s1 + $0x8] sm:$0xff]  ;;  %v47_v13 = vld [vmem:[%s1157_s1 + $0x98] sm:$0xff]  ;;  %v105_v0 = vshrl.u32 %v104_v49, 7 }
   0x3   :  { %v76_v5 = vld [vmem:[%s1157_s1 + $0x180] sm:$0xff]  ;;  %v77_v6 = vld [vmem:[%s1157_s1 + $0x188] sm:$0xff]  ;;  %v643_v7 = vpack.c.bf16 %v29_v4, %v28_v2  ;;  %v30_v14 = vld [vmem:[%s1157_s1 + $0x10] sm:$0xff]  ;;  %v645_v16 = vpack.c.bf16 %v47_v13, %v46_v11  ;;  %v103_v63 = vunpack.c.0.s8 %v102_v48 }
   0x4   :  { %v673_v8 = vpack.c.bf16 %v77_v6, %v76_v5  ;;  %v60_v9 = vld [vmem:[%s1157_s1 + $0x100] sm:$0xff]  ;;  %v61_v10 = vld [vmem:[%s1157_s1 + $0x108] sm:$0xff]  ;;  %642 = vmatprep.subr.bf16.mxu0 %v641_v3  ;;  %v31_v15 = vld [vmem:[%s1157_s1 + $0x18] sm:$0xff] }
   0x5   :  { %v675_v12 = vpack.c.bf16 %v61_v10, %v60_v9  ;;  %644 = vmatpush3.bf16.msra.mxu0 %v643_v7  ;;  %v647_v17 = vpack.c.bf16 %v31_v15, %v30_v14  ;;  %v78_v18 = vld [vmem:[%s1157_s1 + $0x190] sm:$0xff]  ;;  %v79_v19 = vld [vmem:[%s1157_s1 + $0x198] sm:$0xff]  ;;  %v48_v23 = vld [vmem:[%s1157_s1 + $0xa0] sm:$0xff]  ;;  %v106_v13 = vsub.s32 %v103_v63, %v105_v0 }
   0x6   :  { %674 = vmatprep.subr.bf16.mxu1 %v673_v8  ;;  %v62_v20 = vld [vmem:[%s1157_s1 + $0x110] sm:$0xff]  ;;  %v677_v21 = vpack.c.bf16 %v79_v19, %v78_v18  ;;  %v63_v22 = vld [vmem:[%s1157_s1 + $0x118] sm:$0xff]  ;;  %v49_v24 = vld [vmem:[%s1157_s1 + $0xa8] sm:$0xff]  ;;  %646 = vmatprep.subr.bf16.mxu0 %v645_v16 }
   0x7   :  { %676 = vmatpush3.bf16.msra.mxu1 %v675_v12  ;;  %v679_v25 = vpack.c.bf16 %v63_v22, %v62_v20  ;;  %v649_v26 = vpack.c.bf16 %v49_v24, %v48_v23  ;;  %v32_v27 = vld [vmem:[%s1157_s1 + $0x20] sm:$0xff]  ;;  %v33_v28 = vld [vmem:[%s1157_s1 + $0x28] sm:$0xff]  ;;  %v50_v35 = vld [vmem:[%s1157_s1 + $0xb0] sm:$0xff] }
   0x8   :  { %v80_v29 = vld [vmem:[%s1157_s1 + $0x1a0] sm:$0xff]  ;;  %678 = vmatprep.subr.bf16.mxu1 %v677_v21  ;;  %v81_v30 = vld [vmem:[%s1157_s1 + $0x1a8] sm:$0xff]  ;;  %v651_v33 = vpack.c.bf16 %v33_v28, %v32_v27  ;;  %v51_v36 = vld [vmem:[%s1157_s1 + $0xb8] sm:$0xff] }
   0x9   :  { %v64_v31 = vld [vmem:[%s1157_s1 + $0x120] sm:$0xff]  ;;  %v65_v32 = vld [vmem:[%s1157_s1 + $0x128] sm:$0xff]  ;;  %648 = vmatpush3.bf16.msra.mxu0 %v647_v17  ;;  %v681_v34 = vpack.c.bf16 %v81_v30, %v80_v29  ;;  %v34_v37 = vld [vmem:[%s1157_s1 + $0x30] sm:$0xff]  ;;  %v653_v39 = vpack.c.bf16 %v51_v36, %v50_v35 }
   0xa   :  { %650 = vmatprep.subr.bf16.mxu0 %v649_v26  ;;  %v683_v38 = vpack.c.bf16 %v65_v32, %v64_v31  ;;  %v35_v40 = vld [vmem:[%s1157_s1 + $0x38] sm:$0xff]  ;;  %v82_v41 = vld [vmem:[%s1157_s1 + $0x1b0] sm:$0xff]  ;;  %v52_v46 = vld [vmem:[%s1157_s1 + $0xc0] sm:$0xff] }
   0xb   :  { %680 = vmatpush3.bf16.msra.mxu1 %v679_v25  ;;  %v83_v42 = vld [vmem:[%s1157_s1 + $0x1b8] sm:$0xff]  ;;  %v66_v44 = vld [vmem:[%s1157_s1 + $0x130] sm:$0xff]  ;;  %v53_v50 = vld [vmem:[%s1157_s1 + $0xc8] sm:$0xff]  ;;  %v655_v51 = vpack.c.bf16 %v35_v40, %v34_v37 }
   0xc   :  { %682 = vmatprep.subr.bf16.mxu1 %v681_v34  ;;  %v685_v43 = vpack.c.bf16 %v83_v42, %v82_v41  ;;  %v67_v45 = vld [vmem:[%s1157_s1 + $0x138] sm:$0xff]  ;;  %v84_v52 = vld [vmem:[%s1157_s1 + $0x1c0] sm:$0xff]  ;;  %v85_v53 = vld [vmem:[%s1157_s1 + $0x1c8] sm:$0xff]  ;;  %v657_v55 = vpack.c.bf16 %v53_v50, %v52_v46 }
   0xd   :  { %652 = vmatpush3.bf16.msra.mxu0 %v651_v33  ;;  %v687_v54 = vpack.c.bf16 %v67_v45, %v66_v44  ;;  %v36_v56 = vld [vmem:[%s1157_s1 + $0x40] sm:$0xff]  ;;  %v37_v57 = vld [vmem:[%s1157_s1 + $0x48] sm:$0xff]  ;;  %v689_v59 = vpack.c.bf16 %v85_v53, %v84_v52  ;;  %v54_v61 = vld [vmem:[%s1157_s1 + $0xd0] sm:$0xff] }
   0xe   :  { %654 = vmatprep.subr.bf16.mxu0 %v653_v39  ;;  %v68_v58 = vld [vmem:[%s1157_s1 + $0x140] sm:$0xff]  ;;  %v69_v60 = vld [vmem:[%s1157_s1 + $0x148] sm:$0xff]  ;;  %v55_v62 = vld [vmem:[%s1157_s1 + $0xd8] sm:$0xff]  ;;  %v659_v3 = vpack.c.bf16 %v37_v57, %v36_v56 }
   0xf   :  { %684 = vmatpush3.bf16.msra.mxu1 %v683_v38  ;;  %v86_v1 = vld [vmem:[%s1157_s1 + $0x1d0] sm:$0xff]  ;;  %v87_v2 = vld [vmem:[%s1157_s1 + $0x1d8] sm:$0xff]  ;;  %v691_v4 = vpack.c.bf16 %v69_v60, %v68_v58  ;;  %v661_v5 = vpack.c.bf16 %v55_v62, %v54_v61  ;;  %v56_v11 = vld [vmem:[%s1157_s1 + $0xe0] sm:$0xff] }
  0x10   :  { %686 = vmatprep.subr.bf16.mxu1 %v685_v43  ;;  %v38_v6 = vld [vmem:[%s1157_s1 + $0x50] sm:$0xff]  ;;  %v39_v7 = vld [vmem:[%s1157_s1 + $0x58] sm:$0xff]  ;;  %v693_v9 = vpack.c.bf16 %v87_v2, %v86_v1  ;;  %v57_v12 = vld [vmem:[%s1157_s1 + $0xe8] sm:$0xff] }
  0x11   :  { %656 = vmatpush3.bf16.msra.mxu0 %v655_v51  ;;  %v70_v8 = vld [vmem:[%s1157_s1 + $0x150] sm:$0xff]  ;;  %v71_v10 = vld [vmem:[%s1157_s1 + $0x158] sm:$0xff]  ;;  %v88_v14 = vld [vmem:[%s1157_s1 + $0x1e0] sm:$0xff]  ;;  %v663_v16 = vpack.c.bf16 %v39_v7, %v38_v6  ;;  %v665_v19 = vpack.c.bf16 %v57_v12, %v56_v11 }
  0x12   :  { %658 = vmatprep.subr.bf16.mxu0 %v657_v55  ;;  %v89_v15 = vld [vmem:[%s1157_s1 + $0x1e8] sm:$0xff]  ;;  %v40_v17 = vld [vmem:[%s1157_s1 + $0x60] sm:$0xff]  ;;  %v695_v18 = vpack.c.bf16 %v71_v10, %v70_v8  ;;  %v58_v25 = vld [vmem:[%s1157_s1 + $0xf0] sm:$0xff] }
  0x13   :  { %688 = vmatpush3.bf16.msra.mxu1 %v687_v54  ;;  %v41_v20 = vld [vmem:[%s1157_s1 + $0x68] sm:$0xff]  ;;  %v72_v21 = vld [vmem:[%s1157_s1 + $0x160] sm:$0xff]  ;;  %v697_v23 = vpack.c.bf16 %v89_v15, %v88_v14  ;;  %v59_v26 = vld [vmem:[%s1157_s1 + $0xf8] sm:$0xff] }
  0x14   :  { %690 = vmatprep.subr.bf16.mxu1 %v689_v59  ;;  %v27_v22 = vld [vmem:[%s1156_s0] sm:$0xff]  ;;  %v73_v24 = vld [vmem:[%s1157_s1 + $0x168] sm:$0xff]  ;;  %v90_v29 = vld [vmem:[%s1157_s1 + $0x1f0] sm:$0xff]  ;;  %v667_v31 = vpack.c.bf16 %v41_v20, %v40_v17  ;;  %v669_v35 = vpack.c.bf16 %v59_v26, %v58_v25 }
  0x15   :  { %660 = vmatpush3.bf16.msra.mxu0 %v659_v3  ;;  %v107_v27 = vrot.slane %v27_v22, %v106_v13  ;;  %v100_v28 = vcombine.high %v27_v22, %v27_v22  ;;  %v91_v30 = vld [vmem:[%s1157_s1 + $0x1f8] sm:$0xff]  ;;  %v699_v34 = vpack.c.bf16 %v73_v24, %v72_v21  ;;  %v42_v36 = vld [vmem:[%s1157_s1 + $0x70] sm:$0xff] }
  0x16   :  { %662 = vmatprep.subr.bf16.mxu0 %v661_v5  ;;  %v43_v37 = vld [vmem:[%s1157_s1 + $0x78] sm:$0xff] }
  0x17   :  { %692 = vmatpush3.bf16.msra.mxu1 %v691_v4  ;;  %v115_v32 = vcombine.high %v107_v27, %v107_v27  ;;  %v114_v33 = vrot.slane %v100_v28, %v106_v13 }
  0x18   :  { %694 = vmatprep.subr.bf16.mxu1 %v693_v9 }
  0x19   :  { %664 = vmatpush3.bf16.msra.mxu0 %v663_v16 }
  0x1a   :  { %666 = vmatprep.subr.bf16.mxu0 %v665_v19 }
  0x1b   :  { %696 = vmatpush3.bf16.msra.mxu1 %v695_v18 }
  0x1c   :  { %12 = vsyncpa [#allocation3], 0  ;;  %698 = vmatprep.subr.bf16.mxu1 %v697_v23  ;;  %v701_v38 = vpack.c.bf16 %v91_v30, %v90_v29  ;;  %v74_v39 = vld [vmem:[%s1157_s1 + $0x170] sm:$0xff]  ;;  %v75_v40 = vld [vmem:[%s1157_s1 + $0x178] sm:$0xff]  ;;  %185 = vmatprep.mubr.f32.mxu0 %v115_v32  ;;  %v116_v41 = vcombine.high %v114_v33, %v114_v33  ;;  %v671_v42 = vpack.c.bf16 %v43_v37, %v42_v36  ;;  %v784_v47 = vmov 0.0|0.0   ;;  %s787_s30 = smov [#allocation2]  }
  0x1d   :  { %668 = vmatpush3.bf16.msra.mxu0 %v667_v31  ;;  %v703_v43 = vpack.c.bf16 %v75_v40, %v74_v39  ;;  %v262_v44 = vld [vmem:[%s1159_s3] sm:$0xff]  ;;  %v263_v45 = vld [vmem:[%s1159_s3 + $0x8] sm:$0xff]  ;;  %v264_v48 = vld [vmem:[%s1159_s3 + $0x10] sm:$0xff]  ;;  %vm785_vm0 = vmmov 0   ;;  %v786_v5 = vmov 0.0   ;;  %s456_s8 = sshll.u32 %s787_s30, 4  ;;  %s457_s8 = int_to_ptr.vmem [resolvable:$true] %s456_s8 }
  0x1e   :  { %255 = vmatprep.mubr.f32.mxu1 %v116_v41  ;;  %670 = vmatprep.subr.bf16.mxu0 %v669_v35  ;;  %v706_v46 = vpack.c.bf16 %v263_v45, %v262_v44  ;;  %v265_v49 = vld [vmem:[%s1159_s3 + $0x18] sm:$0xff]  ;;  %v266_v51 = vld [vmem:[%s1159_s3 + $0x20] sm:$0xff]  ;;  %v267_v52 = vld [vmem:[%s1159_s3 + $0x28] sm:$0xff]  ;;  %p764_p1 = scmp.lt.s32.totalorder %s457_s8, %s457_s8 }
  0x1f   :  { %700 = vmatpush3.bf16.msra.mxu1 %v699_v34  ;;  %v709_v50 = vpack.c.bf16 %v265_v49, %v264_v48  ;;  %v712_v53 = vpack.c.bf16 %v267_v52, %v266_v51  ;;  %v268_v54 = vld [vmem:[%s1159_s3 + $0x30] sm:$0xff]  ;;  %v269_v55 = vld [vmem:[%s1159_s3 + $0x38] sm:$0xff]  ;;  %v270_v57 = vld [vmem:[%s1159_s3 + $0x40] sm:$0xff] }
  0x20   :  { %702 = vmatprep.subr.bf16.mxu1 %v701_v38  ;;  %v715_v56 = vpack.c.bf16 %v269_v55, %v268_v54  ;;  %v271_v58 = vld [vmem:[%s1159_s3 + $0x48] sm:$0xff]  ;;  %v272_v60 = vld [vmem:[%s1159_s3 + $0x50] sm:$0xff]  ;;  %v273_v61 = vld [vmem:[%s1159_s3 + $0x58] sm:$0xff] }
  0x21   :  { %672 = vmatpush3.bf16.msra.mxu0 %v671_v42  ;;  %v718_v59 = vpack.c.bf16 %v271_v58, %v270_v57  ;;  %v721_v62 = vpack.c.bf16 %v273_v61, %v272_v60  ;;  %v274_v63 = vld [vmem:[%s1159_s3 + $0x60] sm:$0xff]  ;;  %v275_v0 = vld [vmem:[%s1159_s3 + $0x68] sm:$0xff]  ;;  %v276_v2 = vld [vmem:[%s1159_s3 + $0x70] sm:$0xff] }
  0x22   :  { %705 = vmatprep.subr.bf16.mxu0 %v784_v47  ;;  %v724_v1 = vpack.c.bf16 %v275_v0, %v274_v63  ;;  %v277_v3 = vld [vmem:[%s1159_s3 + $0x78] sm:$0xff]  ;;  %v356_v6 = vld [vmem:[%s1161_s5] sm:$0xff]  ;;  %v357_v7 = vld [vmem:[%s1161_s5 + $0x8] sm:$0xff] }
  0x23   :  { %704 = vmatpush3.bf16.msra.mxu1 %v703_v43  ;;  %v727_v4 = vpack.c.bf16 %v277_v3, %v276_v2  ;;  %v358_v8 = vld [vmem:[%s1161_s5 + $0x10] sm:$0xff]  ;;  %v730_v9 = vpack.c.bf16 %v357_v7, %v356_v6  ;;  %v359_v10 = vld [vmem:[%s1161_s5 + $0x18] sm:$0xff]  ;;  %v360_v12 = vld [vmem:[%s1161_s5 + $0x20] sm:$0xff] }
  0x24   :  { %729 = vmatprep.subr.bf16.mxu1 %v784_v47  ;;  %186 = vmatmul.mubr.f32.vlgmr.msra.gmra.mrb[0].mxu0 %v107_v27  ;;  %v733_v11 = vpack.c.bf16 %v359_v10, %v358_v8  ;;  %v361_v13 = vld [vmem:[%s1161_s5 + $0x28] sm:$0xff]  ;;  %v362_v15 = vld [vmem:[%s1161_s5 + $0x30] sm:$0xff]  ;;  %v363_v16 = vld [vmem:[%s1161_s5 + $0x38] sm:$0xff] }
  0x25   :  { %707 = vmatpush3.bf16.msra.mxu0 %v706_v46  ;;  %603 = vmatprep.mubr.msk.f32.mxu0 %vm785_vm0, %v786_v5  ;;  %v736_v14 = vpack.c.bf16 %v361_v13, %v360_v12  ;;  %v739_v17 = vpack.c.bf16 %v363_v16, %v362_v15  ;;  %v364_v18 = vld [vmem:[%s1161_s5 + $0x40] sm:$0xff]  ;;  %v365_v19 = vld [vmem:[%s1161_s5 + $0x48] sm:$0xff]  ;;  %v366_v21 = vld [vmem:[%s1161_s5 + $0x50] sm:$0xff] }
  0x26   :  { %256 = vmatmul.mubr.f32.vlgmr.msra.gmra.mrb[0].mxu1 %v114_v33  ;;  %708 = vmatprep.subr.bf16.mxu0 %v784_v47  ;;  %v742_v20 = vpack.c.bf16 %v365_v19, %v364_v18  ;;  %v367_v22 = vld [vmem:[%s1161_s5 + $0x58] sm:$0xff]  ;;  %v368_v24 = vld [vmem:[%s1161_s5 + $0x60] sm:$0xff]  ;;  %v369_v25 = vld [vmem:[%s1161_s5 + $0x68] sm:$0xff] }
  0x27   :  { %638 = vmatprep.mubr.msk.f32.mxu1 %vm785_vm0, %v786_v5  ;;  %731 = vmatpush3.bf16.msra.mxu1 %v730_v9  ;;  %v745_v23 = vpack.c.bf16 %v367_v22, %v366_v21  ;;  %v748_v26 = vpack.c.bf16 %v369_v25, %v368_v24  ;;  %v464_v28 = vld [vmem:[%s1158_s2] ss:$0 sm:$0xff]  ;;  %v370_v37 = vld [vmem:[%s1161_s5 + $0x70] sm:$0xff]  ;;  %v371_v38 = vld [vmem:[%s1161_s5 + $0x78] sm:$0xff]  ;;  %s759_s5 = scalar_lea.vmem %s457_s8, 32 }
  0x28   :  { %732 = vmatprep.subr.bf16.mxu1 %v784_v47  ;;  %v751_v39 = vpack.c.bf16 %v371_v38, %v370_v37  ;;  %v465_v40 = vld [vmem:[%s1160_s4] ss:$0 sm:$0xff]  ;;  %p760_p0 = scmp.ne.s32.totalorder %s457_s8, %s759_s5  ;;  %p765_p2 = scmp.lt.s32.totalorder %s759_s5, %s759_s5 }
  0x29   :  { %710 = vmatpush3.bf16.msra.mxu0 %v709_v50  ;;  %v466_v45 = vld [vmem:[%s1162_s6] ss:$0 sm:$0xff] }
  0x2a   :  { %711 = vmatprep.subr.bf16.mxu0 %v784_v47  ;;  %p766_p3 = por %p765_p2, %p764_p1 }
  0x2b   :  { %734 = vmatpush3.bf16.msra.mxu1 %v733_v11 }
  0x2c   :  { %735 = vmatprep.subr.bf16.mxu1 %v784_v47  ;;  %p767_p4 = pnand %p766_p3, %p760_p0 }
  0x2d   :  { %713 = vmatpush3.bf16.msra.mxu0 %v712_v53 }
  0x2e   :  { %714 = vmatprep.subr.bf16.mxu0 %v784_v47 }
  0x2f   :  { %737 = vmatpush3.bf16.msra.mxu1 %v736_v14 }
  0x30   :  { %738 = vmatprep.subr.bf16.mxu1 %v784_v47 }
  0x31   :  { %716 = vmatpush3.bf16.msra.mxu0 %v715_v56 }
  0x32   :  { %717 = vmatprep.subr.bf16.mxu0 %v784_v47 }
  0x33   :  { %740 = vmatpush3.bf16.msra.mxu1 %v739_v17 }
  0x34   :  { %741 = vmatprep.subr.bf16.mxu1 %v784_v47 }
  0x35   :  { %719 = vmatpush3.bf16.msra.mxu0 %v718_v59 }
  0x36   :  { %720 = vmatprep.subr.bf16.mxu0 %v784_v47 }
  0x37   :  { %743 = vmatpush3.bf16.msra.mxu1 %v742_v20 }
  0x38   :  { %744 = vmatprep.subr.bf16.mxu1 %v784_v47 }
  0x39   :  { %722 = vmatpush3.bf16.msra.mxu0 %v721_v62 }
  0x3a   :  { %723 = vmatprep.subr.bf16.mxu0 %v784_v47 }
  0x3b   :  { %746 = vmatpush3.bf16.msra.mxu1 %v745_v23 }
  0x3c   :  { %747 = vmatprep.subr.bf16.mxu1 %v784_v47 }
  0x3d   :  { %725 = vmatpush3.bf16.msra.mxu0 %v724_v1 }
  0x3e   :  { %726 = vmatprep.subr.bf16.mxu0 %v784_v47 }
  0x3f   :  { %749 = vmatpush3.bf16.msra.mxu1 %v748_v26 }
  0x40   :  { %750 = vmatprep.subr.bf16.mxu1 %v784_v47 }
  0x41   :  { %728 = vmatpush3.bf16.msra.mxu0 %v727_v4 }
  0x43   :  { %752 = vmatpush3.bf16.msra.mxu1 %v751_v39 }
  0xf7   :  { %v499_v27 = vpop.f32.mrb[0].mxu0 }
  0xf8   :  { %v500_v29 = vpop.f32.mrb[1].mxu0 }
  0xf9   :  { %v534_v30 = vpop.f32.mrb[0].mxu1  ;;  %v501_v31 = vadd.f32 %v500_v29, %v499_v27 }
  0xfa   :  { %v535_v32 = vpop.f32.mrb[1].mxu1 }
  0xfb   :  { %v536_v33 = vadd.f32 %v535_v32, %v534_v30  ;;  %v188_v34 = vadd.f32 %v501_v31, %v464_v28 }
  0xfd   :  { %v258_v35 = vadd.f32 %v536_v33, %v188_v34 }
  0xff   :  { %v261_v36 = vmax.f32 %v258_v35, 0.0 }
 0x101   :  { %604 = vmatmul.mubr.f32.vlgmr.msra.gmra.mrb[2].mxu0 %v261_v36 }
 0x1d4   :  { %v351_v41 = vpop.f32.mrb[2].mxu0 }
 0x1d5   :  { %v352_v42 = vadd.f32 %v465_v40, %v351_v41  ;;  %v605_v43 = vpop.f32.mrb[3].mxu0 }
 0x1d7   :  { %v355_v44 = vmax.f32 %v352_v42, 0.0 }
 0x1d9   :  { %639 = vmatmul.mubr.f32.vlgmr.msra.gmra.mrb[2].mxu1 %v355_v44 }
 0x2ac   :  { %v445_v46 = vpop.f32.mrb[2].mxu1 }
 0x2ad   :  { %v446_v47 = vadd.f32 %v466_v45, %v445_v46  ;;  %v640_v48 = vpop.f32.mrb[3].mxu1 }
 0x2af   :  { %449 = vst [vmem:[#allocation2] sm:$0x3] %v446_v47 }
 0x2b0   :  { %770 = shalt.err (!%p767_p4)
}
 0x2b1   :  { %s771_s10 = scalar_lea.hbm %s1163_s7, 32 }
 0x2b2   :  { %p772_p5 = scmp.ne.s32.totalorder %s1163_s7, %s771_s10  ;;  %p775_p6 = scmp.lt.u32.totalorder %s771_s10, %s1163_s7 }
 0x2b4   :  { %p777_p7 = pnand %p775_p6, %p772_p5 }
 0x2b6   :  { %780 = shalt.err (!%p777_p7)
}
 0x2b7   :  { %459 = dma.vmem_to_hbm [thread:$0]  %s457_s8, 32, %s1163_s7, [#allocation3]  }
 0x2b8   :  { %781 = dma.done.wait [#allocation3], 32  }
 0x2b9   :  { %782 = vsyncadd [#allocation3], 4294967264 }
 0x2ba   :  { %463 = vsyncpa [#allocation3], 1 }

</bundles_post_ra>
